<compile_context>
chip_gen: v7x
topology: tpu7x:2x2x1
jax: 0.10.0
libtpu: 0.0.40
codegen_flags: <defaults>
</compile_context>

<pallas_src>
import functools

import jax
import jax.numpy as jnp
from jax.experimental import pallas as pl
from jax.experimental.pallas import tpu as pltpu


Z_DIM = 62
Z_PAD = 64                       # fc1 contraction dim padded for alignment
FC1 = 1024
FC2_C, FC2_H, FC2_W = 128, 7, 7
FC2 = FC2_C * FC2_H * FC2_W      # 6272
DC1_OUT = 64
IMG_C = 1
BN_EPS = 1e-5


# ----------------------------------------------------------------------------
# Pallas kernels
# ----------------------------------------------------------------------------

def linear_bn_relu_kernel(x_ref, w_ref, g_ref, be_ref, o_ref, *, eps):
    # x: (B, K) bf16, w: (K, tn) bf16, g/be: (1, tn) f32 -> o: (B, tn) bf16
    # Fused Linear -> BatchNorm1d (training-mode batch stats) -> ReLU.
    # The Linear bias is omitted: it is cancelled exactly by the BN mean sub.
    h = jnp.dot(x_ref[...], w_ref[...], preferred_element_type=jnp.float32)
    mean = jnp.mean(h, axis=0, keepdims=True)
    d = h - mean
    var = jnp.mean(d * d, axis=0, keepdims=True)          # centered (stable)
    y = d * jax.lax.rsqrt(var + eps)
    y = y * g_ref[...] + be_ref[...]
    o_ref[...] = jnp.maximum(y, 0.0).astype(o_ref.dtype)


def conv_bn_relu_kernel(p_ref, w_ref, g_ref, be_ref, o_ref, *, eps):
    # p: (4, 4*Cin, M) bf16  sub-pixel patches (one slab per output phase)
    # w: (4, Cout, 4*Cin) bf16 per-phase sub-kernels
    # g/be: (1, Cout, 1) f32  ->  o: (4, Cout, M) bf16
    # Fused ConvTranspose2d (sub-pixel form) -> BatchNorm2d -> ReLU.
    # The conv bias is omitted: it is cancelled by the BN mean subtraction.
    acc = jnp.einsum('pcr,prm->pcm', w_ref[...], p_ref[...],
                     preferred_element_type=jnp.float32)
    # Per-channel batch stats: phases x columns together cover all N*Ho*Wo.
    mean = jnp.mean(jnp.mean(acc, axis=0, keepdims=True), axis=2, keepdims=True)
    d = acc - mean
    var = jnp.mean(jnp.mean(d * d, axis=0, keepdims=True), axis=2, keepdims=True)
    y = d * jax.lax.rsqrt(var + eps)
    y = y * g_ref[...] + be_ref[...]
    o_ref[...] = jnp.maximum(y, 0.0).astype(o_ref.dtype)


def conv_tanh_kernel(p_ref, w_ref, b_ref, o_ref):
    # One output phase per grid step.
    # p: (1, 4*Cin, M) bf16, w: (1, Cout, 4*Cin) bf16, b: (1, 1, 1) f32
    acc = jnp.dot(w_ref[0], p_ref[0], preferred_element_type=jnp.float32)
    o_ref[0] = jnp.tanh(acc + b_ref[0])


# ----------------------------------------------------------------------------
# Wrappers around pallas_call
# ----------------------------------------------------------------------------

def linear_bn_relu(x, w, g, be, *, tn=None, eps=BN_EPS):
    """Fused y = relu(batchnorm(x @ w)), tiled over output columns."""
    B, K = x.shape
    _, N = w.shape
    if tn is None:
        tn = N
    assert N % tn == 0
    kernel = functools.partial(linear_bn_relu_kernel, eps=eps)
    return pl.pallas_call(
        kernel,
        out_shape=jax.ShapeDtypeStruct((B, N), jnp.bfloat16),
        grid=(N // tn,),
        in_specs=[
            pl.BlockSpec((B, K), lambda j: (0, 0)),
            pl.BlockSpec((K, tn), lambda j: (0, j)),
            pl.BlockSpec((1, tn), lambda j: (0, j)),
            pl.BlockSpec((1, tn), lambda j: (0, j)),
        ],
        out_specs=pl.BlockSpec((B, tn), lambda j: (0, j)),
        compiler_params=pltpu.CompilerParams(
            dimension_semantics=("parallel",),
            vmem_limit_bytes=32 * 1024 * 1024,
        ),
    )(x, w, g, be)


def conv_bn_relu(patches, w, g, be, *, eps=BN_EPS):
    """Sub-pixel conv-transpose matmul with fused BatchNorm2d + ReLU.

    Single invocation (whole-array VMEM) so the per-channel batch statistics
    stay tile-local across all 4 phases."""
    P, Cout, _ = w.shape
    M = patches.shape[-1]
    vmem = pltpu.MemorySpace.VMEM
    kernel = functools.partial(conv_bn_relu_kernel, eps=eps)
    return pl.pallas_call(
        kernel,
        out_shape=jax.ShapeDtypeStruct((P, Cout, M), jnp.bfloat16),
        in_specs=[pl.BlockSpec(memory_space=vmem)] * 4,
        out_specs=pl.BlockSpec(memory_space=vmem),
        compiler_params=pltpu.CompilerParams(
            vmem_limit_bytes=48 * 1024 * 1024,
        ),
    )(patches, w, g, be)


def conv_tanh(patches, w, b):
    """Sub-pixel conv-transpose matmul with fused bias + tanh (final layer).

    Grid over the 4 output phases; marked "parallel" so v7x's two TensorCores
    split the work (no effect on single-TC v5e/v6e)."""
    P, Cout, R = w.shape
    M = patches.shape[-1]
    return pl.pallas_call(
        conv_tanh_kernel,
        out_shape=jax.ShapeDtypeStruct((P, Cout, M), jnp.float32),
        grid=(P,),
        in_specs=[
            pl.BlockSpec((1, R, M), lambda ph: (ph, 0, 0)),
            pl.BlockSpec((1, Cout, R), lambda ph: (ph, 0, 0)),
            pl.BlockSpec((1, 1, 1), lambda ph: (0, 0, 0)),
        ],
        out_specs=pl.BlockSpec((1, Cout, M), lambda ph: (ph, 0, 0)),
        compiler_params=pltpu.CompilerParams(
            dimension_semantics=("parallel",),
            vmem_limit_bytes=32 * 1024 * 1024,
        ),
    )(patches, w, b)


# ----------------------------------------------------------------------------
# Sub-pixel decomposition helpers (XLA glue; dense, no zero-insertion)
# ----------------------------------------------------------------------------

def subpixel_patches(xc):
    """Phase patches for ConvTranspose2d(k=4, s=2, p=1) in CNHW layout.

    xc: (Cin, N, H, W)  ->  (4, 4*Cin, N*H*W) bf16.
    Phase ph = 2*py + px produces output pixels (2u+py, 2v+px); each phase is
    a dense stride-1 2x2 conv on the 1-padded input, so the zero-inserted taps
    of the classic im2col are never built.  Rows ordered (dy, dx, ci)."""
    C, N, H, W = xc.shape
    xp = jnp.pad(xc, ((0, 0), (0, 0), (1, 1), (1, 1)))
    phases = []
    for py in range(2):
        for px in range(2):
            taps = [xp[:, :, py + dy:py + dy + H, px + dx:px + dx + W]
                    for dy in range(2) for dx in range(2)]
            phases.append(jnp.stack(taps, axis=0).reshape(4 * C, N * H * W))
    return jnp.stack(phases, axis=0)


def pixel_shuffle(phase_out, C, N, H, W):
    """(4, C, N*H*W) phase-major conv output -> (C, N, 2H, 2W) CNHW image."""
    t = phase_out.reshape(2, 2, C, N, H, W)        # (py, px, c, n, u, v)
    t = jnp.transpose(t, (2, 3, 4, 0, 5, 1))       # (c, n, u, py, v, px)
    return t.reshape(C, N, 2 * H, 2 * W)


def subpixel_conv_weights(w_t):
    """PyTorch ConvTranspose2d weight (Cin, Cout, 4, 4) -> (4, Cout, 4*Cin)
    bf16 per-phase sub-kernels, tap order (dy, dx, ci) to match the patches."""
    Cin, Cout, _, _ = w_t.shape
    phases = []
    for py in range(2):
        for px in range(2):
            taps = [w_t[:, :, 3 - py - 2 * dy, 3 - px - 2 * dx]   # (Cin, Cout)
                    for dy in range(2) for dx in range(2)]
            wp = jnp.stack(taps, axis=0).reshape(4 * Cin, Cout)
            phases.append(wp.T)                                   # (Cout, 4*Cin)
    return jnp.stack(phases, axis=0).astype(jnp.bfloat16)


# ----------------------------------------------------------------------------
# Parameters & forward pass
# ----------------------------------------------------------------------------

def init_params(key):
    """Raw parameters in PyTorch layouts (f32).  fc1_b/fc2_b/dc1_b exist in
    the PyTorch model but are mathematically cancelled by training-mode BN,
    so they are not used by the Pallas forward pass."""
    ks = jax.random.split(key, 4)
    return {
        "fc1_w": jax.random.normal(ks[0], (Z_DIM, FC1), jnp.float32) * 0.05,
        "fc1_b": jnp.zeros((FC1,), jnp.float32),
        "bn1_g": jnp.ones((FC1,), jnp.float32),
        "bn1_b": jnp.zeros((FC1,), jnp.float32),
        "fc2_w": jax.random.normal(ks[1], (FC1, FC2), jnp.float32) * 0.05,
        "fc2_b": jnp.zeros((FC2,), jnp.float32),
        "bn2_g": jnp.ones((FC2,), jnp.float32),
        "bn2_b": jnp.zeros((FC2,), jnp.float32),
        # PyTorch ConvTranspose2d weight layout: (Cin, Cout, kH, kW)
        "dc1_w": jax.random.normal(ks[2], (FC2_C, DC1_OUT, 4, 4), jnp.float32) * 0.05,
        "dc1_b": jnp.zeros((DC1_OUT,), jnp.float32),
        "bn3_g": jnp.ones((DC1_OUT,), jnp.float32),
        "bn3_b": jnp.zeros((DC1_OUT,), jnp.float32),
        "dc2_w": jax.random.normal(ks[3], (DC1_OUT, IMG_C, 4, 4), jnp.float32) * 0.05,
        "dc2_b": jnp.zeros((IMG_C,), jnp.float32),
    }


def prepare_params(p):
    """One-time prep: bf16 casts, fc1 contraction padding 62->64, sub-pixel
    conv-weight reordering, gamma/beta reshapes.  Off the per-forward path."""
    fc1_w = jnp.zeros((Z_PAD, FC1), jnp.float32).at[:Z_DIM].set(p["fc1_w"])
    return {
        "fc1_w": fc1_w.astype(jnp.bfloat16),
        "bn1_g": p["bn1_g"].reshape(1, FC1),
        "bn1_b": p["bn1_b"].reshape(1, FC1),
        "fc2_w": p["fc2_w"].astype(jnp.bfloat16),
        "bn2_g": p["bn2_g"].reshape(1, FC2),
        "bn2_b": p["bn2_b"].reshape(1, FC2),
        "dc1_w": subpixel_conv_weights(p["dc1_w"]),      # (4, 64, 512)
        "bn3_g": p["bn3_g"].reshape(1, DC1_OUT, 1),
        "bn3_b": p["bn3_b"].reshape(1, DC1_OUT, 1),
        "dc2_w": subpixel_conv_weights(p["dc2_w"]),      # (4, 1, 256)
        "dc2_b": p["dc2_b"].reshape(1, 1, 1),
    }


def generator_forward(pp, x, y=None):
    """Matches generator.forward(x, y) with dataset='MNIST', conditional=False."""
    del y  # conditional=False: label is ignored
    B = x.shape[0]
    xb = jnp.pad(x.astype(jnp.bfloat16), ((0, 0), (0, Z_PAD - Z_DIM)))

    # Fused Linear + BN1d + ReLU  (B, 1024) then (B, 6272)
    h = linear_bn_relu(xb, pp["fc1_w"], pp["bn1_g"], pp["bn1_b"])
    h = linear_bn_relu(h, pp["fc2_w"], pp["bn2_g"], pp["bn2_b"], tn=896)

    # Channels-leading CNHW layout (avoids per-conv transposes).
    hc = jnp.transpose(h.reshape(B, FC2_C, FC2_H, FC2_W), (1, 0, 2, 3))

    # ConvTranspose2d(128->64) + BN2d + ReLU via sub-pixel phases.
    p1 = subpixel_patches(hc)                                    # (4, 512, B*49)
    c1 = conv_bn_relu(p1, pp["dc1_w"], pp["bn3_g"], pp["bn3_b"])  # (4, 64, B*49)
    c1 = pixel_shuffle(c1, DC1_OUT, B, FC2_H, FC2_W)             # (64, B, 14, 14)

    # ConvTranspose2d(64->1) + Tanh via sub-pixel phases.
    p2 = subpixel_patches(c1)                                    # (4, 256, B*196)
    img = conv_tanh(p2, pp["dc2_w"], pp["dc2_b"])                # (4, 1, B*196) f32
    img = pixel_shuffle(img, IMG_C, B, 2 * FC2_H, 2 * FC2_W)     # (1, B, 28, 28)
    return jnp.transpose(img, (1, 0, 2, 3))                      # (B, 1, 28, 28)


if __name__ == "__main__":
    key = jax.random.PRNGKey(0)
    pkey, zkey = jax.random.split(key)
    params = prepare_params(init_params(pkey))
    z = jax.random.normal(zkey, (2, Z_DIM), jnp.float32)

    fwd = jax.jit(generator_forward)
    out = jax.block_until_ready(fwd(params, z))

    assert out.shape == (2, 1, 28, 28), out.shape
    assert out.dtype == jnp.float32
    assert bool(jnp.all(jnp.isfinite(out)))
    assert bool(jnp.all(jnp.abs(out) <= 1.0))  # tanh output range
    print("KERNEL_OK")
</pallas_src>

<mosaic_0001>
module attributes {stable_mosaic.version = 11 : i64} {
  func.func @linear_bn_relu_kernel(%arg0: i32, %arg1: memref<2x64xbf16, #tpu.memory_space<vmem>>, %arg2: memref<64x1024xbf16, #tpu.memory_space<vmem>>, %arg3: memref<1x1024xf32, #tpu.memory_space<vmem>>, %arg4: memref<1x1024xf32, #tpu.memory_space<vmem>>, %arg5: memref<2x1024xbf16, #tpu.memory_space<vmem>>) attributes {dimension_semantics = [#tpu.dimension_semantics<parallel>], iteration_bounds = array<i64: 1>, scalar_prefetch = 0 : i64, scratch_operands = 0 : i64, tpu.core_type = #tpu.core_type<tc>, window_params = [{pipeline_mode = #tpu.pipeline_mode<synchronous>, transform_indices = @transform_0, window_bounds = array<i64: 2, 64>}, {transform_indices = @transform_1, window_bounds = array<i64: 64, 1024>}, {transform_indices = @transform_2, window_bounds = array<i64: 1, 1024>}, {transform_indices = @transform_3, window_bounds = array<i64: 1, 1024>}, {transform_indices = @transform_4, window_bounds = array<i64: 2, 1024>}]} {
    %c0 = arith.constant 0 : index
    %c0_0 = arith.constant 0 : index
    %0 = vector.load %arg1[%c0, %c0_0] : memref<2x64xbf16, #tpu.memory_space<vmem>>, vector<2x64xbf16>
    %c0_1 = arith.constant 0 : index
    %c0_2 = arith.constant 0 : index
    %1 = vector.load %arg2[%c0_1, %c0_2] : memref<64x1024xbf16, #tpu.memory_space<vmem>>, vector<64x1024xbf16>
    %cst = arith.constant dense<0.000000e+00> : vector<2x1024xf32>
    %2 = tpu.matmul %0, %1, %cst {dimension_numbers = #tpu.dot_dimension_numbers<[1], [0], [0], [1], [0, 0, 1, 1], [], []>} : vector<2x64xbf16>, vector<64x1024xbf16>, vector<2x1024xf32> -> vector<2x1024xf32>
    %cst_3 = arith.constant dense<0.000000e+00> : vector<1024xf32>
    %3 = vector.multi_reduction <add>, %2, %cst_3 [0] : vector<2x1024xf32> to vector<1024xf32>
    %4 = vector.shape_cast %3 : vector<1024xf32> to vector<1x1024xf32>
    %cst_4 = arith.constant 2.000000e+00 : f32
    %5 = vector.broadcast %cst_4 : f32 to vector<1x1024xf32>
    %6 = arith.divf %4, %5 : vector<1x1024xf32>
    %7 = vector.broadcast %6 : vector<1x1024xf32> to vector<2x1024xf32>
    %8 = arith.subf %2, %7 : vector<2x1024xf32>
    %9 = arith.mulf %8, %8 : vector<2x1024xf32>
    %cst_5 = arith.constant dense<0.000000e+00> : vector<1024xf32>
    %10 = vector.multi_reduction <add>, %9, %cst_5 [0] : vector<2x1024xf32> to vector<1024xf32>
    %11 = vector.shape_cast %10 : vector<1024xf32> to vector<1x1024xf32>
    %cst_6 = arith.constant 2.000000e+00 : f32
    %12 = vector.broadcast %cst_6 : f32 to vector<1x1024xf32>
    %13 = arith.divf %11, %12 : vector<1x1024xf32>
    %cst_7 = arith.constant 9.99999974E-6 : f32
    %14 = vector.broadcast %cst_7 : f32 to vector<1x1024xf32>
    %15 = arith.addf %13, %14 : vector<1x1024xf32>
    %16 = math.rsqrt %15 : vector<1x1024xf32>
    %17 = vector.broadcast %16 : vector<1x1024xf32> to vector<2x1024xf32>
    %18 = arith.mulf %8, %17 : vector<2x1024xf32>
    %c0_8 = arith.constant 0 : index
    %c0_9 = arith.constant 0 : index
    %19 = vector.load %arg3[%c0_8, %c0_9] : memref<1x1024xf32, #tpu.memory_space<vmem>>, vector<1x1024xf32>
    %20 = vector.broadcast %19 : vector<1x1024xf32> to vector<2x1024xf32>
    %21 = arith.mulf %18, %20 : vector<2x1024xf32>
    %c0_10 = arith.constant 0 : index
    %c0_11 = arith.constant 0 : index
    %22 = vector.load %arg4[%c0_10, %c0_11] : memref<1x1024xf32, #tpu.memory_space<vmem>>, vector<1x1024xf32>
    %23 = vector.broadcast %22 : vector<1x1024xf32> to vector<2x1024xf32>
    %24 = arith.addf %21, %23 : vector<2x1024xf32>
    %cst_12 = arith.constant 0.000000e+00 : f32
    %25 = vector.broadcast %cst_12 : f32 to vector<2x1024xf32>
    %26 = arith.maximumf %24, %25 : vector<2x1024xf32>
    %27 = arith.truncf %26 : vector<2x1024xf32> to vector<2x1024xbf16>
    %c0_13 = arith.constant 0 : index
    %c0_14 = arith.constant 0 : index
    %28 = vector.load %arg5[%c0_13, %c0_14] : memref<2x1024xbf16, #tpu.memory_space<vmem>>, vector<2x1024xbf16>
    tpu.vector_store %arg5[%c0_13, %c0_14], %27 {strides = array<i32>} : memref<2x1024xbf16, #tpu.memory_space<vmem>>, vector<2x1024xbf16>,
    return
  }
  func.func @transform_0(%arg0: i32) -> (i32, i32) {
    %c0_i32 = arith.constant 0 : i32
    %c0_i32_0 = arith.constant 0 : i32
    %c0_i32_1 = arith.constant 0 : i32
    return %c0_i32, %c0_i32_0 : i32, i32
  }
  func.func @transform_1(%arg0: i32) -> (i32, i32) {
    %c0_i32 = arith.constant 0 : i32
    %c0_i32_0 = arith.constant 0 : i32
    return %c0_i32, %arg0 : i32, i32
  }
  func.func @transform_2(%arg0: i32) -> (i32, i32) {
    %c0_i32 = arith.constant 0 : i32
    %c0_i32_0 = arith.constant 0 : i32
    return %c0_i32, %arg0 : i32, i32
  }
  func.func @transform_3(%arg0: i32) -> (i32, i32) {
    %c0_i32 = arith.constant 0 : i32
    %c0_i32_0 = arith.constant 0 : i32
    return %c0_i32, %arg0 : i32, i32
  }
  func.func @transform_4(%arg0: i32) -> (i32, i32) {
    %c0_i32 = arith.constant 0 : i32
    %c0_i32_0 = arith.constant 0 : i32
    return %c0_i32, %arg0 : i32, i32
  }
}

module attributes {stable_mosaic.version = 11 : i64} {
  func.func @linear_bn_relu_kernel(%arg0: i32, %arg1: memref<2x1024xbf16, #tpu.memory_space<vmem>>, %arg2: memref<1024x896xbf16, #tpu.memory_space<vmem>>, %arg3: memref<1x896xf32, #tpu.memory_space<vmem>>, %arg4: memref<1x896xf32, #tpu.memory_space<vmem>>, %arg5: memref<2x896xbf16, #tpu.memory_space<vmem>>) attributes {dimension_semantics = [#tpu.dimension_semantics<parallel>], iteration_bounds = array<i64: 7>, scalar_prefetch = 0 : i64, scratch_operands = 0 : i64, tpu.core_type = #tpu.core_type<tc>, window_params = [{pipeline_mode = #tpu.pipeline_mode<synchronous>, transform_indices = @transform_0, window_bounds = array<i64: 2, 1024>}, {transform_indices = @transform_1, window_bounds = array<i64: 1024, 896>}, {transform_indices = @transform_2, window_bounds = array<i64: 1, 896>}, {transform_indices = @transform_3, window_bounds = array<i64: 1, 896>}, {transform_indices = @transform_4, window_bounds = array<i64: 2, 896>}]} {
    %c0 = arith.constant 0 : index
    %c0_0 = arith.constant 0 : index
    %0 = vector.load %arg1[%c0, %c0_0] : memref<2x1024xbf16, #tpu.memory_space<vmem>>, vector<2x1024xbf16>
    %c0_1 = arith.constant 0 : index
    %c0_2 = arith.constant 0 : index
    %1 = vector.load %arg2[%c0_1, %c0_2] : memref<1024x896xbf16, #tpu.memory_space<vmem>>, vector<1024x896xbf16>
    %cst = arith.constant dense<0.000000e+00> : vector<2x896xf32>
    %2 = tpu.matmul %0, %1, %cst {dimension_numbers = #tpu.dot_dimension_numbers<[1], [0], [0], [1], [0, 0, 1, 1], [], []>} : vector<2x1024xbf16>, vector<1024x896xbf16>, vector<2x896xf32> -> vector<2x896xf32>
    %cst_3 = arith.constant dense<0.000000e+00> : vector<896xf32>
    %3 = vector.multi_reduction <add>, %2, %cst_3 [0] : vector<2x896xf32> to vector<896xf32>
    %4 = vector.shape_cast %3 : vector<896xf32> to vector<1x896xf32>
    %cst_4 = arith.constant 2.000000e+00 : f32
    %5 = vector.broadcast %cst_4 : f32 to vector<1x896xf32>
    %6 = arith.divf %4, %5 : vector<1x896xf32>
    %7 = vector.broadcast %6 : vector<1x896xf32> to vector<2x896xf32>
    %8 = arith.subf %2, %7 : vector<2x896xf32>
    %9 = arith.mulf %8, %8 : vector<2x896xf32>
    %cst_5 = arith.constant dense<0.000000e+00> : vector<896xf32>
    %10 = vector.multi_reduction <add>, %9, %cst_5 [0] : vector<2x896xf32> to vector<896xf32>
    %11 = vector.shape_cast %10 : vector<896xf32> to vector<1x896xf32>
    %cst_6 = arith.constant 2.000000e+00 : f32
    %12 = vector.broadcast %cst_6 : f32 to vector<1x896xf32>
    %13 = arith.divf %11, %12 : vector<1x896xf32>
    %cst_7 = arith.constant 9.99999974E-6 : f32
    %14 = vector.broadcast %cst_7 : f32 to vector<1x896xf32>
    %15 = arith.addf %13, %14 : vector<1x896xf32>
    %16 = math.rsqrt %15 : vector<1x896xf32>
    %17 = vector.broadcast %16 : vector<1x896xf32> to vector<2x896xf32>
    %18 = arith.mulf %8, %17 : vector<2x896xf32>
    %c0_8 = arith.constant 0 : index
    %c0_9 = arith.constant 0 : index
    %19 = vector.load %arg3[%c0_8, %c0_9] : memref<1x896xf32, #tpu.memory_space<vmem>>, vector<1x896xf32>
    %20 = vector.broadcast %19 : vector<1x896xf32> to vector<2x896xf32>
    %21 = arith.mulf %18, %20 : vector<2x896xf32>
    %c0_10 = arith.constant 0 : index
    %c0_11 = arith.constant 0 : index
    %22 = vector.load %arg4[%c0_10, %c0_11] : memref<1x896xf32, #tpu.memory_space<vmem>>, vector<1x896xf32>
    %23 = vector.broadcast %22 : vector<1x896xf32> to vector<2x896xf32>
    %24 = arith.addf %21, %23 : vector<2x896xf32>
    %cst_12 = arith.constant 0.000000e+00 : f32
    %25 = vector.broadcast %cst_12 : f32 to vector<2x896xf32>
    %26 = arith.maximumf %24, %25 : vector<2x896xf32>
    %27 = arith.truncf %26 : vector<2x896xf32> to vector<2x896xbf16>
    %c0_13 = arith.constant 0 : index
    %c0_14 = arith.constant 0 : index
    %28 = vector.load %arg5[%c0_13, %c0_14] : memref<2x896xbf16, #tpu.memory_space<vmem>>, vector<2x896xbf16>
    tpu.vector_store %arg5[%c0_13, %c0_14], %27 {strides = array<i32>} : memref<2x896xbf16, #tpu.memory_space<vmem>>, vector<2x896xbf16>,
    return
  }
  func.func @transform_0(%arg0: i32) -> (i32, i32) {
    %c0_i32 = arith.constant 0 : i32
    %c0_i32_0 = arith.constant 0 : i32
    %c0_i32_1 = arith.constant 0 : i32
    return %c0_i32, %c0_i32_0 : i32, i32
  }
  func.func @transform_1(%arg0: i32) -> (i32, i32) {
    %c0_i32 = arith.constant 0 : i32
    %c0_i32_0 = arith.constant 0 : i32
    return %c0_i32, %arg0 : i32, i32
  }
  func.func @transform_2(%arg0: i32) -> (i32, i32) {
    %c0_i32 = arith.constant 0 : i32
    %c0_i32_0 = arith.constant 0 : i32
    return %c0_i32, %arg0 : i32, i32
  }
  func.func @transform_3(%arg0: i32) -> (i32, i32) {
    %c0_i32 = arith.constant 0 : i32
    %c0_i32_0 = arith.constant 0 : i32
    return %c0_i32, %arg0 : i32, i32
  }
  func.func @transform_4(%arg0: i32) -> (i32, i32) {
    %c0_i32 = arith.constant 0 : i32
    %c0_i32_0 = arith.constant 0 : i32
    return %c0_i32, %arg0 : i32, i32
  }
}

module attributes {stable_mosaic.version = 11 : i64} {
  func.func @conv_bn_relu_kernel(%arg0: memref<4x512x98xbf16, #tpu.memory_space<vmem>>, %arg1: memref<4x64x512xbf16, #tpu.memory_space<vmem>>, %arg2: memref<1x64x1xf32, #tpu.memory_space<vmem>>, %arg3: memref<1x64x1xf32, #tpu.memory_space<vmem>>, %arg4: memref<4x64x98xbf16, #tpu.memory_space<vmem>>) attributes {dimension_semantics = [], scalar_prefetch = 0 : i64, scratch_operands = 0 : i64, tpu.core_type = #tpu.core_type<tc>} {
    %c0 = arith.constant 0 : index
    %c0_0 = arith.constant 0 : index
    %c0_1 = arith.constant 0 : index
    %0 = vector.load %arg1[%c0, %c0_0, %c0_1] : memref<4x64x512xbf16, #tpu.memory_space<vmem>>, vector<4x64x512xbf16>
    %c0_2 = arith.constant 0 : index
    %c0_3 = arith.constant 0 : index
    %c0_4 = arith.constant 0 : index
    %1 = vector.load %arg0[%c0_2, %c0_3, %c0_4] : memref<4x512x98xbf16, #tpu.memory_space<vmem>>, vector<4x512x98xbf16>
    "tpu.trace_start"() <{level = 10 : i32, message = "pcr,prm->pcm"}> : () -> ()
    %cst = arith.constant dense<0.000000e+00> : vector<4x64x98xf32>
    %2 = tpu.matmul %0, %1, %cst {dimension_numbers = #tpu.dot_dimension_numbers<[2], [1], [1], [2], [0, 0, 0, 1, 1, 2], [0], [0]>} : vector<4x64x512xbf16>, vector<4x512x98xbf16>, vector<4x64x98xf32> -> vector<4x64x98xf32>
    "tpu.trace_stop"() : () -> ()
    %cst_5 = arith.constant dense<0.000000e+00> : vector<64x98xf32>
    %3 = vector.multi_reduction <add>, %2, %cst_5 [0] : vector<4x64x98xf32> to vector<64x98xf32>
    %4 = vector.shape_cast %3 : vector<64x98xf32> to vector<1x64x98xf32>
    %cst_6 = arith.constant 4.000000e+00 : f32
    %5 = vector.broadcast %cst_6 : f32 to vector<1x64x98xf32>
    %6 = arith.divf %4, %5 : vector<1x64x98xf32>
    %cst_7 = arith.constant dense<0.000000e+00> : vector<1x64xf32>
    %7 = vector.multi_reduction <add>, %6, %cst_7 [2] : vector<1x64x98xf32> to vector<1x64xf32>
    %8 = vector.shape_cast %7 : vector<1x64xf32> to vector<1x64x1xf32>
    %cst_8 = arith.constant 9.800000e+01 : f32
    %9 = vector.broadcast %cst_8 : f32 to vector<1x64x1xf32>
    %10 = arith.divf %8, %9 : vector<1x64x1xf32>
    %11 = vector.broadcast %10 : vector<1x64x1xf32> to vector<4x64x98xf32>
    %12 = arith.subf %2, %11 : vector<4x64x98xf32>
    %13 = arith.mulf %12, %12 : vector<4x64x98xf32>
    %cst_9 = arith.constant dense<0.000000e+00> : vector<64x98xf32>
    %14 = vector.multi_reduction <add>, %13, %cst_9 [0] : vector<4x64x98xf32> to vector<64x98xf32>
    %15 = vector.shape_cast %14 : vector<64x98xf32> to vector<1x64x98xf32>
    %cst_10 = arith.constant 4.000000e+00 : f32
    %16 = vector.broadcast %cst_10 : f32 to vector<1x64x98xf32>
    %17 = arith.divf %15, %16 : vector<1x64x98xf32>
    %cst_11 = arith.constant dense<0.000000e+00> : vector<1x64xf32>
    %18 = vector.multi_reduction <add>, %17, %cst_11 [2] : vector<1x64x98xf32> to vector<1x64xf32>
    %19 = vector.shape_cast %18 : vector<1x64xf32> to vector<1x64x1xf32>
    %cst_12 = arith.constant 9.800000e+01 : f32
    %20 = vector.broadcast %cst_12 : f32 to vector<1x64x1xf32>
    %21 = arith.divf %19, %20 : vector<1x64x1xf32>
    %cst_13 = arith.constant 9.99999974E-6 : f32
    %22 = vector.broadcast %cst_13 : f32 to vector<1x64x1xf32>
    %23 = arith.addf %21, %22 : vector<1x64x1xf32>
    %24 = math.rsqrt %23 : vector<1x64x1xf32>
    %25 = vector.broadcast %24 : vector<1x64x1xf32> to vector<4x64x98xf32>
    %26 = arith.mulf %12, %25 : vector<4x64x98xf32>
    %c0_14 = arith.constant 0 : index
    %c0_15 = arith.constant 0 : index
    %c0_16 = arith.constant 0 : index
    %27 = vector.load %arg2[%c0_14, %c0_15, %c0_16] : memref<1x64x1xf32, #tpu.memory_space<vmem>>, vector<1x64x1xf32>
    %28 = vector.broadcast %27 : vector<1x64x1xf32> to vector<4x64x98xf32>
    %29 = arith.mulf %26, %28 : vector<4x64x98xf32>
    %c0_17 = arith.constant 0 : index
    %c0_18 = arith.constant 0 : index
    %c0_19 = arith.constant 0 : index
    %30 = vector.load %arg3[%c0_17, %c0_18, %c0_19] : memref<1x64x1xf32, #tpu.memory_space<vmem>>, vector<1x64x1xf32>
    %31 = vector.broadcast %30 : vector<1x64x1xf32> to vector<4x64x98xf32>
    %32 = arith.addf %29, %31 : vector<4x64x98xf32>
    %cst_20 = arith.constant 0.000000e+00 : f32
    %33 = vector.broadcast %cst_20 : f32 to vector<4x64x98xf32>
    %34 = arith.maximumf %32, %33 : vector<4x64x98xf32>
    %35 = arith.truncf %34 : vector<4x64x98xf32> to vector<4x64x98xbf16>
    %c0_21 = arith.constant 0 : index
    %c0_22 = arith.constant 0 : index
    %c0_23 = arith.constant 0 : index
    %36 = vector.load %arg4[%c0_21, %c0_22, %c0_23] : memref<4x64x98xbf16, #tpu.memory_space<vmem>>, vector<4x64x98xbf16>
    tpu.vector_store %arg4[%c0_21, %c0_22, %c0_23], %35 {strides = array<i32>} : memref<4x64x98xbf16, #tpu.memory_space<vmem>>, vector<4x64x98xbf16>,
    return
  }
}

module attributes {stable_mosaic.version = 11 : i64} {
  func.func @conv_tanh_kernel(%arg0: i32, %arg1: memref<1x256x392xbf16, #tpu.memory_space<vmem>>, %arg2: memref<1x1x256xbf16, #tpu.memory_space<vmem>>, %arg3: memref<1x1x1xf32, #tpu.memory_space<vmem>>, %arg4: memref<1x1x392xf32, #tpu.memory_space<vmem>>) attributes {dimension_semantics = [#tpu.dimension_semantics<parallel>], iteration_bounds = array<i64: 4>, scalar_prefetch = 0 : i64, scratch_operands = 0 : i64, tpu.core_type = #tpu.core_type<tc>, window_params = [{transform_indices = @transform_0, window_bounds = array<i64: 1, 256, 392>}, {transform_indices = @transform_1, window_bounds = array<i64: 1, 1, 256>}, {pipeline_mode = #tpu.pipeline_mode<synchronous>, transform_indices = @transform_2, window_bounds = array<i64: 1, 1, 1>}, {transform_indices = @transform_3, window_bounds = array<i64: 1, 1, 392>}]} {
    %c0 = arith.constant 0 : index
    %c0_0 = arith.constant 0 : index
    %c0_1 = arith.constant 0 : index
    %0 = vector.load %arg2[%c0, %c0_0, %c0_1] : memref<1x1x256xbf16, #tpu.memory_space<vmem>>, vector<1x1x256xbf16>
    %1 = vector.shape_cast %0 : vector<1x1x256xbf16> to vector<1x256xbf16>
    %c0_2 = arith.constant 0 : index
    %c0_3 = arith.constant 0 : index
    %c0_4 = arith.constant 0 : index
    %2 = vector.load %arg1[%c0_2, %c0_3, %c0_4] : memref<1x256x392xbf16, #tpu.memory_space<vmem>>, vector<1x256x392xbf16>
    %3 = vector.shape_cast %2 : vector<1x256x392xbf16> to vector<256x392xbf16>
    %cst = arith.constant dense<0.000000e+00> : vector<1x392xf32>
    %4 = tpu.matmul %1, %3, %cst {dimension_numbers = #tpu.dot_dimension_numbers<[1], [0], [0], [1], [0, 0, 1, 1], [], []>} : vector<1x256xbf16>, vector<256x392xbf16>, vector<1x392xf32> -> vector<1x392xf32>
    %c0_5 = arith.constant 0 : index
    %c0_6 = arith.constant 0 : index
    %c0_7 = arith.constant 0 : index
    %5 = vector.load %arg3[%c0_5, %c0_6, %c0_7] : memref<1x1x1xf32, #tpu.memory_space<vmem>>, vector<1x1x1xf32>
    %6 = vector.shape_cast %5 : vector<1x1x1xf32> to vector<1x1xf32>
    %7 = vector.broadcast %6 : vector<1x1xf32> to vector<1x392xf32>
    %8 = arith.addf %4, %7 : vector<1x392xf32>
    %9 = math.tanh %8 : vector<1x392xf32>
    %c0_8 = arith.constant 0 : index
    %c0_9 = arith.constant 0 : index
    %c0_10 = arith.constant 0 : index
    %10 = vector.load %arg4[%c0_8, %c0_9, %c0_10] : memref<1x1x392xf32, #tpu.memory_space<vmem>>, vector<1x1x392xf32>
    %11 = vector.shape_cast %10 : vector<1x1x392xf32> to vector<1x392xf32>
    %12 = vector.shape_cast %9 : vector<1x392xf32> to vector<1x1x392xf32>
    tpu.vector_store %arg4[%c0_8, %c0_9, %c0_10], %12 {strides = array<i32>} : memref<1x1x392xf32, #tpu.memory_space<vmem>>, vector<1x1x392xf32>,
    return
  }
  func.func @transform_0(%arg0: i32) -> (i32, i32, i32) {
    %c0_i32 = arith.constant 0 : i32
    %c0_i32_0 = arith.constant 0 : i32
    %c0_i32_1 = arith.constant 0 : i32
    return %arg0, %c0_i32, %c0_i32_0 : i32, i32, i32
  }
  func.func @transform_1(%arg0: i32) -> (i32, i32, i32) {
    %c0_i32 = arith.constant 0 : i32
    %c0_i32_0 = arith.constant 0 : i32
    %c0_i32_1 = arith.constant 0 : i32
    return %arg0, %c0_i32, %c0_i32_0 : i32, i32, i32
  }
  func.func @transform_2(%arg0: i32) -> (i32, i32, i32) {
    %c0_i32 = arith.constant 0 : i32
    %c0_i32_0 = arith.constant 0 : i32
    %c0_i32_1 = arith.constant 0 : i32
    %c0_i32_2 = arith.constant 0 : i32
    return %c0_i32, %c0_i32_0, %c0_i32_1 : i32, i32, i32
  }
  func.func @transform_3(%arg0: i32) -> (i32, i32, i32) {
    %c0_i32 = arith.constant 0 : i32
    %c0_i32_0 = arith.constant 0 : i32
    %c0_i32_1 = arith.constant 0 : i32
    return %arg0, %c0_i32, %c0_i32_0 : i32, i32, i32
  }
}

</mosaic_0001>

<bundles_post_ra>
// kernel: generator_forward.4
= control target key start
LH: loop header
LB: loop body
LE: loop exit
PB: predicated region body
PF: predicated region fallthrough
CT: control target
= control target key end

     0   :  { %9 = vsyncpa [#allocation3], 0  ;;  %s1092_s0 = inlined_call_operand.vmem [shape: bf16[2,64], index: 0, kind: input, shape index: {}]   ;;  %s1093_s1 = inlined_call_operand.hbm [shape: bf16[64,1024], index: 1, kind: input, shape index: {}]   ;;  %s1094_s2 = inlined_call_operand.hbm [shape: f32[1,1024], index: 2, kind: input, shape index: {}]   ;;  %s1095_s3 = inlined_call_operand.hbm [shape: f32[1,1024], index: 3, kind: input, shape index: {}]   ;;  %s1096_s4 = inlined_call_operand.vmem [shape: bf16[2,1024], index: 4, kind: output, shape index: {}]  }
   0x1   :  { %10 = vsyncpa [#allocation5], 0  ;;  %s900_s15 = smov [#allocation4]   ;;  %s901_s17 = smov [#allocation2]  }
   0x2   :  { %s31_s16 = sshll.u32 %s900_s15, 4  ;;  %s18_s18 = sshll.u32 %s901_s17, 4  ;;  %s32_s16 = int_to_ptr.vmem [resolvable:$true] %s31_s16  ;;  %s932_s18 = int_to_ptr.vmem [resolvable:$true] %s18_s18 }
   0x3   :  { %s830_s21 = scalar_lea.hbm %s1094_s2, 128 }
   0x4   :  { %p831_p0 = scmp.ne.s32.totalorder %s1094_s2, %s830_s21  ;;  %p834_p1 = scmp.lt.u32.totalorder %s830_s21, %s1094_s2 }
   0x6   :  { %p836_p2 = pnand %p834_p1, %p831_p0 }
   0x8   :  { %839 = shalt.err (!%p836_p2)
}
   0x9   :  { %s840_s26 = scalar_lea.vmem %s32_s16, 128  ;;  %p845_p4 = scmp.lt.s32.totalorder %s32_s16, %s32_s16 }
   0xa   :  { %p841_p3 = scmp.ne.s32.totalorder %s32_s16, %s840_s26  ;;  %p846_p5 = scmp.lt.s32.totalorder %s840_s26, %s840_s26 }
   0xc   :  { %p847_p6 = por %p846_p5, %p845_p4 }
   0xe   :  { %p848_p7 = pnand %p847_p6, %p841_p3 }
  0x10   :  { %851 = shalt.err (!%p848_p7)
}
  0x11   :  { %34 = dma.hbm_to_vmem [thread:$0]  %s1094_s2, 128, %s32_s16, [#allocation5]  }
  0x12   :  { %s852_s5 = scalar_lea.hbm %s1093_s1, 4096 }
  0x13   :  { %p853_p8 = scmp.ne.s32.totalorder %s1093_s1, %s852_s5  ;;  %p856_p9 = scmp.lt.u32.totalorder %s852_s5, %s1093_s1 }
  0x15   :  { %p858_p10 = pnand %p856_p9, %p853_p8 }
  0x17   :  { %861 = shalt.err (!%p858_p10)
}
  0x18   :  { %s862_s10 = scalar_lea.vmem %s932_s18, 4096  ;;  %p867_p12 = scmp.lt.s32.totalorder %s932_s18, %s932_s18 }
  0x19   :  { %p863_p11 = scmp.ne.s32.totalorder %s932_s18, %s862_s10  ;;  %p868_p13 = scmp.lt.s32.totalorder %s862_s10, %s862_s10 }
  0x1b   :  { %p869_p0 = por %p868_p13, %p867_p12 }
  0x1d   :  { %p870_p1 = pnand %p869_p0, %p863_p11 }
  0x1f   :  { %873 = shalt.err (!%p870_p1)
}
  0x20   :  { %s902_s2 = smov 512   ;;  %s903_s11 = smov 32  }
  0x21   :  { %24 = dma.hbm_to_vmem [thread:$0]  %s1093_s1, 4096, %s932_s18, [#allocation3], %s902_s2, %s902_s2, %s903_s11  }
  0x22   :  { %s904_s14 = smov [#allocation6]   ;;  %s874_s19 = scalar_lea.hbm %s1095_s3, 128 }
  0x23   :  { %s41_s15 = sshll.u32 %s904_s14, 4  ;;  %p875_p2 = scmp.ne.s32.totalorder %s1095_s3, %s874_s19  ;;  %s42_s15 = int_to_ptr.vmem [resolvable:$true] %s41_s15 }
  0x24   :  { %p878_p3 = scmp.lt.u32.totalorder %s874_s19, %s1095_s3 }
  0x26   :  { %p880_p4 = pnand %p878_p3, %p875_p2 }
  0x28   :  { %883 = shalt.err (!%p880_p4)
}
  0x29   :  { %s884_s24 = scalar_lea.vmem %s42_s15, 128  ;;  %p889_p6 = scmp.lt.s32.totalorder %s42_s15, %s42_s15 }
  0x2a   :  { %p885_p5 = scmp.ne.s32.totalorder %s42_s15, %s884_s24  ;;  %p890_p7 = scmp.lt.s32.totalorder %s884_s24, %s884_s24 }
  0x2c   :  { %p891_p8 = por %p890_p7, %p889_p6 }
  0x2e   :  { %p892_p9 = pnand %p891_p8, %p885_p5 }
  0x30   :  { %895 = shalt.err (!%p892_p9)
}
  0x31   :  { %44 = dma.hbm_to_vmem [thread:$0]  %s1095_s3, 128, %s42_s15, [#allocation5]  }
  0x32   :  { %896 = dma.done.wait [#allocation3], 4096  }
  0x33   :  { %897 = vsyncadd [#allocation3], 4294963200 }
  0x34   :  { %898 = dma.done.wait [#allocation5], 256  }
  0x35   :  { %899 = vsyncadd [#allocation5], 4294967040  ;;  %v905_v0 = vmov 0   ;;  %v56_v1 = vld [vmem:[#allocation2] sm:$0xff]  ;;  %v57_v3 = vld [vmem:[#allocation2 + $0x8] sm:$0xff]  ;;  %vm248_vm0 = vcmask 523264  }
  0x36   :  { %284 = vmatprep.mubr.bf16.mxu0 %v905_v0  ;;  %325 = vmatprep.mubr.bf16.mxu1 %v905_v0  ;;  %v60_v2 = vld [vmem:[#allocation2 + $0x20] sm:$0xff]  ;;  %v61_v5 = vld [vmem:[#allocation2 + $0x28] sm:$0xff]  ;;  %v58_v31 = vld [vmem:[#allocation2 + $0x10] sm:$0xff]  ;;  %vm416_vm1 = vcmask 1041408  }
  0x37   :  { %v768_v4 = vcombine.high %v56_v1, %v60_v2  ;;  %v767_v6 = vcombine.low %v56_v1, %v60_v2  ;;  %v64_v7 = vld [vmem:[#allocation2 + $0x40] sm:$0xff]  ;;  %v770_v9 = vcombine.high %v57_v3, %v61_v5  ;;  %v769_v10 = vcombine.low %v57_v3, %v61_v5  ;;  %v65_v12 = vld [vmem:[#allocation2 + $0x48] sm:$0xff]  ;;  %v62_v32 = vld [vmem:[#allocation2 + $0x30] sm:$0xff] }
  0x38   :  { %v68_v8 = vld [vmem:[#allocation2 + $0x60] sm:$0xff]  ;;  %v69_v13 = vld [vmem:[#allocation2 + $0x68] sm:$0xff]  ;;  %v59_v33 = vld [vmem:[#allocation2 + $0x18] sm:$0xff]  ;;  %v772_v37 = vcombine.high %v58_v31, %v62_v32  ;;  %v771_v44 = vcombine.low %v58_v31, %v62_v32 }
  0x39   :  { %v776_v11 = vcombine.high %v64_v7, %v68_v8  ;;  %v72_v14 = vld [vmem:[#allocation2 + $0x80] sm:$0xff]  ;;  %252 = vmatprep.subr.bf16.mxu0 %v768_v4  ;;  %v778_v15 = vcombine.high %v65_v12, %v69_v13  ;;  %v73_v17 = vld [vmem:[#allocation2 + $0x88] sm:$0xff]  ;;  %293 = vmatprep.subr.bf16.mxu1 %v770_v9  ;;  %v775_v19 = vcombine.low %v64_v7, %v68_v8  ;;  %v63_v34 = vld [vmem:[#allocation2 + $0x38] sm:$0xff] }
  0x3a   :  { %v76_v16 = vld [vmem:[#allocation2 + $0xa0] sm:$0xff]  ;;  %v77_v18 = vld [vmem:[#allocation2 + $0xa8] sm:$0xff]  ;;  %253 = vmatpush1.bf16.msra.mxu0 %v767_v6  ;;  %294 = vmatpush1.bf16.msra.mxu1 %v769_v10  ;;  %v777_v20 = vcombine.low %v65_v12, %v69_v13  ;;  %v774_v38 = vcombine.high %v59_v33, %v63_v34  ;;  %v66_v39 = vld [vmem:[#allocation2 + $0x50] sm:$0xff]  ;;  %v773_v45 = vcombine.low %v59_v33, %v63_v34 }
  0x3b   :  { %254 = vmatprep.subr.bf16.mxu0 %v776_v11  ;;  %v784_v21 = vcombine.high %v72_v14, %v76_v16  ;;  %295 = vmatprep.subr.bf16.mxu1 %v778_v15  ;;  %v786_v22 = vcombine.high %v73_v17, %v77_v18  ;;  %v80_v23 = vld [vmem:[#allocation2 + $0xc0] sm:$0xff]  ;;  %v81_v25 = vld [vmem:[#allocation2 + $0xc8] sm:$0xff]  ;;  %v783_v27 = vcombine.low %v72_v14, %v76_v16  ;;  %v70_v40 = vld [vmem:[#allocation2 + $0x70] sm:$0xff] }
  0x3c   :  { %v84_v24 = vld [vmem:[#allocation2 + $0xe0] sm:$0xff]  ;;  %v85_v26 = vld [vmem:[#allocation2 + $0xe8] sm:$0xff]  ;;  %v785_v28 = vcombine.low %v73_v17, %v77_v18  ;;  %v67_v41 = vld [vmem:[#allocation2 + $0x58] sm:$0xff]  ;;  %v780_v46 = vcombine.high %v66_v39, %v70_v40  ;;  %v779_v52 = vcombine.low %v66_v39, %v70_v40 }
  0x3d   :  { %v792_v29 = vcombine.high %v80_v23, %v84_v24  ;;  %v794_v30 = vcombine.high %v81_v25, %v85_v26  ;;  %v791_v35 = vcombine.low %v80_v23, %v84_v24  ;;  %v793_v36 = vcombine.low %v81_v25, %v85_v26  ;;  %v71_v42 = vld [vmem:[#allocation2 + $0x78] sm:$0xff]  ;;  %v55_v43 = vld [vmem:[%s1092_s0] sm:$0x1]  ;;  %v74_v48 = vld [vmem:[#allocation2 + $0x90] sm:$0xff] }
  0x3e   :  { %255 = vmatpush1.bf16.msra.mxu0 %v775_v19  ;;  %296 = vmatpush1.bf16.msra.mxu1 %v777_v20  ;;  %v782_v47 = vcombine.high %v67_v41, %v71_v42  ;;  %v78_v49 = vld [vmem:[#allocation2 + $0xb0] sm:$0xff]  ;;  %v75_v50 = vld [vmem:[#allocation2 + $0x98] sm:$0xff]  ;;  %v781_v53 = vcombine.low %v67_v41, %v71_v42 }
  0x3f   :  { %256 = vmatprep.subr.bf16.mxu0 %v784_v21  ;;  %297 = vmatprep.subr.bf16.mxu1 %v786_v22  ;;  %v79_v51 = vld [vmem:[#allocation2 + $0xb8] sm:$0xff]  ;;  %v788_v54 = vcombine.high %v74_v48, %v78_v49  ;;  %v82_v56 = vld [vmem:[#allocation2 + $0xd0] sm:$0xff]  ;;  %v787_v60 = vcombine.low %v74_v48, %v78_v49 }
  0x40   :  { %v790_v55 = vcombine.high %v75_v50, %v79_v51  ;;  %v86_v57 = vld [vmem:[#allocation2 + $0xf0] sm:$0xff]  ;;  %v83_v58 = vld [vmem:[#allocation2 + $0xd8] sm:$0xff]  ;;  %v789_v61 = vcombine.low %v75_v50, %v79_v51 }
  0x41   :  { %v87_v59 = vld [vmem:[#allocation2 + $0xf8] sm:$0xff]  ;;  %v796_v62 = vcombine.high %v82_v56, %v86_v57  ;;  %v795_v1 = vcombine.low %v82_v56, %v86_v57 }
  0x42   :  { %257 = vmatpush1.bf16.msra.mxu0 %v783_v27  ;;  %298 = vmatpush1.bf16.msra.mxu1 %v785_v28  ;;  %v798_v63 = vcombine.high %v83_v58, %v87_v59  ;;  %v797_v2 = vcombine.low %v83_v58, %v87_v59 }
  0x43   :  { %258 = vmatprep.subr.bf16.mxu0 %v792_v29  ;;  %299 = vmatprep.subr.bf16.mxu1 %v794_v30 }
  0x46   :  { %259 = vmatpush1.bf16.msra.mxu0 %v791_v35  ;;  %300 = vmatpush1.bf16.msra.mxu1 %v793_v36  ;;  %v588_v35 = vlaneseq }
  0x47   :  { %334 = vmatprep.subr.bf16.mxu0 %v772_v37  ;;  %375 = vmatprep.subr.bf16.mxu1 %v774_v38 }
  0x49   :  { %799 = vmatmul.mubr.msk.bf16.vlgmr.msra.gmra.mrb[0].mxu0 %vm248_vm0, %v55_v43  ;;  %800 = vmatmul.mubr.msk.bf16.vlgmr.msra.gmra.mrb[0].mxu1 %vm248_vm0, %v55_v43 }
  0x4a   :  { %335 = vmatpush1.bf16.msra.mxu0 %v771_v44  ;;  %376 = vmatpush1.bf16.msra.mxu1 %v773_v45  ;;  %v994_v45 = vshrl.u32 %v588_v35, 7 }
  0x4b   :  { %336 = vmatprep.subr.bf16.mxu0 %v780_v46  ;;  %377 = vmatprep.subr.bf16.mxu1 %v782_v47 }
  0x4c   :  { %366 = vmatprep.mubr.bf16.mxu0 %v905_v0  ;;  %407 = vmatprep.mubr.bf16.mxu1 %v905_v0 }
  0x4e   :  { %337 = vmatpush1.bf16.msra.mxu0 %v779_v52  ;;  %378 = vmatpush1.bf16.msra.mxu1 %v781_v53 }
  0x4f   :  { %338 = vmatprep.subr.bf16.mxu0 %v788_v54  ;;  %379 = vmatprep.subr.bf16.mxu1 %v790_v55 }
  0x52   :  { %339 = vmatpush1.bf16.msra.mxu0 %v787_v60  ;;  %380 = vmatpush1.bf16.msra.mxu1 %v789_v61 }
  0x53   :  { %340 = vmatprep.subr.bf16.mxu0 %v796_v62  ;;  %381 = vmatprep.subr.bf16.mxu1 %v798_v63 }
  0x56   :  { %341 = vmatpush1.bf16.msra.mxu0 %v795_v1  ;;  %382 = vmatpush1.bf16.msra.mxu1 %v797_v2 }
  0x59   :  { %801 = vmatmul.mubr.msk.bf16.vlgmr.msra.gmra.mrb[4].mxu0 %vm248_vm0, %v55_v43  ;;  %802 = vmatmul.mubr.msk.bf16.vlgmr.msra.gmra.mrb[4].mxu1 %vm248_vm0, %v55_v43 }
 0x11c   :  { %v286_v0 = vpop.f32.mrb[0].mxu0  ;;  %v327_v4 = vpop.f32.mrb[0].mxu1 }
 0x11d   :  { %v417_v3 = vsel %vm416_vm1, %v286_v0, 0.0  ;;  %v288_v5 = vpop.f32.mrb[1].mxu0  ;;  %v431_v7 = vsel %vm416_vm1, %v327_v4, 0.0  ;;  %v329_v9 = vpop.f32.mrb[1].mxu1 }
 0x11e   :  { %v418_v6 = vrot.slane %v417_v3, 4  ;;  %v424_v8 = vsel %vm416_vm1, %v288_v5, 0.0  ;;  %v290_v10 = vpop.f32.mrb[2].mxu0  ;;  %v432_v11 = vrot.slane %v431_v7, 4  ;;  %v438_v13 = vsel %vm416_vm1, %v329_v9, 0.0  ;;  %v331_v14 = vpop.f32.mrb[2].mxu1 }
 0x11f   :  { %v425_v12 = vrot.slane %v424_v8, 4  ;;  %v291_v15 = vpop.f32.mrb[3].mxu0  ;;  %v439_v17 = vrot.slane %v438_v13, 4  ;;  %v332_v18 = vpop.f32.mrb[3].mxu1 }
 0x120   :  { %v419_v16 = vadd.f32 %v418_v6, %v417_v3  ;;  %v433_v19 = vadd.f32 %v432_v11, %v431_v7 }
 0x121   :  { %v426_v20 = vadd.f32 %v425_v12, %v424_v8  ;;  %v440_v22 = vadd.f32 %v439_v17, %v438_v13 }
 0x122   :  { %v420_v21 = vrot.slane %v419_v16, 2  ;;  %v434_v23 = vrot.slane %v433_v19, 2 }
 0x123   :  { %v427_v24 = vrot.slane %v426_v20, 2  ;;  %v441_v26 = vrot.slane %v440_v22, 2 }
 0x124   :  { %v421_v25 = vadd.f32 %v420_v21, %v419_v16  ;;  %v435_v27 = vadd.f32 %v434_v23, %v433_v19 }
 0x125   :  { %v428_v28 = vadd.f32 %v427_v24, %v426_v20  ;;  %v442_v30 = vadd.f32 %v441_v26, %v440_v22 }
 0x126   :  { %v422_v29 = vrot.slane %v421_v25, 1  ;;  %v436_v31 = vrot.slane %v435_v27, 1 }
 0x127   :  { %v429_v32 = vrot.slane %v428_v28, 1  ;;  %v443_v34 = vrot.slane %v442_v30, 1 }
 0x128   :  { %v423_v33 = vadd.f32 %v422_v29, %v421_v25  ;;  %v437_v36 = vadd.f32 %v436_v31, %v435_v27 }
 0x129   :  { %v430_v37 = vadd.f32 %v429_v32, %v428_v28  ;;  %v444_v39 = vadd.f32 %v443_v34, %v442_v30 }
 0x12a   :  { %v474_v38 = vmul.f32 0.5, %v423_v33  ;;  %v476_v40 = vmul.f32 0.5, %v437_v36 }
 0x12b   :  { %v475_v41 = vmul.f32 0.5, %v430_v37  ;;  %v477_v43 = vmul.f32 0.5, %v444_v39 }
 0x12c   :  { %v990_v42 = vsub.f32 %v286_v0, %v474_v38  ;;  %v992_v44 = vpop.f32.mrb[4].mxu0  ;;  %v996_v46 = vsub.f32 %v327_v4, %v476_v40  ;;  %v1002_v49 = vpop.f32.mrb[4].mxu1 }
 0x12d   :  { %v998_v47 = vsub.f32 %v288_v5, %v475_v41  ;;  %v445_v48 = vsel %vm416_vm1, %v992_v44, 0.0  ;;  %v1004_v50 = vpop.f32.mrb[5].mxu0  ;;  %v1008_v52 = vsub.f32 %v329_v9, %v477_v43  ;;  %v459_v54 = vsel %vm416_vm1, %v1002_v49, 0.0  ;;  %v1012_v55 = vpop.f32.mrb[5].mxu1 }
 0x12e   :  { %v490_v51 = vmul.f32 %v990_v42, %v990_v42  ;;  %v446_v53 = vrot.slane %v445_v48, 4  ;;  %v372_v56 = vpop.f32.mrb[6].mxu0  ;;  %v492_v57 = vmul.f32 %v996_v46, %v996_v46  ;;  %v460_v59 = vrot.slane %v459_v54, 4  ;;  %v413_v61 = vpop.f32.mrb[6].mxu1 }
 0x12f   :  { %v491_v58 = vmul.f32 %v998_v47, %v998_v47  ;;  %v452_v60 = vsel %vm416_vm1, %v1004_v50, 0.0  ;;  %v373_v62 = vpop.f32.mrb[7].mxu0  ;;  %v493_v1 = vmul.f32 %v1008_v52, %v1008_v52  ;;  %v414_v3 = vpop.f32.mrb[7].mxu1  ;;  %v466_v19 = vsel %vm416_vm1, %v1012_v55, 0.0 }
 0x130   :  { %v498_v63 = vsel %vm416_vm1, %v490_v51, 0.0  ;;  %v447_v2 = vadd.f32 %v446_v53, %v445_v48  ;;  %v453_v0 = vrot.slane %v452_v60, 4  ;;  %v512_v5 = vsel %vm416_vm1, %v492_v57, 0.0 }
 0x131   :  { %v499_v4 = vrot.slane %v498_v63, 4  ;;  %v505_v6 = vsel %vm416_vm1, %v491_v58, 0.0  ;;  %v461_v7 = vadd.f32 %v460_v59, %v459_v54  ;;  %v513_v8 = vrot.slane %v512_v5, 4 }
 0x132   :  { %v506_v9 = vrot.slane %v505_v6, 4  ;;  %v519_v10 = vsel %vm416_vm1, %v493_v1, 0.0  ;;  %v448_v11 = vrot.slane %v447_v2, 2  ;;  %v454_v15 = vadd.f32 %v453_v0, %v452_v60 }
 0x133   :  { %v500_v12 = vadd.f32 %v499_v4, %v498_v63  ;;  %v520_v13 = vrot.slane %v519_v10, 4  ;;  %v462_v14 = vrot.slane %v461_v7, 2  ;;  %v514_v16 = vadd.f32 %v513_v8, %v512_v5 }
 0x134   :  { %v507_v17 = vadd.f32 %v506_v9, %v505_v6  ;;  %v449_v18 = vadd.f32 %v448_v11, %v447_v2  ;;  %v455_v23 = vrot.slane %v454_v15, 2  ;;  %v467_v27 = vrot.slane %v466_v19, 4 }
 0x135   :  { %v501_v20 = vrot.slane %v500_v12, 2  ;;  %v521_v21 = vadd.f32 %v520_v13, %v519_v10  ;;  %v463_v22 = vadd.f32 %v462_v14, %v461_v7  ;;  %v515_v24 = vrot.slane %v514_v16, 2 }
 0x136   :  { %v508_v25 = vrot.slane %v507_v17, 2  ;;  %v450_v26 = vrot.slane %v449_v18, 1  ;;  %v456_v31 = vadd.f32 %v455_v23, %v454_v15  ;;  %v468_v35 = vadd.f32 %v467_v27, %v466_v19 }
 0x137   :  { %v502_v28 = vadd.f32 %v501_v20, %v500_v12  ;;  %v522_v29 = vrot.slane %v521_v21, 2  ;;  %v464_v30 = vrot.slane %v463_v22, 1  ;;  %v516_v32 = vadd.f32 %v515_v24, %v514_v16 }
 0x138   :  { %v509_v33 = vadd.f32 %v508_v25, %v507_v17  ;;  %v451_v34 = vadd.f32 %v450_v26, %v449_v18  ;;  %v457_v39 = vrot.slane %v456_v31, 1  ;;  %v469_v48 = vrot.slane %v468_v35, 2 }
 0x139   :  { %v503_v36 = vrot.slane %v502_v28, 1  ;;  %v523_v37 = vadd.f32 %v522_v29, %v521_v21  ;;  %v465_v38 = vadd.f32 %v464_v30, %v463_v22  ;;  %v517_v40 = vrot.slane %v516_v32, 1  ;;  %v1051_v22 = vld [vmem:[#allocation4] sm:$0xff] }
 0x13a   :  { %v510_v41 = vrot.slane %v509_v33, 1  ;;  %v478_v43 = vmul.f32 0.5, %v451_v34  ;;  %v458_v56 = vadd.f32 %v457_v39, %v456_v31  ;;  %v470_v60 = vadd.f32 %v469_v48, %v468_v35 }
 0x13b   :  { %v504_v51 = vadd.f32 %v503_v36, %v502_v28  ;;  %v524_v53 = vrot.slane %v523_v37, 1  ;;  %v480_v54 = vmul.f32 0.5, %v465_v38  ;;  %v518_v57 = vadd.f32 %v517_v40, %v516_v32  ;;  %v1056_v28 = vld [vmem:[#allocation6] sm:$0xff] }
 0x13c   :  { %v511_v58 = vadd.f32 %v510_v41, %v509_v33  ;;  %v1029_v59 = vsub.f32 %v992_v44, %v478_v43  ;;  %v479_v1 = vmul.f32 0.5, %v458_v56  ;;  %v471_v4 = vrot.slane %v470_v60, 1 }
 0x13d   :  { %v554_v61 = vmul.f32 0.5, %v504_v51  ;;  %v525_v62 = vadd.f32 %v524_v53, %v523_v37  ;;  %v1032_v63 = vsub.f32 %v1002_v49, %v480_v54  ;;  %v556_v2 = vmul.f32 0.5, %v518_v57 }
 0x13e   :  { %v555_v0 = vmul.f32 0.5, %v511_v58  ;;  %v494_v3 = vmul.f32 %v1029_v59, %v1029_v59  ;;  %v1039_v44 = vsub.f32 %v1004_v50, %v479_v1  ;;  %v472_v10 = vadd.f32 %v471_v4, %v470_v60 }
 0x13f   :  { %v562_v5 = vadd.f32 1e-05, %v554_v61  ;;  %v557_v6 = vmul.f32 0.5, %v525_v62  ;;  %v496_v7 = vmul.f32 %v1032_v63, %v1032_v63  ;;  %v564_v8 = vadd.f32 1e-05, %v556_v2 }
 0x140   :  { %v563_v9 = vadd.f32 1e-05, %v555_v0  ;;  %v526_v49 = vsel %vm416_vm1, %v494_v3, 0.0  ;;  %v495_v15 = vmul.f32 %v1039_v44, %v1039_v44  ;;  %v481_v16 = vmul.f32 0.5, %v472_v10 }
 0x141   :  { %814 = vrsqrt.f32 %v562_v5  ;;  %v565_v11 = vadd.f32 1e-05, %v557_v6  ;;  %v527_v12 = vrot.slane %v526_v49, 4  ;;  %v540_v13 = vsel %vm416_vm1, %v496_v7, 0.0 }
 0x142   :  { %816 = vrsqrt.f32 %v564_v8  ;;  %v541_v14 = vrot.slane %v540_v13, 4  ;;  %v590_v17 = vsub.s32 0, %v994_v45  ;;  %v598_v50 = vsub.s32 2, %v994_v45 }
 0x143   :  { %818 = vrsqrt.f32 %v563_v9  ;;  %v528_v18 = vadd.f32 %v527_v12, %v526_v49  ;;  %v533_v20 = vsel %vm416_vm1, %v495_v15, 0.0  ;;  %v1049_v21 = vsub.f32 %v1012_v55, %v481_v16 }
 0x144   :  { %820 = vrsqrt.f32 %v565_v11  ;;  %v542_v19 = vadd.f32 %v541_v14, %v540_v13  ;;  %v594_v23 = vsub.s32 1, %v994_v45  ;;  %v534_v25 = vrot.slane %v533_v20, 4 }
 0x145   :  { %v529_v24 = vrot.slane %v528_v18, 2  ;;  %v497_v27 = vmul.f32 %v1049_v21, %v1049_v21  ;;  %v602_v29 = vsub.s32 3, %v994_v45  ;;  %v591_v32 = vrot.slane %v1051_v22, %v590_v17 }
 0x146   :  { %v543_v26 = vrot.slane %v542_v19, 2  ;;  %v535_v31 = vadd.f32 %v534_v25, %v533_v20  ;;  %v599_v55 = vrot.slane %v1051_v22, %v598_v50  ;;  %v595_v35 = vrot.slane %v1051_v22, %v594_v23 }
 0x147   :  { %v530_v30 = vadd.f32 %v529_v24, %v528_v18  ;;  %v547_v34 = vsel %vm416_vm1, %v497_v27, 0.0  ;;  %v641_v39 = vrot.slane %v1056_v28, %v590_v17  ;;  %v649_v40 = vrot.slane %v1056_v28, %v598_v50 }
 0x148   :  { %v544_v33 = vadd.f32 %v543_v26, %v542_v19  ;;  %v536_v37 = vrot.slane %v535_v31, 2  ;;  %v548_v38 = vrot.slane %v547_v34, 4  ;;  %v906_v41 = vmov 1966171168  }
 0x149   :  { %v531_v36 = vrot.slane %v530_v30, 1  ;;  %v715_v43 = vunpack.c.l.s4 %v906_v41  ;;  %v603_v53 = vrot.slane %v1051_v22, %v602_v29  ;;  %v645_v61 = vrot.slane %v1056_v28, %v594_v23 }
 0x14a   :  { %v545_v48 = vrot.slane %v544_v33, 1  ;;  %v537_v56 = vadd.f32 %v536_v37, %v535_v31  ;;  %v549_v57 = vadd.f32 %v548_v38, %v547_v34  ;;  %v653_v62 = vrot.slane %v1056_v28, %v602_v29 }
 0x14b   :  { %v815_v51 = vpop.eup %814  ;;  %v532_v54 = vadd.f32 %v531_v36, %v530_v30  ;;  %v716_v9 = vunpack.c.0.s8 %v715_v43  ;;  %v606_v30 = vsub.s32 4, %v994_v45  ;;  %v610_v37 = vsub.s32 5, %v994_v45 }
 0x14c   :  { %v817_v58 = vpop.eup %816  ;;  %v578_v60 = vmul.f32 %v815_v51, %v990_v42  ;;  %v546_v1 = vadd.f32 %v545_v48, %v544_v33  ;;  %v538_v4 = vrot.slane %v537_v56, 1  ;;  %v550_v5 = vrot.slane %v549_v57, 2 }
 0x14d   :  { %v819_v2 = vpop.eup %818  ;;  %v580_v0 = vmul.f32 %v817_v58, %v996_v46  ;;  %v558_v3 = vmul.f32 0.5, %v532_v54  ;;  %v607_v36 = vrot.slane %v1051_v22, %v606_v30  ;;  %v657_v43 = vrot.slane %v1056_v28, %v606_v30 }
 0x14e   :  { %v821_v6 = vpop.eup %820  ;;  %v628_v7 = vmul.f32 %v591_v32, %v578_v60  ;;  %v579_v8 = vmul.f32 %v819_v2, %v998_v47  ;;  %v560_v49 = vmul.f32 0.5, %v546_v1  ;;  %v539_v12 = vadd.f32 %v538_v4, %v537_v56 }
 0x14f   :  { %v630_v10 = vmul.f32 %v599_v55, %v580_v0  ;;  %v581_v42 = vmul.f32 %v821_v6, %v1008_v52  ;;  %v566_v11 = vadd.f32 1e-05, %v558_v3  ;;  %v551_v16 = vadd.f32 %v550_v5, %v549_v57 }
 0x150   :  { %v678_v13 = vadd.f32 %v641_v39, %v628_v7  ;;  %v629_v14 = vmul.f32 %v595_v35, %v579_v8  ;;  %v568_v15 = vadd.f32 1e-05, %v560_v49  ;;  %v559_v50 = vmul.f32 0.5, %v539_v12 }
 0x151   :  { %v680_v17 = vadd.f32 %v649_v40, %v630_v10  ;;  %v631_v46 = vmul.f32 %v603_v53, %v581_v42  ;;  %822 = vrsqrt.f32 %v566_v11  ;;  %v552_v20 = vrot.slane %v551_v16, 1 }
 0x152   :  { %v686_v18 = vmax.f32 %v678_v13, 0.0  ;;  %v679_v19 = vadd.f32 %v645_v61, %v629_v14  ;;  %824 = vrsqrt.f32 %v568_v15  ;;  %v567_v24 = vadd.f32 1e-05, %v559_v50 }
 0x153   :  { %v688_v47 = vmax.f32 %v680_v17, 0.0  ;;  %v681_v23 = vadd.f32 %v653_v62, %v631_v46  ;;  %v719_v52 = vsub.s32 %v716_v9, %v994_v45  ;;  %v553_v26 = vadd.f32 %v552_v20, %v551_v16 }
 0x154   :  { %v687_v25 = vmax.f32 %v679_v19, 0.0  ;;  %826 = vrsqrt.f32 %v567_v24  ;;  %v614_v35 = vsub.s32 6, %v994_v45  ;;  %v611_v54 = vrot.slane %v1051_v22, %v610_v37 }
 0x155   :  { %v689_v27 = vmax.f32 %v681_v23, 0.0  ;;  %v561_v31 = vmul.f32 0.5, %v553_v26  ;;  %v618_v57 = vsub.s32 7, %v994_v45  ;;  %v661_v61 = vrot.slane %v1056_v28, %v610_v37 }
 0x156   :  { %v803_v29 = vpack.c.bf16 %v687_v25, %v686_v18  ;;  %v615_v51 = vrot.slane %v1051_v22, %v614_v35 }
 0x157   :  { %v804_v32 = vpack.c.bf16 %v689_v27, %v688_v47  ;;  %v569_v33 = vadd.f32 1e-05, %v561_v31  ;;  %v619_v2 = vrot.slane %v1051_v22, %v618_v57  ;;  %v669_v6 = vrot.slane %v1056_v28, %v618_v57 }
 0x158   :  { %v720_v55 = vrot.slane %v803_v29, %v719_v52 }
 0x159   :  { %v727_v34 = vrot.slane %v804_v32, %v719_v52  ;;  %828 = vrsqrt.f32 %v569_v33 }
 0x15b   :  { %v823_v38 = vpop.eup %822  ;;  %v742_v39 = vcombine.low %v720_v55, %v727_v34 }
 0x15c   :  { %v825_v40 = vpop.eup %824  ;;  %v582_v41 = vmul.f32 %v823_v38, %v1029_v59  ;;  %v665_v59 = vrot.slane %v1056_v28, %v614_v35 }
 0x15d   :  { %v584_v48 = vmul.f32 %v825_v40, %v1032_v63  ;;  %v750_v13 = vrot.slane %v742_v39, %v719_v52 }
 0x15e   :  { %v632_v53 = vmul.f32 %v607_v36, %v582_v41  ;;  %v827_v56 = vpop.eup %826 }
 0x15f   :  { %v583_v60 = vmul.f32 %v827_v56, %v1039_v44  ;;  %v634_v62 = vmul.f32 %v615_v51, %v584_v48 }
 0x160   :  { %v682_v58 = vadd.f32 %v657_v43, %v632_v53 }
 0x161   :  { %v633_v1 = vmul.f32 %v611_v54, %v583_v60  ;;  %v684_v4 = vadd.f32 %v665_v59, %v634_v62 }
 0x162   :  { %v690_v0 = vmax.f32 %v682_v58, 0.0 }
 0x163   :  { %v829_v63 = vpop.eup %828  ;;  %v683_v3 = vadd.f32 %v661_v61, %v633_v1  ;;  %v692_v44 = vmax.f32 %v684_v4, 0.0 }
 0x164   :  { %v585_v5 = vmul.f32 %v829_v63, %v1049_v21 }
 0x165   :  { %v691_v45 = vmax.f32 %v683_v3, 0.0 }
 0x166   :  { %v635_v7 = vmul.f32 %v619_v2, %v585_v5 }
 0x167   :  { %v805_v8 = vpack.c.bf16 %v691_v45, %v690_v0 }
 0x168   :  { %v685_v9 = vadd.f32 %v669_v6, %v635_v7 }
 0x169   :  { %v734_v10 = vrot.slane %v805_v8, %v719_v52 }
 0x16a   :  { %v693_v49 = vmax.f32 %v685_v9, 0.0 }
 0x16c   :  { %v806_v42 = vpack.c.bf16 %v693_v49, %v692_v44 }
 0x16e   :  { %v741_v11 = vrot.slane %v806_v42, %v719_v52 }
 0x170   :  { %v743_v12 = vcombine.low %v734_v10, %v741_v11 }
 0x172   :  { %v757_v22 = vrot.slane %v743_v12, %v719_v52 }
 0x174   :  { %v758_v14 = vcombine.low %v750_v13, %v757_v22 }
 0x176   :  { %760 = vst [vmem:[%s1096_s4] sm:$0xff] %v758_v14 }
 0x177   :  { %765 = vsyncpa [#allocation3], 1 }
 0x178   :  { %766 = vsyncpa [#allocation5], 1 }

// kernel: generator_forward.5
= control target key start
LH: loop header
LB: loop body
LE: loop exit
PB: predicated region body
PF: predicated region fallthrough
CT: control target
= control target key end

     0   :  { %9 = vsyncpa [#allocation3], 0  ;;  %s6484_s0 = inlined_call_operand.vmem [shape: bf16[2,1024], index: 0, kind: input, shape index: {}]   ;;  %s6485_s1 = inlined_call_operand.hbm [shape: bf16[1024,6272], index: 1, kind: input, shape index: {}]   ;;  %s6486_s2 = inlined_call_operand.hbm [shape: f32[1,6272], index: 2, kind: input, shape index: {}]   ;;  %s6487_s3 = inlined_call_operand.hbm [shape: f32[1,6272], index: 3, kind: input, shape index: {}]   ;;  %s6488_s4 = inlined_call_operand.vmem [shape: bf16[2,6272], index: 4, kind: output, shape index: {}]  }
   0x1   :  { %11 = vsyncpa [#allocation3 + $0x1], 0 }
   0x2   :  { %12 = vsyncpa [#allocation5], 0 }
   0x3   :  { %14 = vsyncpa [#allocation5 + $0x1], 0  ;;  %s5694_s15 = smov 0   ;;  %s5696_s16 = smov 0  }
   0x4   :  { %s5698_s17 = smov 0   ;;  %s5700_s18 = smov 0  }
   0x5 LB: > { %s5713_s19 = sadd.s32 4294967295, %s5660_s18   ;;  %s5716_s20 = sadd.s32 1, %s5660_s18   ;;  %s5660_s18 = sphi %s5700_s18, %s6501_s18   ;;  %s5656_s17 = sphi %s5698_s17, %s6500_s17   ;;  %s5652_s16 = sphi %s5696_s16, %s6499_s16   ;;  %s5648_s15 = sphi %s5694_s15, %s6498_s15  }
   0x6   : > { %s45_s21 = ssub.s32 %s5660_s18, %s5716_s20  ;;  %s48_s22 = sadd.s32 1, %s5656_s17 }
   0x7   : > { %p46_p0 = scmp.eq.s32.totalorder %s45_s21, 0  ;;  %p55_p1 = scmp.ne.s32.totalorder %s5656_s17, %s5652_s16 }
   0x8   : > { %p56_p2 = scmp.eq.s32.totalorder %s5660_s18, 0  ;;  %p61_p3 = scmp.ne.s32.totalorder %s5652_s16, %s5648_s15 }
   0x9   : > { %s5726_s23 = scalar_select %p46_p0, %s5656_s17, %s48_s22  }
   0xa   : > { %p57_p4 = por %p56_p2, %p55_p1  ;;  %p62_p5 = scmp.eq.s32.totalorder %s5713_s19, 0 }
   0xb   : > { %p4840_p6 = scmp.lt.s32.totalorder %s5660_s18, 7  ;;  %s5735_s25 = sand.u32 1, %s5656_s17  }
   0xc   : > { %p5730_p7 = por %p62_p5, %p61_p3  ;;  %s4819_s26 = smul.u32 3584, %s5735_s25 }
   0xd   : > { %p5738_p8 = pnand %p4840_p6, %p57_p4  ;;  %s187_s28 = sand.u32 1, %s5660_s18  }
   0xe   : > { %s6491_s24 = scalar_select %p5730_p7, 1, 0 }
   0xf   : > { %s6492_s27 = scalar_select %p5738_p8, 1, 0 }
  0x10   : > { %s170_s29 = scalar_lea.vmem [#allocation2], %s4819_s26  ;;  %s4820_s5 = smul.u32 7, %s5735_s25 }
  0x11   : > { %s177_s30 = sshll.u32 %s170_s29, 4  ;;  %s4695_s6 = smul.u32 112, %s5660_s18  ;;  %s5743_s30 = int_to_ptr.vmem [resolvable:$true] %s177_s30 }
  0x12   : > { %p4240_p9 = scmp.ge.s32.totalorder %s5660_s18, 1  ;;  %p223_p10 = scmp.lt.s32.totalorder %s5660_s18, 8 }
  0x13   : > { %s5754_s9 = scalar_lea.hbm %s6486_s2, %s4695_s6  ;;  %s191_s10 = scalar_lea.vmem [#allocation4], %s4820_s5 }
  0x14   : > { %s199_s11 = sshll.u32 %s191_s10, 4  ;;  %p5760_p11 = pnand %p4240_p9, %p223_p10  ;;  %s5758_s11 = int_to_ptr.vmem [resolvable:$true] %s199_s11 }
  0x15   : > { %s5764_s13 = scalar_lea.sflag [#allocation5], %s187_s28  ;;  %s5532_s14 = scalar_lea.hbm %s5754_s9, 112 }
  0x16   : > { %s6493_s12 = scalar_select %p5760_p11, 1, 0 }
  0x17   : > { %p5533_p12 = scmp.ne.s32.totalorder %s5754_s9, %s5532_s14  ;;  %p5770_p13 = pneg %p5738_p8 }
  0x18   : > { %s5537_s26 = scalar_lea.hbm %s6486_s2, 784  ;;  %p5538_p2 = scmp.lt.u32.totalorder %s5754_s9, %s6486_s2 }
  0x19   : > { %p5535_p0 = pnand %p5770_p13, %p5533_p12  ;;  %p5539_p3 = scmp.lt.u32.totalorder %s5537_s26, %s5532_s14 }
  0x1a   : > { %p5541_p5 = scmp.lt.u32.totalorder %s5532_s14, %s5754_s9 }
  0x1b   : > { %p5536_p1 = pneg %p5535_p0  ;;  %p5540_p4 = por %p5539_p3, %p5538_p2 }
  0x1d   : > { %p5542_p6 = por %p5541_p5, %p5540_p4 }
  0x1f   : > { %p5543_p9 = pnand %p5542_p6, %p5536_p1 }
  0x21   : > { %5546 = shalt.err (!%p5543_p9)
}
  0x22   : > { %s5547_s28 = scalar_lea.vmem %s5758_s11, 112  ;;  %s5662_s8 = smov [#allocation4]  }
  0x23   : > { %p5548_p10 = scmp.ne.s32.totalorder %s5758_s11, %s5547_s28  ;;  %s5552_s10 = sshll.u32 %s5662_s8, 4  ;;  %s5553_s10 = int_to_ptr.vmem [resolvable:$false] %s5552_s10 }
  0x24   : > { %s5554_s21 = scalar_lea.vmem %s5553_s10, 224  ;;  %p5555_p7 = scmp.lt.s32.totalorder %s5758_s11, %s5553_s10 }
  0x25   : > { %p5550_p12 = pnand %p5548_p10, %p5770_p13  ;;  %p5556_p11 = scmp.lt.s32.totalorder %s5554_s21, %s5547_s28 }
  0x27   : > { %p5551_p0 = pneg %p5550_p12  ;;  %p5557_p2 = por %p5556_p11, %p5555_p7 }
  0x29   : > { %p5558_p3 = pnand %p5557_p2, %p5551_p0 }
  0x2b   : > { %5561 = shalt.err (!%p5558_p3)
}
  0x2c   : > { %4836 = dma.hbm_to_vmem [thread:$0]  (!%p5738_p8), %s5754_s9, 112, %s5758_s11, %s5764_s13  }
  0x2d   : > { %s4694_s14 = smul.u32 448, %s5660_s18  ;;  %s167_s7 = scalar_lea.sflag [#allocation3], %s5735_s25 }
  0x2e   : > { %s5567_s9 = scalar_lea.hbm %s6485_s1, 401408 }
  0x2f   : > { %s5798_s29 = scalar_lea.hbm %s6485_s1, %s4694_s14 }
  0x30   : > { %s5562_s28 = scalar_lea.hbm %s5798_s29, 57344  ;;  %p5568_p4 = scmp.lt.u32.totalorder %s5798_s29, %s6485_s1 }
  0x31   : > { %p5563_p7 = scmp.ne.s32.totalorder %s5798_s29, %s5562_s28  ;;  %p5569_p5 = scmp.lt.u32.totalorder %s5567_s9, %s5562_s28 }
  0x32   : > { %p5571_p9 = scmp.lt.u32.totalorder %s5562_s28, %s5798_s29 }
  0x33   : > { %p5565_p11 = pnand %p5563_p7, %p5770_p13  ;;  %p5570_p6 = por %p5569_p5, %p5568_p4 }
  0x35   : > { %p5566_p1 = pneg %p5565_p11  ;;  %p5572_p10 = por %p5571_p9, %p5570_p6 }
  0x37   : > { %p5573_p12 = pnand %p5572_p10, %p5566_p1 }
  0x39   : > { %5576 = shalt.err (!%p5573_p12)
}
  0x3a   : > { %s5577_s14 = scalar_lea.vmem %s5743_s30, 57344  ;;  %s5663_s22 = smov [#allocation2]  }
  0x3b   : > { %p5578_p0 = scmp.ne.s32.totalorder %s5743_s30, %s5577_s14  ;;  %s5582_s26 = sshll.u32 %s5663_s22, 4  ;;  %s5583_s26 = int_to_ptr.vmem [resolvable:$false] %s5582_s26 }
  0x3c   : > { %s5584_s8 = scalar_lea.vmem %s5583_s26, 114688  ;;  %p5585_p7 = scmp.lt.s32.totalorder %s5743_s30, %s5583_s26 }
  0x3d   : > { %p5580_p2 = pnand %p5578_p0, %p5770_p13  ;;  %p5586_p11 = scmp.lt.s32.totalorder %s5584_s8, %s5577_s14 }
  0x3f   : > { %p5581_p3 = pneg %p5580_p2  ;;  %p5587_p4 = por %p5586_p11, %p5585_p7 }
  0x41   : > { %p5588_p5 = pnand %p5587_p4, %p5581_p3 }
  0x43   : > { %5591 = shalt.err (!%p5588_p5)
}
  0x44   : > { %s5664_s28 = smov 3136   ;;  %s5665_s10 = smov 448  }
  0x45   : > { %s5666_s9 = smov 28   ;;  %s5829_s14 = scalar_lea.hbm %s6487_s3, %s4695_s6 }
  0x46   : > { %4833 = dma.hbm_to_vmem [thread:$0]  (!%p5738_p8), %s5798_s29, 57344, %s5743_s30, %s167_s7, %s5664_s28, %s5665_s10, %s5666_s9  }
  0x47   : > { %s210_s22 = scalar_lea.vmem [#allocation6], %s4820_s5  ;;  %s5592_s8 = scalar_lea.hbm %s5829_s14, 112 }
  0x48   : > { %s218_s26 = sshll.u32 %s210_s22, 4  ;;  %p5593_p1 = scmp.ne.s32.totalorder %s5829_s14, %s5592_s8  ;;  %s219_s26 = int_to_ptr.vmem [resolvable:$true] %s218_s26 }
  0x49   : > { %s5597_s29 = scalar_lea.hbm %s6487_s3, 784  ;;  %p5598_p10 = scmp.lt.u32.totalorder %s5829_s14, %s6487_s3 }
  0x4a   : > { %p5595_p6 = pnand %p5593_p1, %p5770_p13  ;;  %p5599_p12 = scmp.lt.u32.totalorder %s5597_s29, %s5592_s8 }
  0x4b   : > { %p5601_p2 = scmp.lt.u32.totalorder %s5592_s8, %s5829_s14 }
  0x4c   : > { %p5596_p9 = pneg %p5595_p6  ;;  %p5600_p0 = por %p5599_p12, %p5598_p10 }
  0x4e   : > { %p5602_p3 = por %p5601_p2, %p5600_p0 }
  0x50   : > { %p5603_p7 = pnand %p5602_p3, %p5596_p9 }
  0x52   : > { %5606 = shalt.err (!%p5603_p7)
}
  0x53   : > { %s5607_s25 = scalar_lea.vmem %s219_s26, 112  ;;  %s5667_s5 = smov [#allocation6]  }
  0x54   : > { %p5608_p11 = scmp.ne.s32.totalorder %s219_s26, %s5607_s25  ;;  %s5612_s28 = sshll.u32 %s5667_s5, 4  ;;  %s5613_s28 = int_to_ptr.vmem [resolvable:$false] %s5612_s28 }
  0x55   : > { %s5614_s10 = scalar_lea.vmem %s5613_s28, 224  ;;  %p5615_p1 = scmp.lt.s32.totalorder %s219_s26, %s5613_s28 }
  0x56   : > { %p5610_p4 = pnand %p5608_p11, %p5770_p13  ;;  %p5616_p6 = scmp.lt.s32.totalorder %s5614_s10, %s5607_s25 }
  0x58   : > { %p5611_p5 = pneg %p5610_p4  ;;  %p5617_p8 = por %p5616_p6, %p5615_p1 }
  0x5a   : > { %p5618_p10 = pnand %p5617_p8, %p5611_p5 }
  0x5c   : > { %5621 = shalt.err (!%p5618_p10)
}
  0x5d   : > { %p6495_p12 = scmp.ne.s32.totalorder %s6492_s27, 0  ;;  %p6496_p9 = scmp.ne.s32.totalorder %s6493_s12, 0 }
  0x5e   : > { %s5854_s15 = sand.u32 (!%p6496_p9), 1, %s5652_s16   ;;  %p6497_p8 = scmp.ne.s32.totalorder (!%p6496_p9), %s6491_s24, 0 }
  0x5f   : > { %4839 = dma.hbm_to_vmem [thread:$0]  (!%p6495_p12), %s5829_s14, 112, %s219_s26, %s5764_s13  }
  0x60   : > { %227 = sbr.rel (%p6496_p9) target bundleno = 841 (0x349), region = 36  ;;  %s230_s11 = scalar_lea.sflag (!%p6496_p9), [#allocation3], %s5854_s15 }
  0x61   : > { %s4822_s9 = smul.u32 (!%p6496_p9), 3584, %s5854_s15 }
  0x63   : > { %s5858_s21 = scalar_lea.vmem (!%p6496_p9), [#allocation2], %s4822_s9 }
  0x67   : > { %5639 = dma.done.wait (%p6497_p8), %s230_s11, 57344  }
  0x68   : > { %5641 = vsyncadd (%p6497_p8), %s230_s11, 4294909952  ;;  %s238_s27 = sand.u32 1, %s5713_s19   ;;  %s4823_s12 = smul.u32 7, %s5854_s15 }
  0x69   : > { %s239_s13 = scalar_lea.sflag [#allocation5], %s238_s27 }
  0x6a   : > { %s5868_s14 = scalar_lea.vmem [#allocation4], %s4823_s12 }
  0x6b   : > { %5643 = dma.done.wait (%p6497_p8), %s239_s13, 224  }
  0x6c   : > { %5645 = vsyncadd (%p6497_p8), %s239_s13, 4294967072  ;;  %v4877_v0 = vld [vmem:[%s5858_s21 + $0x4] ss:$28 sps:$4 sm:$0xff]   ;;  %v4883_v4 = vld [vmem:[%s5858_s21 + $0x3c] ss:$28 sps:$4 sm:$0xff]   ;;  %v812_v38 = vlaneseq  ;;  %vm3821_vm0 = vcmask 1041408  }
  0x6d   : > { %v4879_v1 = vld [vmem:[%s5858_s21 + $0x384] ss:$28 sps:$4 sm:$0xff]   ;;  %3169 = vmatprep.subr.bf16.mxu1 %v4877_v0  ;;  %v4885_v5 = vld [vmem:[%s5858_s21 + $0x3bc] ss:$28 sps:$4 sm:$0xff]   ;;  %v4889_v8 = vld [vmem:[%s5858_s21 + $0x74] ss:$28 sps:$4 sm:$0xff]  }
  0x6e   : > { %v4881_v2 = vld [vmem:[%s5858_s21] ss:$28 sps:$4 sm:$0xff]   ;;  %3210 = vmatprep.subr.bf16.mxu0 %v4879_v1  ;;  %v4887_v6 = vld [vmem:[%s5858_s21 + $0x38] ss:$28 sps:$4 sm:$0xff]   ;;  %v4893_v10 = vld [vmem:[%s5858_s21 + $0x70] ss:$28 sps:$4 sm:$0xff]  }
  0x6f   : > { %v4882_v3 = vld [vmem:[%s5858_s21 + $0x380] ss:$28 sps:$4 sm:$0xff]   ;;  %3170 = vmatpush1.bf16.msra.mxu1 %v4881_v2  ;;  %v4888_v7 = vld [vmem:[%s5858_s21 + $0x3b8] ss:$28 sps:$4 sm:$0xff]   ;;  %v4894_v11 = vld [vmem:[%s5858_s21 + $0x3f0] ss:$28 sps:$4 sm:$0xff]  }
  0x70   : > { %3211 = vmatpush1.bf16.msra.mxu0 %v4882_v3  ;;  %3171 = vmatprep.subr.bf16.mxu1 %v4883_v4  ;;  %v4891_v9 = vld [vmem:[%s5858_s21 + $0x3f4] ss:$28 sps:$4 sm:$0xff]   ;;  %v4895_v12 = vld [vmem:[%s5858_s21 + $0xac] ss:$28 sps:$4 sm:$0xff]   ;;  %v4901_v16 = vld [vmem:[%s5858_s21 + $0xe4] ss:$28 sps:$4 sm:$0xff]  }
  0x71   : > { %3212 = vmatprep.subr.bf16.mxu0 %v4885_v5  ;;  %v4897_v13 = vld [vmem:[%s5858_s21 + $0x42c] ss:$28 sps:$4 sm:$0xff]   ;;  %v4903_v17 = vld [vmem:[%s5858_s21 + $0x464] ss:$28 sps:$4 sm:$0xff]   ;;  %v4907_v20 = vld [vmem:[%s5858_s21 + $0x11c] ss:$28 sps:$4 sm:$0xff]  }
  0x72   : > { %v4899_v14 = vld [vmem:[%s5858_s21 + $0xa8] ss:$28 sps:$4 sm:$0xff]   ;;  %v4905_v18 = vld [vmem:[%s5858_s21 + $0xe0] ss:$28 sps:$4 sm:$0xff]   ;;  %v4911_v22 = vld [vmem:[%s5858_s21 + $0x118] ss:$28 sps:$4 sm:$0xff]  }
  0x73   : > { %3172 = vmatpush1.bf16.msra.mxu1 %v4887_v6  ;;  %v4900_v15 = vld [vmem:[%s5858_s21 + $0x428] ss:$28 sps:$4 sm:$0xff]   ;;  %v4906_v19 = vld [vmem:[%s5858_s21 + $0x460] ss:$28 sps:$4 sm:$0xff]   ;;  %v4912_v23 = vld [vmem:[%s5858_s21 + $0x498] ss:$28 sps:$4 sm:$0xff]  }
  0x74   : > { %3213 = vmatpush1.bf16.msra.mxu0 %v4888_v7  ;;  %3173 = vmatprep.subr.bf16.mxu1 %v4889_v8  ;;  %v4909_v21 = vld [vmem:[%s5858_s21 + $0x49c] ss:$28 sps:$4 sm:$0xff]   ;;  %v4913_v24 = vld [vmem:[%s5858_s21 + $0x154] ss:$28 sps:$4 sm:$0xff]   ;;  %v4919_v28 = vld [vmem:[%s5858_s21 + $0x18c] ss:$28 sps:$4 sm:$0xff]  }
  0x75   : > { %3214 = vmatprep.subr.bf16.mxu0 %v4891_v9  ;;  %v4915_v25 = vld [vmem:[%s5858_s21 + $0x4d4] ss:$28 sps:$4 sm:$0xff]   ;;  %v4921_v29 = vld [vmem:[%s5858_s21 + $0x50c] ss:$28 sps:$4 sm:$0xff]   ;;  %v4925_v32 = vld [vmem:[%s5858_s21 + $0x1c4] ss:$28 sps:$4 sm:$0xff]  }
  0x76   : > { %v4917_v26 = vld [vmem:[%s5858_s21 + $0x150] ss:$28 sps:$4 sm:$0xff]   ;;  %v4923_v30 = vld [vmem:[%s5858_s21 + $0x188] ss:$28 sps:$4 sm:$0xff]   ;;  %v4929_v34 = vld [vmem:[%s5858_s21 + $0x1c0] ss:$28 sps:$4 sm:$0xff]  }
  0x77   : > { %3174 = vmatpush1.bf16.msra.mxu1 %v4893_v10  ;;  %v4918_v27 = vld [vmem:[%s5858_s21 + $0x4d0] ss:$28 sps:$4 sm:$0xff]   ;;  %v4924_v31 = vld [vmem:[%s5858_s21 + $0x508] ss:$28 sps:$4 sm:$0xff]   ;;  %v4930_v35 = vld [vmem:[%s5858_s21 + $0x540] ss:$28 sps:$4 sm:$0xff]  }
  0x78   : > { %3215 = vmatpush1.bf16.msra.mxu0 %v4894_v11  ;;  %3175 = vmatprep.subr.bf16.mxu1 %v4895_v12  ;;  %v4927_v33 = vld [vmem:[%s5858_s21 + $0x544] ss:$28 sps:$4 sm:$0xff]   ;;  %v5668_v36 = vmov 1966171168   ;;  %v4931_v39 = vld [vmem:[%s5858_s21 + $0x1fc] ss:$28 sps:$4 sm:$0xff]  }
  0x79   : > { %3216 = vmatprep.subr.bf16.mxu0 %v4897_v13  ;;  %v810_v37 = vunpack.c.l.s4 %v5668_v36  ;;  %v4933_v40 = vld [vmem:[%s5858_s21 + $0x57c] ss:$28 sps:$4 sm:$0xff]   ;;  %v5913_v43 = vshrl.u32 %v812_v38, 7  ;;  %v4937_v45 = vld [vmem:[%s5858_s21 + $0x234] ss:$28 sps:$4 sm:$0xff]   ;;  %v294_v52 = vld [vmem:[%s6484_s0] sm:$0xff] }
  0x7a   : > { %v4935_v41 = vld [vmem:[%s5858_s21 + $0x1f8] ss:$28 sps:$4 sm:$0xff]   ;;  %v4941_v47 = vld [vmem:[%s5858_s21 + $0x230] ss:$28 sps:$4 sm:$0xff]   ;;  %v4947_v53 = vld [vmem:[%s5858_s21 + $0x268] ss:$28 sps:$4 sm:$0xff]   ;;  %v808_v5 = vcombine.high %v294_v52, %v294_v52 }
  0x7b   : > { %3176 = vmatpush1.bf16.msra.mxu1 %v4899_v14  ;;  %v811_v42 = vunpack.c.0.s8 %v810_v37  ;;  %v4936_v44 = vld [vmem:[%s5858_s21 + $0x578] ss:$28 sps:$4 sm:$0xff]   ;;  %v4942_v48 = vld [vmem:[%s5858_s21 + $0x5b0] ss:$28 sps:$4 sm:$0xff]   ;;  %v4948_v55 = vld [vmem:[%s5858_s21 + $0x5e8] ss:$28 sps:$4 sm:$0xff]  }
  0x7c   : > { %3217 = vmatpush1.bf16.msra.mxu0 %v4900_v15  ;;  %3177 = vmatprep.subr.bf16.mxu1 %v4901_v16  ;;  %v4939_v46 = vld [vmem:[%s5858_s21 + $0x5b4] ss:$28 sps:$4 sm:$0xff]   ;;  %v4943_v50 = vld [vmem:[%s5858_s21 + $0x26c] ss:$28 sps:$4 sm:$0xff]   ;;  %v4949_v56 = vld [vmem:[%s5858_s21 + $0x2a4] ss:$28 sps:$4 sm:$0xff]  }
  0x7d   : > { %3218 = vmatprep.subr.bf16.mxu0 %v4903_v17  ;;  %v5921_v49 = vsub.s32 %v811_v42, %v5913_v43  ;;  %v4945_v51 = vld [vmem:[%s5858_s21 + $0x5ec] ss:$28 sps:$4 sm:$0xff]   ;;  %v4951_v57 = vld [vmem:[%s5858_s21 + $0x624] ss:$28 sps:$4 sm:$0xff]   ;;  %v4955_v62 = vld [vmem:[%s5858_s21 + $0x2dc] ss:$28 sps:$4 sm:$0xff]  }
  0x7e   : > { %v4953_v59 = vld [vmem:[%s5858_s21 + $0x2a0] ss:$28 sps:$4 sm:$0xff]   ;;  %v4959_v1 = vld [vmem:[%s5858_s21 + $0x2d8] ss:$28 sps:$4 sm:$0xff]   ;;  %v4965_v6 = vld [vmem:[%s5858_s21 + $0x310] ss:$28 sps:$4 sm:$0xff]  }
  0x7f   : > { %3178 = vmatpush1.bf16.msra.mxu1 %v4905_v18  ;;  %v815_v54 = vrot.slane %v294_v52, %v5921_v49  ;;  %v4954_v61 = vld [vmem:[%s5858_s21 + $0x620] ss:$28 sps:$4 sm:$0xff]   ;;  %v4960_v2 = vld [vmem:[%s5858_s21 + $0x658] ss:$28 sps:$4 sm:$0xff]   ;;  %v4966_v7 = vld [vmem:[%s5858_s21 + $0x690] ss:$28 sps:$4 sm:$0xff]   ;;  %v5955_v10 = vrot.slane %v808_v5, %v5921_v49 }
  0x80   : > { %3219 = vmatpush1.bf16.msra.mxu0 %v4906_v19  ;;  %3179 = vmatprep.subr.bf16.mxu1 %v4907_v20  ;;  %v4957_v63 = vld [vmem:[%s5858_s21 + $0x65c] ss:$28 sps:$4 sm:$0xff]   ;;  %v4961_v3 = vld [vmem:[%s5858_s21 + $0x314] ss:$28 sps:$4 sm:$0xff]   ;;  %v4967_v8 = vld [vmem:[%s5858_s21 + $0x34c] ss:$28 sps:$4 sm:$0xff]  }
  0x81   : > { %3220 = vmatprep.subr.bf16.mxu0 %v4909_v21  ;;  %v823_v58 = vcombine.high %v815_v54, %v815_v54  ;;  %v4963_v4 = vld [vmem:[%s5858_s21 + $0x694] ss:$28 sps:$4 sm:$0xff]   ;;  %v4969_v9 = vld [vmem:[%s5858_s21 + $0x6cc] ss:$28 sps:$4 sm:$0xff]   ;;  %v5959_v12 = vrot.slane %v815_v54, %v5921_v49  ;;  %v4975_v14 = vld [vmem:[%s5858_s21 + $0x704] ss:$28 sps:$4 sm:$0xff]   ;;  %v824_v16 = vcombine.high %v5955_v10, %v5955_v10 }
  0x82   : > { %v4971_v11 = vld [vmem:[%s5858_s21 + $0x348] ss:$28 sps:$4 sm:$0xff]   ;;  %v4973_v17 = vld [vmem:[%s5858_s21 + $0x700] ss:$28 sps:$4 sm:$0xff]   ;;  %s251_s26 = scalar_lea.vmem [#allocation6], %s4823_s12  ;;  %s288_s8 = smul.u32 7, %s5713_s19 }
  0x83   : > { %3180 = vmatpush1.bf16.msra.mxu1 %v4911_v22  ;;  %v5935_v60 = vrot.slane %v823_v58, %v5921_v49  ;;  %v4972_v13 = vld [vmem:[%s5858_s21 + $0x6c8] ss:$28 sps:$4 sm:$0xff]   ;;  %v5969_v18 = vcombine.high %v5959_v12, %v5959_v12  ;;  %v4981_v20 = vld [vmem:[%s5858_s21 + $0x73c] ss:$28 sps:$4 sm:$0xff]   ;;  %v5975_v22 = vrot.slane %v824_v16, %v5921_v49 }
  0x84   : > { %3221 = vmatpush1.bf16.msra.mxu0 %v4912_v23  ;;  %3181 = vmatprep.subr.bf16.mxu1 %v4913_v24  ;;  %v4978_v15 = vld [vmem:[%s5858_s21 + $0xc] ss:$28 sps:$4 sm:$0xff]   ;;  %v4984_v21 = vld [vmem:[%s5858_s21 + $0x44] ss:$28 sps:$4 sm:$0xff]   ;;  %v4979_v23 = vld [vmem:[%s5858_s21 + $0x738] ss:$28 sps:$4 sm:$0xff]  }
  0x85   : > { %3222 = vmatprep.subr.bf16.mxu0 %v4915_v25  ;;  %v5942_v0 = vcombine.high %v5935_v60, %v5935_v60  ;;  %3201 = vmatprep.mubr.bf16.mxu1 %v5935_v60  ;;  %v4976_v19 = vld [vmem:[%s5858_s21 + $0x8] ss:$28 sps:$4 sm:$0xff]   ;;  %v4982_v24 = vld [vmem:[%s5858_s21 + $0x40] ss:$28 sps:$4 sm:$0xff]   ;;  %v4987_v25 = vld [vmem:[%s5858_s21 + $0x774] ss:$28 sps:$4 sm:$0xff]  }
  0x86   : > { %v5000_v36 = vld [vmem:[%s5858_s21 + $0xe8] ss:$28 sps:$4 sm:$0xff]   ;;  %v5005_v37 = vld [vmem:[%s5858_s21 + $0x81c] ss:$28 sps:$4 sm:$0xff]   ;;  %p289_p13 = scmp.lt.s32.totalorder %s288_s8, 48 }
  0x87   : > { %3182 = vmatpush1.bf16.msra.mxu1 %v4917_v26  ;;  %3242 = vmatprep.mubr.bf16.mxu0 %v5942_v0  ;;  %v4990_v26 = vld [vmem:[%s5858_s21 + $0x7c] ss:$28 sps:$4 sm:$0xff]   ;;  %v5008_v38 = vld [vmem:[%s5858_s21 + $0x124] ss:$28 sps:$4 sm:$0xff]   ;;  %v5026_v52 = vld [vmem:[%s5858_s21 + $0x1cc] ss:$28 sps:$4 sm:$0xff]  }
  0x88   : > { %3223 = vmatpush1.bf16.msra.mxu0 %v4918_v27  ;;  %3183 = vmatprep.subr.bf16.mxu1 %v4919_v28  ;;  %v4985_v27 = vld [vmem:[%s5858_s21 + $0x770] ss:$28 sps:$4 sm:$0xff]   ;;  %v4988_v28 = vld [vmem:[%s5858_s21 + $0x78] ss:$28 sps:$4 sm:$0xff]   ;;  %v5024_v54 = vld [vmem:[%s5858_s21 + $0x1c8] ss:$28 sps:$4 sm:$0xff]  }
  0x89   : > { %3224 = vmatprep.subr.bf16.mxu0 %v4921_v29  ;;  %v4993_v29 = vld [vmem:[%s5858_s21 + $0x7ac] ss:$28 sps:$4 sm:$0xff]   ;;  %v5014_v42 = vld [vmem:[%s5858_s21 + $0x15c] ss:$28 sps:$4 sm:$0xff]   ;;  %v5047_v5 = vld [vmem:[%s5858_s21 + $0x9a4] ss:$28 sps:$4 sm:$0xff]  }
  0x8a   : > { %v5030_v58 = vld [vmem:[%s5858_s21 + $0x200] ss:$28 sps:$4 sm:$0xff]   ;;  %s6503_s8 = smov (!%p289_p13, %s288_s8), 48 }
  0x8b   : > { %3184 = vmatpush1.bf16.msra.mxu1 %v4923_v30  ;;  %v4996_v30 = vld [vmem:[%s5858_s21 + $0xb4] ss:$28 sps:$4 sm:$0xff]   ;;  %v5062_v16 = vld [vmem:[%s5858_s21 + $0x31c] ss:$28 sps:$4 sm:$0xff]   ;;  %s291_s19 = scalar_lea.vmem %s6488_s4, %s6503_s8 }
  0x8c   : > { %3225 = vmatpush1.bf16.msra.mxu0 %v4924_v31  ;;  %3185 = vmatprep.subr.bf16.mxu1 %v4925_v32  ;;  %v4991_v31 = vld [vmem:[%s5858_s21 + $0x7a8] ss:$28 sps:$4 sm:$0xff]   ;;  %v4994_v32 = vld [vmem:[%s5858_s21 + $0xb0] ss:$28 sps:$4 sm:$0xff]  }
  0x8d   : > { %3226 = vmatprep.subr.bf16.mxu0 %v4927_v33  ;;  %v4999_v33 = vld [vmem:[%s5858_s21 + $0x7e4] ss:$28 sps:$4 sm:$0xff]  }
  0x8f   : > { %3186 = vmatpush1.bf16.msra.mxu1 %v4929_v34  ;;  %v5002_v34 = vld [vmem:[%s5858_s21 + $0xec] ss:$28 sps:$4 sm:$0xff]  }
  0x90   : > { %3227 = vmatpush1.bf16.msra.mxu0 %v4930_v35  ;;  %3187 = vmatprep.subr.bf16.mxu1 %v4931_v39  ;;  %v4997_v35 = vld [vmem:[%s5858_s21 + $0x7e0] ss:$28 sps:$4 sm:$0xff]   ;;  %v5003_v39 = vld [vmem:[%s5858_s21 + $0x818] ss:$28 sps:$4 sm:$0xff]  }
  0x91   : > { %3228 = vmatprep.subr.bf16.mxu0 %v4933_v40  ;;  %v5006_v40 = vld [vmem:[%s5858_s21 + $0x120] ss:$28 sps:$4 sm:$0xff]  }
  0x93   : > { %3188 = vmatpush1.bf16.msra.mxu1 %v4935_v41  ;;  %v5011_v41 = vld [vmem:[%s5858_s21 + $0x854] ss:$28 sps:$4 sm:$0xff]  }
  0x94   : > { %3229 = vmatpush1.bf16.msra.mxu0 %v4936_v44  ;;  %3189 = vmatprep.subr.bf16.mxu1 %v4937_v45  ;;  %v5009_v44 = vld [vmem:[%s5858_s21 + $0x850] ss:$28 sps:$4 sm:$0xff]   ;;  %v5012_v45 = vld [vmem:[%s5858_s21 + $0x158] ss:$28 sps:$4 sm:$0xff]  }
  0x95   : > { %3230 = vmatprep.subr.bf16.mxu0 %v4939_v46  ;;  %v5017_v46 = vld [vmem:[%s5858_s21 + $0x88c] ss:$28 sps:$4 sm:$0xff]  }
  0x97   : > { %3190 = vmatpush1.bf16.msra.mxu1 %v4941_v47  ;;  %v5020_v47 = vld [vmem:[%s5858_s21 + $0x194] ss:$28 sps:$4 sm:$0xff]  }
  0x98   : > { %3231 = vmatpush1.bf16.msra.mxu0 %v4942_v48  ;;  %3191 = vmatprep.subr.bf16.mxu1 %v4943_v50  ;;  %v5015_v48 = vld [vmem:[%s5858_s21 + $0x888] ss:$28 sps:$4 sm:$0xff]   ;;  %v5018_v50 = vld [vmem:[%s5858_s21 + $0x190] ss:$28 sps:$4 sm:$0xff]  }
  0x99   : > { %3232 = vmatprep.subr.bf16.mxu0 %v4945_v51  ;;  %v5023_v51 = vld [vmem:[%s5858_s21 + $0x8c4] ss:$28 sps:$4 sm:$0xff]  }
  0x9b   : > { %3192 = vmatpush1.bf16.msra.mxu1 %v4947_v53  ;;  %v5021_v53 = vld [vmem:[%s5858_s21 + $0x8c0] ss:$28 sps:$4 sm:$0xff]  }
  0x9c   : > { %3233 = vmatpush1.bf16.msra.mxu0 %v4948_v55  ;;  %3193 = vmatprep.subr.bf16.mxu1 %v4949_v56  ;;  %v5029_v55 = vld [vmem:[%s5858_s21 + $0x8fc] ss:$28 sps:$4 sm:$0xff]   ;;  %v5032_v56 = vld [vmem:[%s5858_s21 + $0x204] ss:$28 sps:$4 sm:$0xff]  }
  0x9d   : > { %3234 = vmatprep.subr.bf16.mxu0 %v4951_v57  ;;  %v5027_v57 = vld [vmem:[%s5858_s21 + $0x8f8] ss:$28 sps:$4 sm:$0xff]  }
  0x9f   : > { %3194 = vmatpush1.bf16.msra.mxu1 %v4953_v59  ;;  %v5035_v59 = vld [vmem:[%s5858_s21 + $0x934] ss:$28 sps:$4 sm:$0xff]  }
  0xa0   : > { %3235 = vmatpush1.bf16.msra.mxu0 %v4954_v61  ;;  %3195 = vmatprep.subr.bf16.mxu1 %v4955_v62  ;;  %v5038_v61 = vld [vmem:[%s5858_s21 + $0x23c] ss:$28 sps:$4 sm:$0xff]   ;;  %v5033_v62 = vld [vmem:[%s5858_s21 + $0x930] ss:$28 sps:$4 sm:$0xff]  }
  0xa1   : > { %3236 = vmatprep.subr.bf16.mxu0 %v4957_v63  ;;  %v5036_v63 = vld [vmem:[%s5858_s21 + $0x238] ss:$28 sps:$4 sm:$0xff]  }
  0xa3   : > { %3196 = vmatpush1.bf16.msra.mxu1 %v4959_v1  ;;  %v5041_v1 = vld [vmem:[%s5858_s21 + $0x96c] ss:$28 sps:$4 sm:$0xff]  }
  0xa4   : > { %3237 = vmatpush1.bf16.msra.mxu0 %v4960_v2  ;;  %3197 = vmatprep.subr.bf16.mxu1 %v4961_v3  ;;  %v5044_v2 = vld [vmem:[%s5858_s21 + $0x274] ss:$28 sps:$4 sm:$0xff]   ;;  %v5039_v3 = vld [vmem:[%s5858_s21 + $0x968] ss:$28 sps:$4 sm:$0xff]  }
  0xa5   : > { %3238 = vmatprep.subr.bf16.mxu0 %v4963_v4  ;;  %v5042_v4 = vld [vmem:[%s5858_s21 + $0x270] ss:$28 sps:$4 sm:$0xff]  }
  0xa7   : > { %3198 = vmatpush1.bf16.msra.mxu1 %v4965_v6  ;;  %v5050_v6 = vld [vmem:[%s5858_s21 + $0x2ac] ss:$28 sps:$4 sm:$0xff]  }
  0xa8   : > { %3239 = vmatpush1.bf16.msra.mxu0 %v4966_v7  ;;  %3199 = vmatprep.subr.bf16.mxu1 %v4967_v8  ;;  %v5045_v7 = vld [vmem:[%s5858_s21 + $0x9a0] ss:$28 sps:$4 sm:$0xff]   ;;  %v5048_v8 = vld [vmem:[%s5858_s21 + $0x2a8] ss:$28 sps:$4 sm:$0xff]  }
  0xa9   : > { %3240 = vmatprep.subr.bf16.mxu0 %v4969_v9  ;;  %v5053_v9 = vld [vmem:[%s5858_s21 + $0x9dc] ss:$28 sps:$4 sm:$0xff]  }
  0xab   : > { %3200 = vmatpush1.bf16.msra.mxu1 %v4971_v11  ;;  %v5056_v11 = vld [vmem:[%s5858_s21 + $0x2e4] ss:$28 sps:$4 sm:$0xff]  }
  0xac   : > { %3241 = vmatpush1.bf16.msra.mxu0 %v4972_v13  ;;  %3333 = vmatprep.subr.bf16.mxu1 %v4978_v15  ;;  %v5051_v13 = vld [vmem:[%s5858_s21 + $0x9d8] ss:$28 sps:$4 sm:$0xff]  }
  0xad   : > { %3251 = vmatprep.subr.bf16.mxu0 %v4975_v14  ;;  %v5054_v14 = vld [vmem:[%s5858_s21 + $0x2e0] ss:$28 sps:$4 sm:$0xff]   ;;  %v5059_v15 = vld [vmem:[%s5858_s21 + $0xa14] ss:$28 sps:$4 sm:$0xff]  }
  0xae   : > { %3202 = vmatmul.mubr.bf16.vlgmr.msra.gmra.mrb[0].mxu1 %v5959_v12 }
  0xaf   : > { %3243 = vmatmul.mubr.bf16.vlgmr.msra.gmra.mrb[0].mxu0 %v5969_v18  ;;  %3334 = vmatpush1.bf16.msra.mxu1 %v4976_v19  ;;  %v5060_v19 = vld [vmem:[%s5858_s21 + $0x318] ss:$28 sps:$4 sm:$0xff]  }
  0xb0   : > { %3252 = vmatpush1.bf16.msra.mxu0 %v4973_v17  ;;  %3335 = vmatprep.subr.bf16.mxu1 %v4984_v21  ;;  %v5057_v17 = vld [vmem:[%s5858_s21 + $0xa10] ss:$28 sps:$4 sm:$0xff]  }
  0xb1   : > { %3253 = vmatprep.subr.bf16.mxu0 %v4981_v20  ;;  %3283 = vmatprep.mubr.bf16.mxu0 %v5975_v22  ;;  %v5065_v20 = vld [vmem:[%s5858_s21 + $0xa4c] ss:$28 sps:$4 sm:$0xff]   ;;  %v5068_v21 = vld [vmem:[%s5858_s21 + $0x354] ss:$28 sps:$4 sm:$0xff]  }
  0xb2   : > { %3365 = vmatprep.mubr.bf16.mxu1 %v5935_v60 }
  0xb3   : > { %3336 = vmatpush1.bf16.msra.mxu1 %v4982_v24  ;;  %v5066_v24 = vld [vmem:[%s5858_s21 + $0x350] ss:$28 sps:$4 sm:$0xff]  }
  0xb4   : > { %3254 = vmatpush1.bf16.msra.mxu0 %v4979_v23  ;;  %3337 = vmatprep.subr.bf16.mxu1 %v4990_v26  ;;  %v5063_v23 = vld [vmem:[%s5858_s21 + $0xa48] ss:$28 sps:$4 sm:$0xff]  }
  0xb5   : > { %3255 = vmatprep.subr.bf16.mxu0 %v4987_v25  ;;  %v5072_v25 = vld [vmem:[%s5858_s21 + $0xa84] ss:$28 sps:$4 sm:$0xff]   ;;  %v5075_v26 = vld [vmem:[%s5858_s21 + $0x38c] ss:$28 sps:$4 sm:$0xff]  }
  0xb7   : > { %3338 = vmatpush1.bf16.msra.mxu1 %v4988_v28  ;;  %v6044_v28 = vrot.slane %v5955_v10, %v5921_v49  ;;  %v5076_v10 = vld [vmem:[%s5858_s21 + $0xab8] ss:$28 sps:$4 sm:$0xff]  }
  0xb8   : > { %3256 = vmatpush1.bf16.msra.mxu0 %v4985_v27  ;;  %3339 = vmatprep.subr.bf16.mxu1 %v4996_v30  ;;  %v5070_v27 = vld [vmem:[%s5858_s21 + $0xa80] ss:$28 sps:$4 sm:$0xff]  }
  0xb9   : > { %3257 = vmatprep.subr.bf16.mxu0 %v4993_v29  ;;  %v5073_v29 = vld [vmem:[%s5858_s21 + $0x388] ss:$28 sps:$4 sm:$0xff]   ;;  %v5078_v30 = vld [vmem:[%s5858_s21 + $0xabc] ss:$28 sps:$4 sm:$0xff]  }
  0xbb   : > { %3340 = vmatpush1.bf16.msra.mxu1 %v4994_v32  ;;  %v6051_v32 = vcombine.high %v5975_v22, %v5975_v22 }
  0xbc   : > { %3258 = vmatpush1.bf16.msra.mxu0 %v4991_v31  ;;  %3341 = vmatprep.subr.bf16.mxu1 %v5002_v34  ;;  %v5081_v31 = vld [vmem:[%s5858_s21 + $0x3c4] ss:$28 sps:$4 sm:$0xff]   ;;  %v5084_v34 = vld [vmem:[%s5858_s21 + $0xaf4] ss:$28 sps:$4 sm:$0xff]  }
  0xbd   : > { %3259 = vmatprep.subr.bf16.mxu0 %v4999_v33  ;;  %v5079_v33 = vld [vmem:[%s5858_s21 + $0x3c0] ss:$28 sps:$4 sm:$0xff]  }
  0xbf   : > { %3342 = vmatpush1.bf16.msra.mxu1 %v5000_v36  ;;  %v5082_v36 = vld [vmem:[%s5858_s21 + $0xaf0] ss:$28 sps:$4 sm:$0xff]  }
  0xc0   : > { %3260 = vmatpush1.bf16.msra.mxu0 %v4997_v35  ;;  %3343 = vmatprep.subr.bf16.mxu1 %v5008_v38  ;;  %v5087_v35 = vld [vmem:[%s5858_s21 + $0x3fc] ss:$28 sps:$4 sm:$0xff]   ;;  %v5090_v38 = vld [vmem:[%s5858_s21 + $0xb2c] ss:$28 sps:$4 sm:$0xff]  }
  0xc1   : > { %3261 = vmatprep.subr.bf16.mxu0 %v5005_v37  ;;  %v5085_v37 = vld [vmem:[%s5858_s21 + $0x3f8] ss:$28 sps:$4 sm:$0xff]  }
  0xc3   : > { %3344 = vmatpush1.bf16.msra.mxu1 %v5006_v40  ;;  %v5088_v40 = vld [vmem:[%s5858_s21 + $0xb28] ss:$28 sps:$4 sm:$0xff]  }
  0xc4   : > { %3262 = vmatpush1.bf16.msra.mxu0 %v5003_v39  ;;  %3345 = vmatprep.subr.bf16.mxu1 %v5014_v42  ;;  %v5093_v39 = vld [vmem:[%s5858_s21 + $0x434] ss:$28 sps:$4 sm:$0xff]   ;;  %v5096_v42 = vld [vmem:[%s5858_s21 + $0xb64] ss:$28 sps:$4 sm:$0xff]  }
  0xc5   : > { %3263 = vmatprep.subr.bf16.mxu0 %v5011_v41  ;;  %v5091_v41 = vld [vmem:[%s5858_s21 + $0x430] ss:$28 sps:$4 sm:$0xff]  }
  0xc7   : > { %3346 = vmatpush1.bf16.msra.mxu1 %v5012_v45  ;;  %v5094_v45 = vld [vmem:[%s5858_s21 + $0xb60] ss:$28 sps:$4 sm:$0xff]  }
  0xc8   : > { %3264 = vmatpush1.bf16.msra.mxu0 %v5009_v44  ;;  %3347 = vmatprep.subr.bf16.mxu1 %v5020_v47  ;;  %v5099_v44 = vld [vmem:[%s5858_s21 + $0x46c] ss:$28 sps:$4 sm:$0xff]   ;;  %v5102_v47 = vld [vmem:[%s5858_s21 + $0xb9c] ss:$28 sps:$4 sm:$0xff]  }
  0xc9   : > { %3265 = vmatprep.subr.bf16.mxu0 %v5017_v46  ;;  %v5097_v46 = vld [vmem:[%s5858_s21 + $0x468] ss:$28 sps:$4 sm:$0xff]  }
  0xcb   : > { %3348 = vmatpush1.bf16.msra.mxu1 %v5018_v50  ;;  %v5100_v50 = vld [vmem:[%s5858_s21 + $0xb98] ss:$28 sps:$4 sm:$0xff]  }
  0xcc   : > { %3266 = vmatpush1.bf16.msra.mxu0 %v5015_v48  ;;  %3349 = vmatprep.subr.bf16.mxu1 %v5026_v52  ;;  %v5105_v48 = vld [vmem:[%s5858_s21 + $0x4a4] ss:$28 sps:$4 sm:$0xff]   ;;  %v5108_v52 = vld [vmem:[%s5858_s21 + $0xbd4] ss:$28 sps:$4 sm:$0xff]  }
  0xcd   : > { %3267 = vmatprep.subr.bf16.mxu0 %v5023_v51  ;;  %v5103_v51 = vld [vmem:[%s5858_s21 + $0x4a0] ss:$28 sps:$4 sm:$0xff]  }
  0xcf   : > { %3350 = vmatpush1.bf16.msra.mxu1 %v5024_v54  ;;  %v5106_v54 = vld [vmem:[%s5858_s21 + $0xbd0] ss:$28 sps:$4 sm:$0xff]  }
  0xd0   : > { %3268 = vmatpush1.bf16.msra.mxu0 %v5021_v53  ;;  %3351 = vmatprep.subr.bf16.mxu1 %v5032_v56  ;;  %v5111_v53 = vld [vmem:[%s5858_s21 + $0x4dc] ss:$28 sps:$4 sm:$0xff]   ;;  %v5114_v56 = vld [vmem:[%s5858_s21 + $0xc0c] ss:$28 sps:$4 sm:$0xff]  }
  0xd1   : > { %3269 = vmatprep.subr.bf16.mxu0 %v5029_v55  ;;  %v5109_v55 = vld [vmem:[%s5858_s21 + $0x4d8] ss:$28 sps:$4 sm:$0xff]  }
  0xd3   : > { %3352 = vmatpush1.bf16.msra.mxu1 %v5030_v58  ;;  %v5112_v58 = vld [vmem:[%s5858_s21 + $0xc08] ss:$28 sps:$4 sm:$0xff]  }
  0xd4   : > { %3270 = vmatpush1.bf16.msra.mxu0 %v5027_v57  ;;  %3353 = vmatprep.subr.bf16.mxu1 %v5038_v61  ;;  %v5117_v57 = vld [vmem:[%s5858_s21 + $0x514] ss:$28 sps:$4 sm:$0xff]   ;;  %v5120_v61 = vld [vmem:[%s5858_s21 + $0xc44] ss:$28 sps:$4 sm:$0xff]  }
  0xd5   : > { %3271 = vmatprep.subr.bf16.mxu0 %v5035_v59  ;;  %v5115_v59 = vld [vmem:[%s5858_s21 + $0x510] ss:$28 sps:$4 sm:$0xff]  }
  0xd7   : > { %3354 = vmatpush1.bf16.msra.mxu1 %v5036_v63  ;;  %v5118_v63 = vld [vmem:[%s5858_s21 + $0xc40] ss:$28 sps:$4 sm:$0xff]  }
  0xd8   : > { %3272 = vmatpush1.bf16.msra.mxu0 %v5033_v62  ;;  %3355 = vmatprep.subr.bf16.mxu1 %v5044_v2  ;;  %v5123_v62 = vld [vmem:[%s5858_s21 + $0x54c] ss:$28 sps:$4 sm:$0xff]   ;;  %v5126_v2 = vld [vmem:[%s5858_s21 + $0xc7c] ss:$28 sps:$4 sm:$0xff]  }
  0xd9   : > { %3273 = vmatprep.subr.bf16.mxu0 %v5041_v1  ;;  %v5121_v1 = vld [vmem:[%s5858_s21 + $0x548] ss:$28 sps:$4 sm:$0xff]  }
  0xdb   : > { %3356 = vmatpush1.bf16.msra.mxu1 %v5042_v4  ;;  %v5124_v4 = vld [vmem:[%s5858_s21 + $0xc78] ss:$28 sps:$4 sm:$0xff]  }
  0xdc   : > { %3274 = vmatpush1.bf16.msra.mxu0 %v5039_v3  ;;  %3357 = vmatprep.subr.bf16.mxu1 %v5050_v6  ;;  %v5129_v3 = vld [vmem:[%s5858_s21 + $0x584] ss:$28 sps:$4 sm:$0xff]   ;;  %v5132_v6 = vld [vmem:[%s5858_s21 + $0xcb4] ss:$28 sps:$4 sm:$0xff]  }
  0xdd   : > { %3275 = vmatprep.subr.bf16.mxu0 %v5047_v5  ;;  %v5127_v5 = vld [vmem:[%s5858_s21 + $0x580] ss:$28 sps:$4 sm:$0xff]  }
  0xdf   : > { %3358 = vmatpush1.bf16.msra.mxu1 %v5048_v8  ;;  %v5130_v8 = vld [vmem:[%s5858_s21 + $0xcb0] ss:$28 sps:$4 sm:$0xff]  }
  0xe0   : > { %3276 = vmatpush1.bf16.msra.mxu0 %v5045_v7  ;;  %3359 = vmatprep.subr.bf16.mxu1 %v5056_v11  ;;  %v5135_v7 = vld [vmem:[%s5858_s21 + $0x5bc] ss:$28 sps:$4 sm:$0xff]   ;;  %v5138_v11 = vld [vmem:[%s5858_s21 + $0xcec] ss:$28 sps:$4 sm:$0xff]  }
  0xe1   : > { %3277 = vmatprep.subr.bf16.mxu0 %v5053_v9  ;;  %v5133_v9 = vld [vmem:[%s5858_s21 + $0x5b8] ss:$28 sps:$4 sm:$0xff]  }
  0xe3   : > { %3360 = vmatpush1.bf16.msra.mxu1 %v5054_v14  ;;  %v5136_v14 = vld [vmem:[%s5858_s21 + $0xce8] ss:$28 sps:$4 sm:$0xff]  }
  0xe4   : > { %3278 = vmatpush1.bf16.msra.mxu0 %v5051_v13  ;;  %3361 = vmatprep.subr.bf16.mxu1 %v5062_v16  ;;  %v5141_v13 = vld [vmem:[%s5858_s21 + $0x5f4] ss:$28 sps:$4 sm:$0xff]   ;;  %v5144_v16 = vld [vmem:[%s5858_s21 + $0xd24] ss:$28 sps:$4 sm:$0xff]  }
  0xe5   : > { %3279 = vmatprep.subr.bf16.mxu0 %v5059_v15  ;;  %v5139_v15 = vld [vmem:[%s5858_s21 + $0x5f0] ss:$28 sps:$4 sm:$0xff]  }
  0xe7   : > { %3362 = vmatpush1.bf16.msra.mxu1 %v5060_v19  ;;  %v5142_v19 = vld [vmem:[%s5858_s21 + $0xd20] ss:$28 sps:$4 sm:$0xff]  }
  0xe8   : > { %3280 = vmatpush1.bf16.msra.mxu0 %v5057_v17  ;;  %3363 = vmatprep.subr.bf16.mxu1 %v5068_v21  ;;  %v5147_v17 = vld [vmem:[%s5858_s21 + $0x62c] ss:$28 sps:$4 sm:$0xff]   ;;  %v5150_v21 = vld [vmem:[%s5858_s21 + $0xd5c] ss:$28 sps:$4 sm:$0xff]  }
  0xe9   : > { %3281 = vmatprep.subr.bf16.mxu0 %v5065_v20  ;;  %v5145_v20 = vld [vmem:[%s5858_s21 + $0x628] ss:$28 sps:$4 sm:$0xff]  }
  0xeb   : > { %3364 = vmatpush1.bf16.msra.mxu1 %v5066_v24  ;;  %v5148_v24 = vld [vmem:[%s5858_s21 + $0xd58] ss:$28 sps:$4 sm:$0xff]  }
  0xec   : > { %3282 = vmatpush1.bf16.msra.mxu0 %v5063_v23  ;;  %3374 = vmatprep.subr.bf16.mxu1 %v5075_v26  ;;  %v5153_v23 = vld [vmem:[%s5858_s21 + $0x664] ss:$28 sps:$4 sm:$0xff]   ;;  %v5156_v26 = vld [vmem:[%s5858_s21 + $0xd94] ss:$28 sps:$4 sm:$0xff]  }
  0xed   : > { %3292 = vmatprep.subr.bf16.mxu0 %v5072_v25  ;;  %v5151_v25 = vld [vmem:[%s5858_s21 + $0x660] ss:$28 sps:$4 sm:$0xff]  }
  0xee   : > { %3366 = vmatmul.mubr.bf16.vlgmr.msra.gmra.mrb[4].mxu1 %v5959_v12 }
  0xef   : > { %3284 = vmatmul.mubr.bf16.vlgmr.msra.gmra.mrb[0].mxu0 %v6044_v28  ;;  %3375 = vmatpush1.bf16.msra.mxu1 %v5073_v29  ;;  %v5154_v29 = vld [vmem:[%s5858_s21 + $0xd90] ss:$28 sps:$4 sm:$0xff]  }
  0xf0   : > { %3293 = vmatpush1.bf16.msra.mxu0 %v5070_v27  ;;  %3376 = vmatprep.subr.bf16.mxu1 %v5081_v31  ;;  %v5159_v27 = vld [vmem:[%s5858_s21 + $0x69c] ss:$28 sps:$4 sm:$0xff]   ;;  %v5162_v31 = vld [vmem:[%s5858_s21 + $0xdcc] ss:$28 sps:$4 sm:$0xff]  }
  0xf1   : > { %3294 = vmatprep.subr.bf16.mxu0 %v5078_v30  ;;  %3324 = vmatprep.mubr.bf16.mxu0 %v6051_v32  ;;  %v5157_v30 = vld [vmem:[%s5858_s21 + $0x698] ss:$28 sps:$4 sm:$0xff]  }
  0xf2   : > { %3406 = vmatprep.mubr.bf16.mxu1 %v5942_v0 }
  0xf3   : > { %3377 = vmatpush1.bf16.msra.mxu1 %v5079_v33  ;;  %v5160_v33 = vld [vmem:[%s5858_s21 + $0xdc8] ss:$28 sps:$4 sm:$0xff]  }
  0xf4   : > { %3295 = vmatpush1.bf16.msra.mxu0 %v5076_v10  ;;  %3378 = vmatprep.subr.bf16.mxu1 %v5087_v35  ;;  %v5165_v10 = vld [vmem:[%s5858_s21 + $0x6d4] ss:$28 sps:$4 sm:$0xff]   ;;  %v5168_v35 = vld [vmem:[%s5858_s21 + $0x70c] ss:$28 sps:$4 sm:$0xff]  }
  0xf5   : > { %3296 = vmatprep.subr.bf16.mxu0 %v5084_v34  ;;  %v5163_v34 = vld [vmem:[%s5858_s21 + $0x6d0] ss:$28 sps:$4 sm:$0xff]  }
  0xf7   : > { %3379 = vmatpush1.bf16.msra.mxu1 %v5085_v37  ;;  %v6119_v37 = vcombine.high %v6044_v28, %v6044_v28 }
  0xf8   : > { %3297 = vmatpush1.bf16.msra.mxu0 %v5082_v36  ;;  %3380 = vmatprep.subr.bf16.mxu1 %v5093_v39  ;;  %v5171_v36 = vld [vmem:[%s5858_s21 + $0x14] ss:$28 sps:$4 sm:$0xff]  }
  0xf9   : > { %3298 = vmatprep.subr.bf16.mxu0 %v5090_v38  ;;  %v5166_v38 = vld [vmem:[%s5858_s21 + $0x708] ss:$28 sps:$4 sm:$0xff]   ;;  %v5169_v39 = vld [vmem:[%s5858_s21 + $0x10] ss:$28 sps:$4 sm:$0xff]  }
  0xfb   : > { %3381 = vmatpush1.bf16.msra.mxu1 %v5091_v41  ;;  %v5177_v41 = vld [vmem:[%s5858_s21 + $0x4c] ss:$28 sps:$4 sm:$0xff]  }
  0xfc   : > { %3299 = vmatpush1.bf16.msra.mxu0 %v5088_v40  ;;  %3382 = vmatprep.subr.bf16.mxu1 %v5099_v44  ;;  %v5174_v40 = vld [vmem:[%s5858_s21 + $0x744] ss:$28 sps:$4 sm:$0xff]  }
  0xfd   : > { %3300 = vmatprep.subr.bf16.mxu0 %v5096_v42  ;;  %v5172_v42 = vld [vmem:[%s5858_s21 + $0x740] ss:$28 sps:$4 sm:$0xff]   ;;  %v5175_v44 = vld [vmem:[%s5858_s21 + $0x48] ss:$28 sps:$4 sm:$0xff]  }
  0xff   : > { %3383 = vmatpush1.bf16.msra.mxu1 %v5097_v46  ;;  %v5183_v46 = vld [vmem:[%s5858_s21 + $0x84] ss:$28 sps:$4 sm:$0xff]  }
 0x100   : > { %3301 = vmatpush1.bf16.msra.mxu0 %v5094_v45  ;;  %3384 = vmatprep.subr.bf16.mxu1 %v5105_v48  ;;  %v5180_v45 = vld [vmem:[%s5858_s21 + $0x77c] ss:$28 sps:$4 sm:$0xff]  }
 0x101   : > { %3302 = vmatprep.subr.bf16.mxu0 %v5102_v47  ;;  %v5178_v47 = vld [vmem:[%s5858_s21 + $0x778] ss:$28 sps:$4 sm:$0xff]   ;;  %v5181_v48 = vld [vmem:[%s5858_s21 + $0x80] ss:$28 sps:$4 sm:$0xff]  }
 0x103   : > { %3385 = vmatpush1.bf16.msra.mxu1 %v5103_v51  ;;  %v5189_v51 = vld [vmem:[%s5858_s21 + $0xbc] ss:$28 sps:$4 sm:$0xff]  }
 0x104   : > { %3303 = vmatpush1.bf16.msra.mxu0 %v5100_v50  ;;  %3386 = vmatprep.subr.bf16.mxu1 %v5111_v53  ;;  %v5186_v50 = vld [vmem:[%s5858_s21 + $0x7b4] ss:$28 sps:$4 sm:$0xff]  }
 0x105   : > { %3304 = vmatprep.subr.bf16.mxu0 %v5108_v52  ;;  %v5184_v52 = vld [vmem:[%s5858_s21 + $0x7b0] ss:$28 sps:$4 sm:$0xff]   ;;  %v5187_v53 = vld [vmem:[%s5858_s21 + $0xb8] ss:$28 sps:$4 sm:$0xff]  }
 0x107   : > { %3387 = vmatpush1.bf16.msra.mxu1 %v5109_v55  ;;  %v5195_v55 = vld [vmem:[%s5858_s21 + $0xf4] ss:$28 sps:$4 sm:$0xff]  }
 0x108   : > { %3305 = vmatpush1.bf16.msra.mxu0 %v5106_v54  ;;  %3388 = vmatprep.subr.bf16.mxu1 %v5117_v57  ;;  %v5192_v54 = vld [vmem:[%s5858_s21 + $0x7ec] ss:$28 sps:$4 sm:$0xff]  }
 0x109   : > { %3306 = vmatprep.subr.bf16.mxu0 %v5114_v56  ;;  %v5190_v56 = vld [vmem:[%s5858_s21 + $0x7e8] ss:$28 sps:$4 sm:$0xff]   ;;  %v5193_v57 = vld [vmem:[%s5858_s21 + $0xf0] ss:$28 sps:$4 sm:$0xff]  }
 0x10b   : > { %3389 = vmatpush1.bf16.msra.mxu1 %v5115_v59  ;;  %v5201_v59 = vld [vmem:[%s5858_s21 + $0x12c] ss:$28 sps:$4 sm:$0xff]  }
 0x10c   : > { %3307 = vmatpush1.bf16.msra.mxu0 %v5112_v58  ;;  %3390 = vmatprep.subr.bf16.mxu1 %v5123_v62  ;;  %v5198_v58 = vld [vmem:[%s5858_s21 + $0x824] ss:$28 sps:$4 sm:$0xff]  }
 0x10d   : > { %3308 = vmatprep.subr.bf16.mxu0 %v5120_v61  ;;  %v5196_v61 = vld [vmem:[%s5858_s21 + $0x820] ss:$28 sps:$4 sm:$0xff]   ;;  %v5199_v62 = vld [vmem:[%s5858_s21 + $0x128] ss:$28 sps:$4 sm:$0xff]  }
 0x10f   : > { %3391 = vmatpush1.bf16.msra.mxu1 %v5121_v1  ;;  %v5207_v1 = vld [vmem:[%s5858_s21 + $0x164] ss:$28 sps:$4 sm:$0xff]  }
 0x110   : > { %3309 = vmatpush1.bf16.msra.mxu0 %v5118_v63  ;;  %3392 = vmatprep.subr.bf16.mxu1 %v5129_v3  ;;  %v5204_v63 = vld [vmem:[%s5858_s21 + $0x85c] ss:$28 sps:$4 sm:$0xff]  }
 0x111   : > { %3310 = vmatprep.subr.bf16.mxu0 %v5126_v2  ;;  %v5202_v2 = vld [vmem:[%s5858_s21 + $0x858] ss:$28 sps:$4 sm:$0xff]   ;;  %v5205_v3 = vld [vmem:[%s5858_s21 + $0x160] ss:$28 sps:$4 sm:$0xff]  }
 0x113   : > { %3393 = vmatpush1.bf16.msra.mxu1 %v5127_v5  ;;  %v5213_v5 = vld [vmem:[%s5858_s21 + $0x19c] ss:$28 sps:$4 sm:$0xff]  }
 0x114   : > { %3311 = vmatpush1.bf16.msra.mxu0 %v5124_v4  ;;  %3394 = vmatprep.subr.bf16.mxu1 %v5135_v7  ;;  %v5210_v4 = vld [vmem:[%s5858_s21 + $0x894] ss:$28 sps:$4 sm:$0xff]  }
 0x115   : > { %3312 = vmatprep.subr.bf16.mxu0 %v5132_v6  ;;  %v5208_v6 = vld [vmem:[%s5858_s21 + $0x890] ss:$28 sps:$4 sm:$0xff]   ;;  %v5211_v7 = vld [vmem:[%s5858_s21 + $0x198] ss:$28 sps:$4 sm:$0xff]  }
 0x117   : > { %3395 = vmatpush1.bf16.msra.mxu1 %v5133_v9  ;;  %v5219_v9 = vld [vmem:[%s5858_s21 + $0x1d4] ss:$28 sps:$4 sm:$0xff]  }
 0x118   : > { %3313 = vmatpush1.bf16.msra.mxu0 %v5130_v8  ;;  %3396 = vmatprep.subr.bf16.mxu1 %v5141_v13  ;;  %v5216_v8 = vld [vmem:[%s5858_s21 + $0x8cc] ss:$28 sps:$4 sm:$0xff]  }
 0x119   : > { %3314 = vmatprep.subr.bf16.mxu0 %v5138_v11  ;;  %v5214_v11 = vld [vmem:[%s5858_s21 + $0x8c8] ss:$28 sps:$4 sm:$0xff]   ;;  %v5217_v13 = vld [vmem:[%s5858_s21 + $0x1d0] ss:$28 sps:$4 sm:$0xff]  }
 0x11b   : > { %3397 = vmatpush1.bf16.msra.mxu1 %v5139_v15  ;;  %v5225_v15 = vld [vmem:[%s5858_s21 + $0x20c] ss:$28 sps:$4 sm:$0xff]  }
 0x11c   : > { %3315 = vmatpush1.bf16.msra.mxu0 %v5136_v14  ;;  %3398 = vmatprep.subr.bf16.mxu1 %v5147_v17  ;;  %v5222_v14 = vld [vmem:[%s5858_s21 + $0x904] ss:$28 sps:$4 sm:$0xff]  }
 0x11d   : > { %3316 = vmatprep.subr.bf16.mxu0 %v5144_v16  ;;  %v5220_v16 = vld [vmem:[%s5858_s21 + $0x900] ss:$28 sps:$4 sm:$0xff]   ;;  %v5223_v17 = vld [vmem:[%s5858_s21 + $0x208] ss:$28 sps:$4 sm:$0xff]  }
 0x11f   : > { %3399 = vmatpush1.bf16.msra.mxu1 %v5145_v20  ;;  %v5231_v20 = vld [vmem:[%s5858_s21 + $0x244] ss:$28 sps:$4 sm:$0xff]  }
 0x120   : > { %3317 = vmatpush1.bf16.msra.mxu0 %v5142_v19  ;;  %3400 = vmatprep.subr.bf16.mxu1 %v5153_v23  ;;  %v5228_v19 = vld [vmem:[%s5858_s21 + $0x93c] ss:$28 sps:$4 sm:$0xff]  }
 0x121   : > { %3318 = vmatprep.subr.bf16.mxu0 %v5150_v21  ;;  %v5226_v21 = vld [vmem:[%s5858_s21 + $0x938] ss:$28 sps:$4 sm:$0xff]   ;;  %v5229_v23 = vld [vmem:[%s5858_s21 + $0x240] ss:$28 sps:$4 sm:$0xff]  }
 0x123   : > { %3401 = vmatpush1.bf16.msra.mxu1 %v5151_v25  ;;  %v5237_v25 = vld [vmem:[%s5858_s21 + $0x27c] ss:$28 sps:$4 sm:$0xff]  }
 0x124   : > { %3319 = vmatpush1.bf16.msra.mxu0 %v5148_v24  ;;  %3402 = vmatprep.subr.bf16.mxu1 %v5159_v27  ;;  %v5234_v24 = vld [vmem:[%s5858_s21 + $0x974] ss:$28 sps:$4 sm:$0xff]  }
 0x125   : > { %3320 = vmatprep.subr.bf16.mxu0 %v5156_v26  ;;  %v5232_v26 = vld [vmem:[%s5858_s21 + $0x970] ss:$28 sps:$4 sm:$0xff]   ;;  %v5235_v27 = vld [vmem:[%s5858_s21 + $0x278] ss:$28 sps:$4 sm:$0xff]  }
 0x127   : > { %3403 = vmatpush1.bf16.msra.mxu1 %v5157_v30  ;;  %v5243_v30 = vld [vmem:[%s5858_s21 + $0x2b4] ss:$28 sps:$4 sm:$0xff]  }
 0x128   : > { %3321 = vmatpush1.bf16.msra.mxu0 %v5154_v29  ;;  %3404 = vmatprep.subr.bf16.mxu1 %v5165_v10  ;;  %v5240_v29 = vld [vmem:[%s5858_s21 + $0x9ac] ss:$28 sps:$4 sm:$0xff]  }
 0x129   : > { %3322 = vmatprep.subr.bf16.mxu0 %v5162_v31  ;;  %v5238_v31 = vld [vmem:[%s5858_s21 + $0x9a8] ss:$28 sps:$4 sm:$0xff]   ;;  %v5241_v10 = vld [vmem:[%s5858_s21 + $0x2b0] ss:$28 sps:$4 sm:$0xff]  }
 0x12b   : > { %3405 = vmatpush1.bf16.msra.mxu1 %v5163_v34  ;;  %v5249_v34 = vld [vmem:[%s5858_s21 + $0x2ec] ss:$28 sps:$4 sm:$0xff]  }
 0x12c   : > { %3323 = vmatpush1.bf16.msra.mxu0 %v5160_v33  ;;  %3415 = vmatprep.subr.bf16.mxu1 %v5168_v35  ;;  %v5246_v33 = vld [vmem:[%s5858_s21 + $0x9e4] ss:$28 sps:$4 sm:$0xff]  }
 0x12d   : > { %3497 = vmatprep.subr.bf16.mxu0 %v5171_v36  ;;  %v5244_v35 = vld [vmem:[%s5858_s21 + $0x9e0] ss:$28 sps:$4 sm:$0xff]   ;;  %v5247_v36 = vld [vmem:[%s5858_s21 + $0x2e8] ss:$28 sps:$4 sm:$0xff]  }
 0x12e   : > { %3407 = vmatmul.mubr.bf16.vlgmr.msra.gmra.mrb[4].mxu1 %v5969_v18 }
 0x12f   : > { %3325 = vmatmul.mubr.bf16.vlgmr.msra.gmra.mrb[0].mxu0 %v6119_v37  ;;  %3416 = vmatpush1.bf16.msra.mxu1 %v5166_v38  ;;  %v5252_v38 = vld [vmem:[%s5858_s21 + $0xa1c] ss:$28 sps:$4 sm:$0xff]  }
 0x130   : > { %3498 = vmatpush1.bf16.msra.mxu0 %v5169_v39  ;;  %3417 = vmatprep.subr.bf16.mxu1 %v5174_v40  ;;  %v5255_v39 = vld [vmem:[%s5858_s21 + $0x324] ss:$28 sps:$4 sm:$0xff]   ;;  %v5250_v40 = vld [vmem:[%s5858_s21 + $0xa18] ss:$28 sps:$4 sm:$0xff]  }
 0x131   : > { %3499 = vmatprep.subr.bf16.mxu0 %v5177_v41  ;;  %3447 = vmatprep.mubr.bf16.mxu1 %v5975_v22  ;;  %v5253_v41 = vld [vmem:[%s5858_s21 + $0x320] ss:$28 sps:$4 sm:$0xff]  }
 0x132   : > { %3529 = vmatprep.mubr.bf16.mxu0 %v5935_v60 }
 0x133   : > { %3418 = vmatpush1.bf16.msra.mxu1 %v5172_v42  ;;  %v5258_v42 = vld [vmem:[%s5858_s21 + $0xa54] ss:$28 sps:$4 sm:$0xff]  }
 0x134   : > { %3500 = vmatpush1.bf16.msra.mxu0 %v5175_v44  ;;  %3419 = vmatprep.subr.bf16.mxu1 %v5180_v45  ;;  %v5261_v44 = vld [vmem:[%s5858_s21 + $0x35c] ss:$28 sps:$4 sm:$0xff]   ;;  %v5256_v45 = vld [vmem:[%s5858_s21 + $0xa50] ss:$28 sps:$4 sm:$0xff]  }
 0x135   : > { %3501 = vmatprep.subr.bf16.mxu0 %v5183_v46  ;;  %v5259_v46 = vld [vmem:[%s5858_s21 + $0x358] ss:$28 sps:$4 sm:$0xff]  }
 0x137   : > { %3420 = vmatpush1.bf16.msra.mxu1 %v5178_v47  ;;  %v5264_v47 = vld [vmem:[%s5858_s21 + $0xa8c] ss:$28 sps:$4 sm:$0xff]  }
 0x138   : > { %3502 = vmatpush1.bf16.msra.mxu0 %v5181_v48  ;;  %3421 = vmatprep.subr.bf16.mxu1 %v5186_v50  ;;  %v5267_v48 = vld [vmem:[%s5858_s21 + $0x394] ss:$28 sps:$4 sm:$0xff]   ;;  %v5262_v50 = vld [vmem:[%s5858_s21 + $0xa88] ss:$28 sps:$4 sm:$0xff]  }
 0x139   : > { %3503 = vmatprep.subr.bf16.mxu0 %v5189_v51  ;;  %v5265_v51 = vld [vmem:[%s5858_s21 + $0x390] ss:$28 sps:$4 sm:$0xff]  }
 0x13b   : > { %3422 = vmatpush1.bf16.msra.mxu1 %v5184_v52  ;;  %v5270_v52 = vld [vmem:[%s5858_s21 + $0xac4] ss:$28 sps:$4 sm:$0xff]  }
 0x13c   : > { %3504 = vmatpush1.bf16.msra.mxu0 %v5187_v53  ;;  %3423 = vmatprep.subr.bf16.mxu1 %v5192_v54  ;;  %v5273_v53 = vld [vmem:[%s5858_s21 + $0x3cc] ss:$28 sps:$4 sm:$0xff]   ;;  %v5268_v54 = vld [vmem:[%s5858_s21 + $0xac0] ss:$28 sps:$4 sm:$0xff]  }
 0x13d   : > { %3505 = vmatprep.subr.bf16.mxu0 %v5195_v55  ;;  %v5271_v55 = vld [vmem:[%s5858_s21 + $0x3c8] ss:$28 sps:$4 sm:$0xff]  }
 0x13f   : > { %3424 = vmatpush1.bf16.msra.mxu1 %v5190_v56  ;;  %v5276_v56 = vld [vmem:[%s5858_s21 + $0xafc] ss:$28 sps:$4 sm:$0xff]  }
 0x140   : > { %3506 = vmatpush1.bf16.msra.mxu0 %v5193_v57  ;;  %3425 = vmatprep.subr.bf16.mxu1 %v5198_v58  ;;  %v5279_v57 = vld [vmem:[%s5858_s21 + $0x404] ss:$28 sps:$4 sm:$0xff]   ;;  %v5274_v58 = vld [vmem:[%s5858_s21 + $0xaf8] ss:$28 sps:$4 sm:$0xff]  }
 0x141   : > { %3507 = vmatprep.subr.bf16.mxu0 %v5201_v59  ;;  %v5277_v59 = vld [vmem:[%s5858_s21 + $0x400] ss:$28 sps:$4 sm:$0xff]  }
 0x143   : > { %3426 = vmatpush1.bf16.msra.mxu1 %v5196_v61  ;;  %v5282_v61 = vld [vmem:[%s5858_s21 + $0xb34] ss:$28 sps:$4 sm:$0xff]  }
 0x144   : > { %3508 = vmatpush1.bf16.msra.mxu0 %v5199_v62  ;;  %3427 = vmatprep.subr.bf16.mxu1 %v5204_v63  ;;  %v5285_v62 = vld [vmem:[%s5858_s21 + $0x43c] ss:$28 sps:$4 sm:$0xff]   ;;  %v5280_v63 = vld [vmem:[%s5858_s21 + $0xb30] ss:$28 sps:$4 sm:$0xff]  }
 0x145   : > { %3509 = vmatprep.subr.bf16.mxu0 %v5207_v1  ;;  %v5283_v1 = vld [vmem:[%s5858_s21 + $0x438] ss:$28 sps:$4 sm:$0xff]  }
 0x147   : > { %3428 = vmatpush1.bf16.msra.mxu1 %v5202_v2  ;;  %v5288_v2 = vld [vmem:[%s5858_s21 + $0xb6c] ss:$28 sps:$4 sm:$0xff]  }
 0x148   : > { %3510 = vmatpush1.bf16.msra.mxu0 %v5205_v3  ;;  %3429 = vmatprep.subr.bf16.mxu1 %v5210_v4  ;;  %v5291_v3 = vld [vmem:[%s5858_s21 + $0x474] ss:$28 sps:$4 sm:$0xff]   ;;  %v5286_v4 = vld [vmem:[%s5858_s21 + $0xb68] ss:$28 sps:$4 sm:$0xff]  }
 0x149   : > { %3511 = vmatprep.subr.bf16.mxu0 %v5213_v5  ;;  %v5289_v5 = vld [vmem:[%s5858_s21 + $0x470] ss:$28 sps:$4 sm:$0xff]  }
 0x14b   : > { %3430 = vmatpush1.bf16.msra.mxu1 %v5208_v6  ;;  %v5294_v6 = vld [vmem:[%s5858_s21 + $0xba4] ss:$28 sps:$4 sm:$0xff]  }
 0x14c   : > { %3512 = vmatpush1.bf16.msra.mxu0 %v5211_v7  ;;  %3431 = vmatprep.subr.bf16.mxu1 %v5216_v8  ;;  %v5297_v7 = vld [vmem:[%s5858_s21 + $0x4ac] ss:$28 sps:$4 sm:$0xff]   ;;  %v5292_v8 = vld [vmem:[%s5858_s21 + $0xba0] ss:$28 sps:$4 sm:$0xff]  }
 0x14d   : > { %3513 = vmatprep.subr.bf16.mxu0 %v5219_v9  ;;  %v5295_v9 = vld [vmem:[%s5858_s21 + $0x4a8] ss:$28 sps:$4 sm:$0xff]  }
 0x14f   : > { %3432 = vmatpush1.bf16.msra.mxu1 %v5214_v11  ;;  %v5300_v11 = vld [vmem:[%s5858_s21 + $0xbdc] ss:$28 sps:$4 sm:$0xff]  }
 0x150   : > { %3514 = vmatpush1.bf16.msra.mxu0 %v5217_v13  ;;  %3433 = vmatprep.subr.bf16.mxu1 %v5222_v14  ;;  %v5303_v13 = vld [vmem:[%s5858_s21 + $0x4e4] ss:$28 sps:$4 sm:$0xff]  }
 0x151   : > { %3515 = vmatprep.subr.bf16.mxu0 %v5225_v15  ;;  %v5298_v15 = vld [vmem:[%s5858_s21 + $0xbd8] ss:$28 sps:$4 sm:$0xff]  }
 0x153   : > { %3434 = vmatpush1.bf16.msra.mxu1 %v5220_v16 }
 0x154   : > { %3516 = vmatpush1.bf16.msra.mxu0 %v5223_v17  ;;  %3435 = vmatprep.subr.bf16.mxu1 %v5228_v19  ;;  %v5301_v17 = vld [vmem:[%s5858_s21 + $0x4e0] ss:$28 sps:$4 sm:$0xff]  }
 0x155   : > { %3517 = vmatprep.subr.bf16.mxu0 %v5231_v20 }
 0x157   : > { %3436 = vmatpush1.bf16.msra.mxu1 %v5226_v21  ;;  %v5306_v21 = vld [vmem:[%s5858_s21 + $0xc14] ss:$28 sps:$4 sm:$0xff]  }
 0x158   : > { %3518 = vmatpush1.bf16.msra.mxu0 %v5229_v23  ;;  %3437 = vmatprep.subr.bf16.mxu1 %v5234_v24  ;;  %v5309_v23 = vld [vmem:[%s5858_s21 + $0x51c] ss:$28 sps:$4 sm:$0xff]   ;;  %v5304_v24 = vld [vmem:[%s5858_s21 + $0xc10] ss:$28 sps:$4 sm:$0xff]  }
 0x159   : > { %3519 = vmatprep.subr.bf16.mxu0 %v5237_v25  ;;  %v5307_v25 = vld [vmem:[%s5858_s21 + $0x518] ss:$28 sps:$4 sm:$0xff]  }
 0x15b   : > { %3438 = vmatpush1.bf16.msra.mxu1 %v5232_v26  ;;  %v5312_v26 = vld [vmem:[%s5858_s21 + $0xc4c] ss:$28 sps:$4 sm:$0xff]  }
 0x15c   : > { %3520 = vmatpush1.bf16.msra.mxu0 %v5235_v27  ;;  %3439 = vmatprep.subr.bf16.mxu1 %v5240_v29  ;;  %v5315_v27 = vld [vmem:[%s5858_s21 + $0x554] ss:$28 sps:$4 sm:$0xff]   ;;  %v5310_v29 = vld [vmem:[%s5858_s21 + $0xc48] ss:$28 sps:$4 sm:$0xff]  }
 0x15d   : > { %3521 = vmatprep.subr.bf16.mxu0 %v5243_v30  ;;  %v5313_v30 = vld [vmem:[%s5858_s21 + $0x550] ss:$28 sps:$4 sm:$0xff]  }
 0x15f   : > { %3440 = vmatpush1.bf16.msra.mxu1 %v5238_v31  ;;  %v5318_v31 = vld [vmem:[%s5858_s21 + $0xc84] ss:$28 sps:$4 sm:$0xff]  }
 0x160   : > { %3522 = vmatpush1.bf16.msra.mxu0 %v5241_v10  ;;  %3441 = vmatprep.subr.bf16.mxu1 %v5246_v33  ;;  %v5321_v10 = vld [vmem:[%s5858_s21 + $0x58c] ss:$28 sps:$4 sm:$0xff]   ;;  %v5316_v33 = vld [vmem:[%s5858_s21 + $0xc80] ss:$28 sps:$4 sm:$0xff]  }
 0x161   : > { %3523 = vmatprep.subr.bf16.mxu0 %v5249_v34  ;;  %v5319_v34 = vld [vmem:[%s5858_s21 + $0x588] ss:$28 sps:$4 sm:$0xff]  }
 0x163   : > { %3442 = vmatpush1.bf16.msra.mxu1 %v5244_v35  ;;  %v5324_v35 = vld [vmem:[%s5858_s21 + $0xcbc] ss:$28 sps:$4 sm:$0xff]  }
 0x164   : > { %3524 = vmatpush1.bf16.msra.mxu0 %v5247_v36  ;;  %3443 = vmatprep.subr.bf16.mxu1 %v5252_v38  ;;  %v5327_v36 = vld [vmem:[%s5858_s21 + $0x5c4] ss:$28 sps:$4 sm:$0xff]   ;;  %v5322_v38 = vld [vmem:[%s5858_s21 + $0xcb8] ss:$28 sps:$4 sm:$0xff]  }
 0x165   : > { %3525 = vmatprep.subr.bf16.mxu0 %v5255_v39  ;;  %v5325_v39 = vld [vmem:[%s5858_s21 + $0x5c0] ss:$28 sps:$4 sm:$0xff]  }
 0x167   : > { %3444 = vmatpush1.bf16.msra.mxu1 %v5250_v40  ;;  %v5330_v40 = vld [vmem:[%s5858_s21 + $0xcf4] ss:$28 sps:$4 sm:$0xff]  }
 0x168   : > { %3526 = vmatpush1.bf16.msra.mxu0 %v5253_v41  ;;  %3445 = vmatprep.subr.bf16.mxu1 %v5258_v42  ;;  %v5333_v41 = vld [vmem:[%s5858_s21 + $0x5fc] ss:$28 sps:$4 sm:$0xff]   ;;  %v5328_v42 = vld [vmem:[%s5858_s21 + $0xcf0] ss:$28 sps:$4 sm:$0xff]  }
 0x169   : > { %3527 = vmatprep.subr.bf16.mxu0 %v5261_v44  ;;  %v5331_v44 = vld [vmem:[%s5858_s21 + $0x5f8] ss:$28 sps:$4 sm:$0xff]  }
 0x16b   : > { %3446 = vmatpush1.bf16.msra.mxu1 %v5256_v45  ;;  %v5336_v45 = vld [vmem:[%s5858_s21 + $0xd2c] ss:$28 sps:$4 sm:$0xff]  }
 0x16c   : > { %3528 = vmatpush1.bf16.msra.mxu0 %v5259_v46  ;;  %3456 = vmatprep.subr.bf16.mxu1 %v5264_v47  ;;  %v5339_v46 = vld [vmem:[%s5858_s21 + $0x634] ss:$28 sps:$4 sm:$0xff]   ;;  %v5334_v47 = vld [vmem:[%s5858_s21 + $0xd28] ss:$28 sps:$4 sm:$0xff]  }
 0x16d   : > { %3538 = vmatprep.subr.bf16.mxu0 %v5267_v48  ;;  %v5337_v48 = vld [vmem:[%s5858_s21 + $0x630] ss:$28 sps:$4 sm:$0xff]  }
 0x16e   : > { %3448 = vmatmul.mubr.bf16.vlgmr.msra.gmra.mrb[4].mxu1 %v6044_v28 }
 0x16f   : > { %3530 = vmatmul.mubr.bf16.vlgmr.msra.gmra.mrb[4].mxu0 %v5959_v12  ;;  %3457 = vmatpush1.bf16.msra.mxu1 %v5262_v50  ;;  %v5342_v50 = vld [vmem:[%s5858_s21 + $0xd64] ss:$28 sps:$4 sm:$0xff]  }
 0x170   : > { %3539 = vmatpush1.bf16.msra.mxu0 %v5265_v51  ;;  %3458 = vmatprep.subr.bf16.mxu1 %v5270_v52  ;;  %v5345_v51 = vld [vmem:[%s5858_s21 + $0x66c] ss:$28 sps:$4 sm:$0xff]   ;;  %v5340_v52 = vld [vmem:[%s5858_s21 + $0xd60] ss:$28 sps:$4 sm:$0xff]  }
 0x171   : > { %3540 = vmatprep.subr.bf16.mxu0 %v5273_v53  ;;  %3488 = vmatprep.mubr.bf16.mxu1 %v6051_v32  ;;  %v5343_v53 = vld [vmem:[%s5858_s21 + $0x668] ss:$28 sps:$4 sm:$0xff]  }
 0x172   : > { %3570 = vmatprep.mubr.bf16.mxu0 %v5942_v0 }
 0x173   : > { %3459 = vmatpush1.bf16.msra.mxu1 %v5268_v54  ;;  %v5348_v54 = vld [vmem:[%s5858_s21 + $0xd9c] ss:$28 sps:$4 sm:$0xff]  }
 0x174   : > { %3541 = vmatpush1.bf16.msra.mxu0 %v5271_v55  ;;  %3460 = vmatprep.subr.bf16.mxu1 %v5276_v56  ;;  %v5351_v55 = vld [vmem:[%s5858_s21 + $0x6a4] ss:$28 sps:$4 sm:$0xff]   ;;  %v5346_v56 = vld [vmem:[%s5858_s21 + $0xd98] ss:$28 sps:$4 sm:$0xff]  }
 0x175   : > { %3542 = vmatprep.subr.bf16.mxu0 %v5279_v57  ;;  %v5349_v57 = vld [vmem:[%s5858_s21 + $0x6a0] ss:$28 sps:$4 sm:$0xff]  }
 0x177   : > { %3461 = vmatpush1.bf16.msra.mxu1 %v5274_v58  ;;  %v5354_v58 = vld [vmem:[%s5858_s21 + $0xdd4] ss:$28 sps:$4 sm:$0xff]  }
 0x178   : > { %3543 = vmatpush1.bf16.msra.mxu0 %v5277_v59  ;;  %3462 = vmatprep.subr.bf16.mxu1 %v5282_v61  ;;  %v5357_v59 = vld [vmem:[%s5858_s21 + $0x6dc] ss:$28 sps:$4 sm:$0xff]   ;;  %v5352_v61 = vld [vmem:[%s5858_s21 + $0xdd0] ss:$28 sps:$4 sm:$0xff]  }
 0x179   : > { %3544 = vmatprep.subr.bf16.mxu0 %v5285_v62  ;;  %v5355_v62 = vld [vmem:[%s5858_s21 + $0x6d8] ss:$28 sps:$4 sm:$0xff]  }
 0x17b   : > { %3463 = vmatpush1.bf16.msra.mxu1 %v5280_v63  ;;  %v5360_v63 = vld [vmem:[%s5858_s21 + $0x714] ss:$28 sps:$4 sm:$0xff]  }
 0x17c   : > { %3545 = vmatpush1.bf16.msra.mxu0 %v5283_v1  ;;  %3464 = vmatprep.subr.bf16.mxu1 %v5288_v2  ;;  %v5361_v1 = vld [vmem:[%s5858_s21 + $0x1d8] ss:$28 sps:$4 sm:$0xff]   ;;  %v5358_v2 = vld [vmem:[%s5858_s21 + $0x710] ss:$28 sps:$4 sm:$0xff]  }
 0x17d   : > { %3546 = vmatprep.subr.bf16.mxu0 %v5291_v3  ;;  %v5362_v3 = vld [vmem:[%s5858_s21 + $0x18] ss:$28 sps:$4 sm:$0xff]  }
 0x17f   : > { %3465 = vmatpush1.bf16.msra.mxu1 %v5286_v4  ;;  %v5365_v4 = vld [vmem:[%s5858_s21 + $0x74c] ss:$28 sps:$4 sm:$0xff]  }
 0x180   : > { %3547 = vmatpush1.bf16.msra.mxu0 %v5289_v5  ;;  %3466 = vmatprep.subr.bf16.mxu1 %v5294_v6  ;;  %v5366_v5 = vld [vmem:[%s5858_s21 + $0x210] ss:$28 sps:$4 sm:$0xff]   ;;  %v5363_v6 = vld [vmem:[%s5858_s21 + $0x748] ss:$28 sps:$4 sm:$0xff]  }
 0x181   : > { %3548 = vmatprep.subr.bf16.mxu0 %v5297_v7  ;;  %v6217_v14 = vpop.f32.mrb[0].mxu1  ;;  %v5367_v7 = vld [vmem:[%s5858_s21 + $0x50] ss:$28 sps:$4 sm:$0xff]  }
 0x182   : > { %v6220_v16 = vpop.f32.mrb[1].mxu1 }
 0x183   : > { %v3207_v19 = vpop.f32.mrb[2].mxu1  ;;  %3467 = vmatpush1.bf16.msra.mxu1 %v5292_v8  ;;  %v5370_v8 = vld [vmem:[%s5858_s21 + $0x784] ss:$28 sps:$4 sm:$0xff]  }
 0x184   : > { %3549 = vmatpush1.bf16.msra.mxu0 %v5295_v9  ;;  %v3208_v20 = vpop.f32.mrb[3].mxu1  ;;  %3468 = vmatprep.subr.bf16.mxu1 %v5300_v11  ;;  %v5371_v9 = vld [vmem:[%s5858_s21 + $0x248] ss:$28 sps:$4 sm:$0xff]   ;;  %v5368_v11 = vld [vmem:[%s5858_s21 + $0x780] ss:$28 sps:$4 sm:$0xff]  }
 0x185   : > { %3550 = vmatprep.subr.bf16.mxu0 %v5303_v13  ;;  %v5372_v13 = vld [vmem:[%s5858_s21 + $0x88] ss:$28 sps:$4 sm:$0xff]   ;;  %v5373_v19 = vld [vmem:[%s5858_s21 + $0x7b8] ss:$28 sps:$4 sm:$0xff]  }
 0x186   : > { %v5380_v20 = vld [vmem:[%s5858_s21 + $0x7f4] ss:$28 sps:$4 sm:$0xff]  }
 0x187   : > { %3469 = vmatpush1.bf16.msra.mxu1 %v5298_v15  ;;  %v5375_v15 = vld [vmem:[%s5858_s21 + $0x7bc] ss:$28 sps:$4 sm:$0xff]  }
 0x188   : > { %3551 = vmatpush1.bf16.msra.mxu0 %v5301_v17  ;;  %3470 = vmatprep.subr.bf16.mxu1 %v5306_v21  ;;  %v5376_v17 = vld [vmem:[%s5858_s21 + $0x280] ss:$28 sps:$4 sm:$0xff]   ;;  %v5381_v21 = vld [vmem:[%s5858_s21 + $0x2b8] ss:$28 sps:$4 sm:$0xff]  }
 0x189   : > { %3552 = vmatprep.subr.bf16.mxu0 %v5309_v23  ;;  %v5378_v23 = vld [vmem:[%s5858_s21 + $0x7f0] ss:$28 sps:$4 sm:$0xff]  }
 0x18b   : > { %3471 = vmatpush1.bf16.msra.mxu1 %v5304_v24  ;;  %v5382_v24 = vld [vmem:[%s5858_s21 + $0xf8] ss:$28 sps:$4 sm:$0xff]  }
 0x18c   : > { %3553 = vmatpush1.bf16.msra.mxu0 %v5307_v25  ;;  %3472 = vmatprep.subr.bf16.mxu1 %v5312_v26  ;;  %v5385_v25 = vld [vmem:[%s5858_s21 + $0x82c] ss:$28 sps:$4 sm:$0xff]  }
 0x18d   : > { %3554 = vmatprep.subr.bf16.mxu0 %v5315_v27  ;;  %v5386_v26 = vld [vmem:[%s5858_s21 + $0x2f0] ss:$28 sps:$4 sm:$0xff]   ;;  %v5383_v27 = vld [vmem:[%s5858_s21 + $0x828] ss:$28 sps:$4 sm:$0xff]  }
 0x18f   : > { %3473 = vmatpush1.bf16.msra.mxu1 %v5310_v29  ;;  %v5387_v29 = vld [vmem:[%s5858_s21 + $0x130] ss:$28 sps:$4 sm:$0xff]  }
 0x190   : > { %3555 = vmatpush1.bf16.msra.mxu0 %v5313_v30  ;;  %3474 = vmatprep.subr.bf16.mxu1 %v5318_v31  ;;  %v5390_v30 = vld [vmem:[%s5858_s21 + $0x864] ss:$28 sps:$4 sm:$0xff]  }
 0x191   : > { %3556 = vmatprep.subr.bf16.mxu0 %v5321_v10  ;;  %v5391_v31 = vld [vmem:[%s5858_s21 + $0x328] ss:$28 sps:$4 sm:$0xff]   ;;  %v5388_v10 = vld [vmem:[%s5858_s21 + $0x860] ss:$28 sps:$4 sm:$0xff]  }
 0x193   : > { %3475 = vmatpush1.bf16.msra.mxu1 %v5316_v33  ;;  %v5392_v33 = vld [vmem:[%s5858_s21 + $0x168] ss:$28 sps:$4 sm:$0xff]  }
 0x194   : > { %3557 = vmatpush1.bf16.msra.mxu0 %v5319_v34  ;;  %3476 = vmatprep.subr.bf16.mxu1 %v5324_v35  ;;  %v5395_v34 = vld [vmem:[%s5858_s21 + $0x89c] ss:$28 sps:$4 sm:$0xff]  }
 0x195   : > { %3558 = vmatprep.subr.bf16.mxu0 %v5327_v36  ;;  %v5396_v35 = vld [vmem:[%s5858_s21 + $0x360] ss:$28 sps:$4 sm:$0xff]   ;;  %v5393_v36 = vld [vmem:[%s5858_s21 + $0x898] ss:$28 sps:$4 sm:$0xff]  }
 0x197   : > { %3477 = vmatpush1.bf16.msra.mxu1 %v5322_v38  ;;  %v5397_v38 = vld [vmem:[%s5858_s21 + $0x1a0] ss:$28 sps:$4 sm:$0xff]  }
 0x198   : > { %3559 = vmatpush1.bf16.msra.mxu0 %v5325_v39  ;;  %3478 = vmatprep.subr.bf16.mxu1 %v5330_v40  ;;  %v5400_v39 = vld [vmem:[%s5858_s21 + $0x8d4] ss:$28 sps:$4 sm:$0xff]  }
 0x199   : > { %3560 = vmatprep.subr.bf16.mxu0 %v5333_v41  ;;  %v5401_v40 = vld [vmem:[%s5858_s21 + $0x558] ss:$28 sps:$4 sm:$0xff]   ;;  %v5398_v41 = vld [vmem:[%s5858_s21 + $0x8d0] ss:$28 sps:$4 sm:$0xff]  }
 0x19b   : > { %3479 = vmatpush1.bf16.msra.mxu1 %v5328_v42  ;;  %v5402_v42 = vld [vmem:[%s5858_s21 + $0x398] ss:$28 sps:$4 sm:$0xff]  }
 0x19c   : > { %3561 = vmatpush1.bf16.msra.mxu0 %v5331_v44  ;;  %3480 = vmatprep.subr.bf16.mxu1 %v5336_v45  ;;  %v5405_v44 = vld [vmem:[%s5858_s21 + $0x90c] ss:$28 sps:$4 sm:$0xff]  }
 0x19d   : > { %3562 = vmatprep.subr.bf16.mxu0 %v5339_v46  ;;  %v5406_v45 = vld [vmem:[%s5858_s21 + $0x590] ss:$28 sps:$4 sm:$0xff]   ;;  %v5403_v46 = vld [vmem:[%s5858_s21 + $0x908] ss:$28 sps:$4 sm:$0xff]  }
 0x19f   : > { %3481 = vmatpush1.bf16.msra.mxu1 %v5334_v47  ;;  %v5407_v47 = vld [vmem:[%s5858_s21 + $0x3d0] ss:$28 sps:$4 sm:$0xff]  }
 0x1a0   : > { %3563 = vmatpush1.bf16.msra.mxu0 %v5337_v48  ;;  %3482 = vmatprep.subr.bf16.mxu1 %v5342_v50  ;;  %v5410_v48 = vld [vmem:[%s5858_s21 + $0x944] ss:$28 sps:$4 sm:$0xff]  }
 0x1a1   : > { %3564 = vmatprep.subr.bf16.mxu0 %v5345_v51  ;;  %v5411_v50 = vld [vmem:[%s5858_s21 + $0x5c8] ss:$28 sps:$4 sm:$0xff]   ;;  %v5408_v51 = vld [vmem:[%s5858_s21 + $0x940] ss:$28 sps:$4 sm:$0xff]  }
 0x1a3   : > { %3483 = vmatpush1.bf16.msra.mxu1 %v5340_v52  ;;  %v5415_v52 = vld [vmem:[%s5858_s21 + $0x97c] ss:$28 sps:$4 sm:$0xff]  }
 0x1a4   : > { %3565 = vmatpush1.bf16.msra.mxu0 %v5343_v53  ;;  %3484 = vmatprep.subr.bf16.mxu1 %v5348_v54  ;;  %v5416_v53 = vld [vmem:[%s5858_s21 + $0x600] ss:$28 sps:$4 sm:$0xff]   ;;  %v5413_v54 = vld [vmem:[%s5858_s21 + $0x978] ss:$28 sps:$4 sm:$0xff]  }
 0x1a5   : > { %3566 = vmatprep.subr.bf16.mxu0 %v5351_v55  ;;  %v5417_v55 = vld [vmem:[%s5858_s21 + $0x440] ss:$28 sps:$4 sm:$0xff]  }
 0x1a7   : > { %3485 = vmatpush1.bf16.msra.mxu1 %v5346_v56  ;;  %v5421_v56 = vld [vmem:[%s5858_s21 + $0x638] ss:$28 sps:$4 sm:$0xff]  }
 0x1a8   : > { %3567 = vmatpush1.bf16.msra.mxu0 %v5349_v57  ;;  %3486 = vmatprep.subr.bf16.mxu1 %v5354_v58  ;;  %v5418_v57 = vld [vmem:[%s5858_s21 + $0x9b0] ss:$28 sps:$4 sm:$0xff]   ;;  %v5422_v58 = vld [vmem:[%s5858_s21 + $0x478] ss:$28 sps:$4 sm:$0xff]  }
 0x1a9   : > { %3568 = vmatprep.subr.bf16.mxu0 %v5357_v59  ;;  %v5425_v59 = vld [vmem:[%s5858_s21 + $0x9ec] ss:$28 sps:$4 sm:$0xff]  }
 0x1ab   : > { %3487 = vmatpush1.bf16.msra.mxu1 %v5352_v61  ;;  %v5426_v61 = vld [vmem:[%s5858_s21 + $0x670] ss:$28 sps:$4 sm:$0xff]  }
 0x1ac   : > { %3569 = vmatpush1.bf16.msra.mxu0 %v5355_v62  ;;  %4697 = vmatprep.subr.bf16.mxu1 %v5361_v1  ;;  %v5423_v62 = vld [vmem:[%s5858_s21 + $0x9e8] ss:$28 sps:$4 sm:$0xff]  }
 0x1ad   : > { %3579 = vmatprep.subr.bf16.mxu0 %v5360_v63  ;;  %v5427_v63 = vld [vmem:[%s5858_s21 + $0x4b0] ss:$28 sps:$4 sm:$0xff]   ;;  %v5430_v1 = vld [vmem:[%s5858_s21 + $0xa24] ss:$28 sps:$4 sm:$0xff]  }
 0x1ae   : > { %3489 = vmatmul.mubr.bf16.vlgmr.msra.gmra.mrb[4].mxu1 %v6119_v37 }
 0x1af   : > { %3571 = vmatmul.mubr.bf16.vlgmr.msra.gmra.mrb[4].mxu0 %v5969_v18  ;;  %4698 = vmatpush3.bf16.msra.mxu1 %v5362_v3  ;;  %v5428_v3 = vld [vmem:[%s5858_s21 + $0xa20] ss:$28 sps:$4 sm:$0xff]  }
 0x1b0   : > { %3580 = vmatpush1.bf16.msra.mxu0 %v5358_v2  ;;  %4699 = vmatprep.subr.bf16.mxu1 %v5366_v5  ;;  %v5431_v2 = vld [vmem:[%s5858_s21 + $0x6a8] ss:$28 sps:$4 sm:$0xff]   ;;  %v5435_v5 = vld [vmem:[%s5858_s21 + $0xa5c] ss:$28 sps:$4 sm:$0xff]  }
 0x1b1   : > { %3581 = vmatprep.subr.bf16.mxu0 %v5365_v4  ;;  %3693 = vmatprep.mubr.bf16.mxu1 %v5935_v60  ;;  %v5377_v60 = vld [vmem:[%s5858_s21 + $0xc0] ss:$28 sps:$4 sm:$0xff]   ;;  %v5432_v4 = vld [vmem:[%s5858_s21 + $0x4e8] ss:$28 sps:$4 sm:$0xff]  }
 0x1b2   : > { %3611 = vmatprep.mubr.bf16.mxu0 %v5975_v22 }
 0x1b3   : > { %4700 = vmatpush3.bf16.msra.mxu1 %v5367_v7  ;;  %v5433_v7 = vld [vmem:[%s5858_s21 + $0xa58] ss:$28 sps:$4 sm:$0xff]  }
 0x1b4   : > { %3582 = vmatpush1.bf16.msra.mxu0 %v5363_v6  ;;  %4701 = vmatprep.subr.bf16.mxu1 %v5371_v9  ;;  %v5436_v6 = vld [vmem:[%s5858_s21 + $0x6e0] ss:$28 sps:$4 sm:$0xff]   ;;  %v5440_v9 = vld [vmem:[%s5858_s21 + $0xa94] ss:$28 sps:$4 sm:$0xff]  }
 0x1b5   : > { %3583 = vmatprep.subr.bf16.mxu0 %v5370_v8  ;;  %v5437_v8 = vld [vmem:[%s5858_s21 + $0x520] ss:$28 sps:$4 sm:$0xff]  }
 0x1b7   : > { %4702 = vmatpush3.bf16.msra.mxu1 %v5372_v13  ;;  %v5438_v13 = vld [vmem:[%s5858_s21 + $0xa90] ss:$28 sps:$4 sm:$0xff]  }
 0x1b8   : > { %3584 = vmatpush1.bf16.msra.mxu0 %v5368_v11  ;;  %4703 = vmatprep.subr.bf16.mxu1 %v5376_v17  ;;  %v5441_v11 = vld [vmem:[%s5858_s21 + $0x8d8] ss:$28 sps:$4 sm:$0xff]   ;;  %v5445_v17 = vld [vmem:[%s5858_s21 + $0xacc] ss:$28 sps:$4 sm:$0xff]  }
 0x1b9   : > { %3585 = vmatprep.subr.bf16.mxu0 %v5375_v15  ;;  %v5442_v15 = vld [vmem:[%s5858_s21 + $0x718] ss:$28 sps:$4 sm:$0xff]  }
 0x1bb   : > { %4704 = vmatpush3.bf16.msra.mxu1 %v5377_v60  ;;  %v5443_v60 = vld [vmem:[%s5858_s21 + $0xac8] ss:$28 sps:$4 sm:$0xff]  }
 0x1bc   : > { %3586 = vmatpush1.bf16.msra.mxu0 %v5373_v19  ;;  %4705 = vmatprep.subr.bf16.mxu1 %v5381_v21  ;;  %v5446_v19 = vld [vmem:[%s5858_s21 + $0x910] ss:$28 sps:$4 sm:$0xff]   ;;  %v5450_v21 = vld [vmem:[%s5858_s21 + $0xb04] ss:$28 sps:$4 sm:$0xff]  }
 0x1bd   : > { %3587 = vmatprep.subr.bf16.mxu0 %v5380_v20  ;;  %v5447_v20 = vld [vmem:[%s5858_s21 + $0x750] ss:$28 sps:$4 sm:$0xff]  }
 0x1bf   : > { %4706 = vmatpush3.bf16.msra.mxu1 %v5382_v24  ;;  %v5452_v24 = vld [vmem:[%s5858_s21 + $0x788] ss:$28 sps:$4 sm:$0xff]  }
 0x1c0   : > { %3588 = vmatpush1.bf16.msra.mxu0 %v5378_v23  ;;  %4707 = vmatprep.subr.bf16.mxu1 %v5386_v26  ;;  %v5451_v23 = vld [vmem:[%s5858_s21 + $0x948] ss:$28 sps:$4 sm:$0xff]   ;;  %v5456_v26 = vld [vmem:[%s5858_s21 + $0x980] ss:$28 sps:$4 sm:$0xff]  }
 0x1c1   : > { %3589 = vmatprep.subr.bf16.mxu0 %v5385_v25  ;;  %v5455_v25 = vld [vmem:[%s5858_s21 + $0xb3c] ss:$28 sps:$4 sm:$0xff]  }
 0x1c3   : > { %4708 = vmatpush3.bf16.msra.mxu1 %v5387_v29  ;;  %v5460_v29 = vld [vmem:[%s5858_s21 + $0xb74] ss:$28 sps:$4 sm:$0xff]  }
 0x1c4   : > { %3590 = vmatpush1.bf16.msra.mxu0 %v5383_v27  ;;  %4709 = vmatprep.subr.bf16.mxu1 %v5391_v31  ;;  %v5453_v27 = vld [vmem:[%s5858_s21 + $0xb38] ss:$28 sps:$4 sm:$0xff]   ;;  %v5458_v31 = vld [vmem:[%s5858_s21 + $0xb70] ss:$28 sps:$4 sm:$0xff]  }
 0x1c5   : > { %3591 = vmatprep.subr.bf16.mxu0 %v5390_v30  ;;  %v5461_v30 = vld [vmem:[%s5858_s21 + $0x9b8] ss:$28 sps:$4 sm:$0xff]  }
 0x1c7   : > { %4710 = vmatpush3.bf16.msra.mxu1 %v5392_v33  ;;  %v5465_v33 = vld [vmem:[%s5858_s21 + $0xbac] ss:$28 sps:$4 sm:$0xff]  }
 0x1c8   : > { %3592 = vmatpush1.bf16.msra.mxu0 %v5388_v10  ;;  %4711 = vmatprep.subr.bf16.mxu1 %v5396_v35  ;;  %v5462_v10 = vld [vmem:[%s5858_s21 + $0x7f8] ss:$28 sps:$4 sm:$0xff]   ;;  %v5463_v35 = vld [vmem:[%s5858_s21 + $0xba8] ss:$28 sps:$4 sm:$0xff]  }
 0x1c9   : > { %3593 = vmatprep.subr.bf16.mxu0 %v5395_v34  ;;  %v5466_v34 = vld [vmem:[%s5858_s21 + $0x9f0] ss:$28 sps:$4 sm:$0xff]  }
 0x1cb   : > { %4712 = vmatpush3.bf16.msra.mxu1 %v5397_v38  ;;  %v5470_v38 = vld [vmem:[%s5858_s21 + $0xbe4] ss:$28 sps:$4 sm:$0xff]  }
 0x1cc   : > { %3594 = vmatpush1.bf16.msra.mxu0 %v5393_v36  ;;  %4719 = vmatprep.subr.bf16.mxu1 %v5401_v40  ;;  %v5467_v36 = vld [vmem:[%s5858_s21 + $0x830] ss:$28 sps:$4 sm:$0xff]  }
 0x1cd   : > { %3595 = vmatprep.subr.bf16.mxu0 %v5400_v39  ;;  %v5471_v39 = vld [vmem:[%s5858_s21 + $0xa28] ss:$28 sps:$4 sm:$0xff]  }
 0x1ce   : > { %3694 = vmatmul.mubr.bf16.vlgmr.msra.gmra.mrb[8].mxu1 %v5959_v12  ;;  %v5412_v12 = vld [vmem:[%s5858_s21 + $0x408] ss:$28 sps:$4 sm:$0xff]  }
 0x1cf   : > { %4720 = vmatpush3.bf16.msra.mxu1 %v5402_v42  ;;  %3733 = vmatprep.mubr.bf16.mxu1 %v5942_v0  ;;  %v5420_v0 = vld [vmem:[%s5858_s21 + $0x9b4] ss:$28 sps:$4 sm:$0xff]  }
 0x1d0   : > { %3596 = vmatpush1.bf16.msra.mxu0 %v5398_v41  ;;  %4721 = vmatprep.subr.bf16.mxu1 %v5406_v45 }
 0x1d1   : > { %3597 = vmatprep.subr.bf16.mxu0 %v5405_v44 }
 0x1d3   : > { %4722 = vmatpush3.bf16.msra.mxu1 %v5407_v47  ;;  %v5472_v47 = vld [vmem:[%s5858_s21 + $0x868] ss:$28 sps:$4 sm:$0xff]  }
 0x1d4   : > { %3598 = vmatpush1.bf16.msra.mxu0 %v5403_v46  ;;  %4723 = vmatprep.subr.bf16.mxu1 %v5411_v50  ;;  %v5468_v46 = vld [vmem:[%s5858_s21 + $0xbe0] ss:$28 sps:$4 sm:$0xff]  }
 0x1d5   : > { %3599 = vmatprep.subr.bf16.mxu0 %v5410_v48 }
 0x1d7   : > { %4724 = vmatpush3.bf16.msra.mxu1 %v5412_v12  ;;  %v5476_v12 = vld [vmem:[%s5858_s21 + $0xa60] ss:$28 sps:$4 sm:$0xff]  }
 0x1d8   : > { %3600 = vmatpush1.bf16.msra.mxu0 %v5408_v51  ;;  %4725 = vmatprep.subr.bf16.mxu1 %v5416_v53  ;;  %v5475_v51 = vld [vmem:[%s5858_s21 + $0xc1c] ss:$28 sps:$4 sm:$0xff]  }
 0x1d9   : > { %3601 = vmatprep.subr.bf16.mxu0 %v5415_v52 }
 0x1db   : > { %4726 = vmatpush3.bf16.msra.mxu1 %v5417_v55  ;;  %v5477_v55 = vld [vmem:[%s5858_s21 + $0x8a0] ss:$28 sps:$4 sm:$0xff]  }
 0x1dc   : > { %3602 = vmatpush1.bf16.msra.mxu0 %v5413_v54  ;;  %4727 = vmatprep.subr.bf16.mxu1 %v5421_v56  ;;  %v5473_v54 = vld [vmem:[%s5858_s21 + $0xc18] ss:$28 sps:$4 sm:$0xff]  }
 0x1dd   : > { %3603 = vmatprep.subr.bf16.mxu0 %v5420_v0  ;;  %v5480_v56 = vld [vmem:[%s5858_s21 + $0xc54] ss:$28 sps:$4 sm:$0xff]  }
 0x1df   : > { %4728 = vmatpush3.bf16.msra.mxu1 %v5422_v58 }
 0x1e0   : > { %3604 = vmatpush1.bf16.msra.mxu0 %v5418_v57  ;;  %4729 = vmatprep.subr.bf16.mxu1 %v5426_v61  ;;  %v5481_v57 = vld [vmem:[%s5858_s21 + $0xc58] ss:$28 sps:$4 sm:$0xff]  }
 0x1e1   : > { %3605 = vmatprep.subr.bf16.mxu0 %v5425_v59 }
 0x1e3   : > { %4730 = vmatpush3.bf16.msra.mxu1 %v5427_v63  ;;  %v5482_v63 = vld [vmem:[%s5858_s21 + $0xa98] ss:$28 sps:$4 sm:$0xff]  }
 0x1e4   : > { %3606 = vmatpush1.bf16.msra.mxu0 %v5423_v62  ;;  %4731 = vmatprep.subr.bf16.mxu1 %v5431_v2  ;;  %v5478_v62 = vld [vmem:[%s5858_s21 + $0xc50] ss:$28 sps:$4 sm:$0xff]  }
 0x1e5   : > { %3607 = vmatprep.subr.bf16.mxu0 %v5430_v1  ;;  %v5485_v2 = vld [vmem:[%s5858_s21 + $0xc8c] ss:$28 sps:$4 sm:$0xff]  }
 0x1e7   : > { %4732 = vmatpush3.bf16.msra.mxu1 %v5432_v4 }
 0x1e8   : > { %3608 = vmatpush1.bf16.msra.mxu0 %v5428_v3  ;;  %4733 = vmatprep.subr.bf16.mxu1 %v5436_v6  ;;  %v5486_v3 = vld [vmem:[%s5858_s21 + $0xc90] ss:$28 sps:$4 sm:$0xff]  }
 0x1e9   : > { %3609 = vmatprep.subr.bf16.mxu0 %v5435_v5 }
 0x1eb   : > { %4734 = vmatpush3.bf16.msra.mxu1 %v5437_v8  ;;  %v5487_v8 = vld [vmem:[%s5858_s21 + $0xad0] ss:$28 sps:$4 sm:$0xff]  }
 0x1ec   : > { %3610 = vmatpush1.bf16.msra.mxu0 %v5433_v7  ;;  %4741 = vmatprep.subr.bf16.mxu1 %v5441_v11  ;;  %v5483_v7 = vld [vmem:[%s5858_s21 + $0xc88] ss:$28 sps:$4 sm:$0xff]  }
 0x1ed   : > { %3620 = vmatprep.subr.bf16.mxu0 %v5440_v9  ;;  %v5490_v11 = vld [vmem:[%s5858_s21 + $0xcc4] ss:$28 sps:$4 sm:$0xff]  }
 0x1ee   : > { %3734 = vmatmul.mubr.bf16.vlgmr.msra.gmra.mrb[12].mxu1 %v5969_v18  ;;  %v5448_v18 = vld [vmem:[%s5858_s21 + $0xb00] ss:$28 sps:$4 sm:$0xff]  }
 0x1ef   : > { %3612 = vmatmul.mubr.bf16.vlgmr.msra.gmra.mrb[4].mxu0 %v6044_v28  ;;  %4742 = vmatpush3.bf16.msra.mxu1 %v5442_v15 }
 0x1f0   : > { %3621 = vmatpush1.bf16.msra.mxu0 %v5438_v13  ;;  %4743 = vmatprep.subr.bf16.mxu1 %v5446_v19  ;;  %v5491_v13 = vld [vmem:[%s5858_s21 + $0xcc8] ss:$28 sps:$4 sm:$0xff]   ;;  %v5488_v19 = vld [vmem:[%s5858_s21 + $0xcc0] ss:$28 sps:$4 sm:$0xff]  }
 0x1f1   : > { %3622 = vmatprep.subr.bf16.mxu0 %v5445_v17  ;;  %3773 = vmatprep.mubr.bf16.mxu1 %v5975_v22  ;;  %v5457_v22 = vld [vmem:[%s5858_s21 + $0x7c0] ss:$28 sps:$4 sm:$0xff]  }
 0x1f2   : > { %3652 = vmatprep.mubr.bf16.mxu0 %v6051_v32 }
 0x1f3   : > { %4744 = vmatpush3.bf16.msra.mxu1 %v5447_v20 }
 0x1f4   : > { %3623 = vmatpush1.bf16.msra.mxu0 %v5443_v60  ;;  %4745 = vmatprep.subr.bf16.mxu1 %v5451_v23  ;;  %v5492_v60 = vld [vmem:[%s5858_s21 + $0xb08] ss:$28 sps:$4 sm:$0xff]   ;;  %v5496_v23 = vld [vmem:[%s5858_s21 + $0xd00] ss:$28 sps:$4 sm:$0xff]  }
 0x1f5   : > { %3624 = vmatprep.subr.bf16.mxu0 %v5450_v21  ;;  %v5495_v21 = vld [vmem:[%s5858_s21 + $0xcfc] ss:$28 sps:$4 sm:$0xff]  }
 0x1f7   : > { %4746 = vmatpush3.bf16.msra.mxu1 %v5452_v24 }
 0x1f8   : > { %3625 = vmatpush1.bf16.msra.mxu0 %v5448_v18  ;;  %4747 = vmatprep.subr.bf16.mxu1 %v5456_v26  ;;  %v5497_v26 = vld [vmem:[%s5858_s21 + $0xb40] ss:$28 sps:$4 sm:$0xff]  }
 0x1f9   : > { %3626 = vmatprep.subr.bf16.mxu0 %v5455_v25  ;;  %v5493_v25 = vld [vmem:[%s5858_s21 + $0xcf8] ss:$28 sps:$4 sm:$0xff]  }
 0x1fb   : > { %4748 = vmatpush3.bf16.msra.mxu1 %v5457_v22 }
 0x1fc   : > { %3627 = vmatpush1.bf16.msra.mxu0 %v5453_v27  ;;  %4749 = vmatprep.subr.bf16.mxu1 %v5461_v30  ;;  %v5501_v30 = vld [vmem:[%s5858_s21 + $0xd38] ss:$28 sps:$4 sm:$0xff]  }
 0x1fd   : > { %3628 = vmatprep.subr.bf16.mxu0 %v5460_v29  ;;  %v5500_v29 = vld [vmem:[%s5858_s21 + $0xd34] ss:$28 sps:$4 sm:$0xff]  }
 0x1ff   : > { %4750 = vmatpush3.bf16.msra.mxu1 %v5462_v10 }
 0x200   : > { %3629 = vmatpush1.bf16.msra.mxu0 %v5458_v31  ;;  %4751 = vmatprep.subr.bf16.mxu1 %v5466_v34  ;;  %v5498_v34 = vld [vmem:[%s5858_s21 + $0xd30] ss:$28 sps:$4 sm:$0xff]  }
 0x201   : > { %3630 = vmatprep.subr.bf16.mxu0 %v5465_v33 }
 0x202   : > { %v3326_v40 = vpop.f32.mrb[0].mxu0 }
 0x203   : > { %v4785_v41 = vadd.f32 %v3326_v40, %v6217_v14  ;;  %v3328_v42 = vpop.f32.mrb[1].mxu0  ;;  %4752 = vmatpush3.bf16.msra.mxu1 %v5467_v36 }
 0x204   : > { %v4786_v44 = vadd.f32 %v3328_v42, %v6220_v16  ;;  %v3330_v45 = vpop.f32.mrb[2].mxu0  ;;  %3631 = vmatpush1.bf16.msra.mxu0 %v5463_v35  ;;  %4753 = vmatprep.subr.bf16.mxu1 %v5471_v39  ;;  %v5502_v35 = vld [vmem:[%s5858_s21 + $0xb78] ss:$28 sps:$4 sm:$0xff]   ;;  %v5506_v39 = vld [vmem:[%s5858_s21 + $0xd70] ss:$28 sps:$4 sm:$0xff]  }
 0x205   : > { %v3822_v48 = vsel %vm3821_vm0, %v4785_v41, 0.0  ;;  %v3331_v50 = vpop.f32.mrb[3].mxu0  ;;  %3632 = vmatprep.subr.bf16.mxu0 %v5470_v38  ;;  %v5505_v38 = vld [vmem:[%s5858_s21 + $0xd6c] ss:$28 sps:$4 sm:$0xff]  }
 0x206   : > { %v3823_v14 = vrot.slane %v3822_v48, 4  ;;  %v3829_v52 = vsel %vm3821_vm0, %v4786_v44, 0.0  ;;  %v5507_v45 = vld [vmem:[%s5858_s21 + $0xbb0] ss:$28 sps:$4 sm:$0xff]  }
 0x207   : > { %v3830_v16 = vrot.slane %v3829_v52, 4  ;;  %4754 = vmatpush3.bf16.msra.mxu1 %v5472_v47  ;;  %v5510_v47 = vld [vmem:[%s5858_s21 + $0xda4] ss:$28 sps:$4 sm:$0xff]  }
 0x208   : > { %v3824_v53 = vadd.f32 %v3823_v14, %v3822_v48  ;;  %3633 = vmatpush1.bf16.msra.mxu0 %v5468_v46  ;;  %4755 = vmatprep.subr.bf16.mxu1 %v5476_v12  ;;  %v5511_v48 = vld [vmem:[%s5858_s21 + $0xda8] ss:$28 sps:$4 sm:$0xff]   ;;  %v5508_v14 = vld [vmem:[%s5858_s21 + $0xda0] ss:$28 sps:$4 sm:$0xff]  }
 0x209   : > { %v3831_v0 = vadd.f32 %v3830_v16, %v3829_v52  ;;  %3634 = vmatprep.subr.bf16.mxu0 %v5475_v51  ;;  %v5512_v52 = vld [vmem:[%s5858_s21 + $0xbe8] ss:$28 sps:$4 sm:$0xff]  }
 0x20a   : > { %v3825_v58 = vrot.slane %v3824_v53, 2 }
 0x20b   : > { %v3832_v59 = vrot.slane %v3831_v0, 2  ;;  %4756 = vmatpush3.bf16.msra.mxu1 %v5477_v55 }
 0x20c   : > { %v3826_v61 = vadd.f32 %v3825_v58, %v3824_v53  ;;  %3635 = vmatpush1.bf16.msra.mxu0 %v5473_v54  ;;  %4763 = vmatprep.subr.bf16.mxu1 %v5481_v57  ;;  %v5515_v53 = vld [vmem:[%s5858_s21 + $0xddc] ss:$28 sps:$4 sm:$0xff]  }
 0x20d   : > { %v3833_v1 = vadd.f32 %v3832_v59, %v3831_v0  ;;  %3636 = vmatprep.subr.bf16.mxu0 %v5480_v56  ;;  %v5516_v54 = vld [vmem:[%s5858_s21 + $0xde0] ss:$28 sps:$4 sm:$0xff]   ;;  %v5513_v57 = vld [vmem:[%s5858_s21 + $0xdd8] ss:$28 sps:$4 sm:$0xff]   ;;  %v3974_v59 = vsub.s32 0, %v5913_v43 }
 0x20e   : > { %v3827_v4 = vrot.slane %v3826_v61, 1  ;;  %3774 = vmatmul.mubr.bf16.vlgmr.msra.gmra.mrb[16].mxu1 %v6044_v28  ;;  %v5517_v58 = vld [vmem:[%s5858_s21 + $0xc20] ss:$28 sps:$4 sm:$0xff]  }
 0x20f   : > { %v3834_v5 = vrot.slane %v3833_v1, 1  ;;  %4764 = vmatpush3.bf16.msra.mxu1 %v5482_v63  ;;  %3813 = vmatprep.mubr.bf16.mxu1 %v6051_v32  ;;  %v6422_v63 = vld [vmem:[%s251_s26] sm:$0xff] }
 0x210   : > { %v3828_v6 = vadd.f32 %v3827_v4, %v3826_v61  ;;  %3637 = vmatpush1.bf16.msra.mxu0 %v5478_v62  ;;  %4765 = vmatprep.subr.bf16.mxu1 %v5486_v3  ;;  %v6415_v61 = vld [vmem:[%s5868_s14] sm:$0xff]  ;;  %v3978_v62 = vsub.s32 1, %v5913_v43 }
 0x211   : > { %v3835_v9 = vadd.f32 %v3834_v5, %v3833_v1  ;;  %3638 = vmatprep.subr.bf16.mxu0 %v5485_v2  ;;  %v3975_v1 = vrot.slane %v6415_v61, %v3974_v59 }
 0x212   : > { %v3872_v15 = vmul.f32 0.5, %v3828_v6  ;;  %v3979_v3 = vrot.slane %v6415_v61, %v3978_v62  ;;  %v4019_v6 = vrot.slane %v6422_v63, %v3974_v59 }
 0x213   : > { %v3873_v17 = vmul.f32 0.5, %v3835_v9  ;;  %4766 = vmatpush3.bf16.msra.mxu1 %v5487_v8  ;;  %v4023_v8 = vrot.slane %v6422_v63, %v3978_v62 }
 0x214   : > { %v6381_v28 = vsub.f32 %v4785_v41, %v3872_v15  ;;  %3639 = vmatpush1.bf16.msra.mxu0 %v5483_v7  ;;  %4767 = vmatprep.subr.bf16.mxu1 %v5491_v13 }
 0x215   : > { %v6385_v20 = vsub.f32 %v4786_v44, %v3873_v17  ;;  %3640 = vmatprep.subr.bf16.mxu0 %v5490_v11  ;;  %v5503_v44 = vld [vmem:[%s5858_s21 + $0xd68] ss:$28 sps:$4 sm:$0xff]  }
 0x216   : > { %v3886_v32 = vmul.f32 %v6381_v28, %v6381_v28 }
 0x217   : > { %v3887_v18 = vmul.f32 %v6385_v20, %v6385_v20  ;;  %4768 = vmatpush3.bf16.msra.mxu1 %v5492_v60 }
 0x218   : > { %v3893_v24 = vsel %vm3821_vm0, %v3886_v32, 0.0  ;;  %3641 = vmatpush1.bf16.msra.mxu0 %v5488_v19  ;;  %4769 = vmatprep.subr.bf16.mxu1 %v5496_v23 }
 0x219   : > { %v3894_v27 = vrot.slane %v3893_v24, 4  ;;  %v3900_v22 = vsel %vm3821_vm0, %v3887_v18, 0.0  ;;  %3642 = vmatprep.subr.bf16.mxu0 %v5495_v21 }
 0x21a   : > { %v3901_v31 = vrot.slane %v3900_v22, 4 }
 0x21b   : > { %v3895_v10 = vadd.f32 %v3894_v27, %v3893_v24  ;;  %4770 = vmatpush3.bf16.msra.mxu1 %v5497_v26 }
 0x21c   : > { %v3902_v33 = vadd.f32 %v3901_v31, %v3900_v22  ;;  %3643 = vmatpush1.bf16.msra.mxu0 %v5493_v25  ;;  %4771 = vmatprep.subr.bf16.mxu1 %v5501_v30 }
 0x21d   : > { %v3896_v36 = vrot.slane %v3895_v10, 2  ;;  %3644 = vmatprep.subr.bf16.mxu0 %v5500_v29 }
 0x21e   : > { %v3903_v40 = vrot.slane %v3902_v33, 2 }
 0x21f   : > { %v3897_v41 = vadd.f32 %v3896_v36, %v3895_v10  ;;  %4772 = vmatpush3.bf16.msra.mxu1 %v5502_v35 }
 0x220   : > { %v3904_v42 = vadd.f32 %v3903_v40, %v3902_v33  ;;  %3645 = vmatpush1.bf16.msra.mxu0 %v5498_v34  ;;  %4773 = vmatprep.subr.bf16.mxu1 %v5506_v39 }
 0x221   : > { %v3898_v46 = vrot.slane %v3897_v41, 1  ;;  %3646 = vmatprep.subr.bf16.mxu0 %v5505_v38 }
 0x222   : > { %v3905_v50 = vrot.slane %v3904_v42, 1 }
 0x223   : > { %v3899_v51 = vadd.f32 %v3898_v46, %v3897_v41  ;;  %4774 = vmatpush3.bf16.msra.mxu1 %v5507_v45 }
 0x224   : > { %v3906_v12 = vadd.f32 %v3905_v50, %v3904_v42  ;;  %3647 = vmatpush1.bf16.msra.mxu0 %v5503_v44  ;;  %4775 = vmatprep.subr.bf16.mxu1 %v5511_v48 }
 0x225   : > { %v3942_v16 = vmul.f32 0.5, %v3899_v51  ;;  %3648 = vmatprep.subr.bf16.mxu0 %v5510_v47 }
 0x226   : > { %v3943_v55 = vmul.f32 0.5, %v3906_v12 }
 0x227   : > { %v3949_v0 = vadd.f32 1e-05, %v3942_v16  ;;  %4776 = vmatpush3.bf16.msra.mxu1 %v5512_v52 }
 0x228   : > { %v3950_v56 = vadd.f32 1e-05, %v3943_v55  ;;  %3649 = vmatpush1.bf16.msra.mxu0 %v5508_v14  ;;  %4777 = vmatprep.subr.bf16.mxu1 %v5516_v54 }
 0x229   : > { %5518 = vrsqrt.f32 %v3949_v0  ;;  %3650 = vmatprep.subr.bf16.mxu0 %v5515_v53 }
 0x22a   : > { %5520 = vrsqrt.f32 %v3950_v56 }
 0x22b   : > { %4778 = vmatpush3.bf16.msra.mxu1 %v5517_v58 }
 0x22c   : > { %3651 = vmatpush1.bf16.msra.mxu0 %v5513_v57 }
 0x22e   : > { %3814 = vmatmul.mubr.bf16.vlgmr.msra.gmra.mrb[20].mxu1 %v6119_v37 }
 0x22f   : > { %3653 = vmatmul.mubr.bf16.vlgmr.msra.gmra.mrb[4].mxu0 %v6119_v37 }
 0x233   : > { %v5519_v2 = vpop.eup %5518 }
 0x234   : > { %v5521_v4 = vpop.eup %5520  ;;  %v3963_v5 = vmul.f32 %v5519_v2, %v6381_v28 }
 0x235   : > { %v3964_v7 = vmul.f32 %v5521_v4, %v6385_v20  ;;  %v3986_v4 = vsub.s32 3, %v5913_v43 }
 0x236   : > { %v4007_v9 = vmul.f32 %v3975_v1, %v3963_v5 }
 0x237   : > { %v4008_v37 = vmul.f32 %v3979_v3, %v3964_v7  ;;  %v3982_v3 = vsub.s32 2, %v5913_v43  ;;  %v3987_v7 = vrot.slane %v6415_v61, %v3986_v4 }
 0x238   : > { %v4051_v11 = vadd.f32 %v4019_v6, %v4007_v9 }
 0x239   : > { %v4052_v13 = vadd.f32 %v4023_v8, %v4008_v37  ;;  %v3983_v5 = vrot.slane %v6415_v61, %v3982_v3  ;;  %v4027_v37 = vrot.slane %v6422_v63, %v3982_v3 }
 0x23a   : > { %v4058_v15 = vmax.f32 %v4051_v11, 0.0 }
 0x23b   : > { %v4059_v17 = vmax.f32 %v4052_v13, 0.0  ;;  %v4031_v13 = vrot.slane %v6422_v63, %v3986_v4 }
 0x23d   : > { %v6430_v19 = vpack.c.bf16 %v4059_v17, %v4058_v15 }
 0x281   : > { %v3490_v60 = vpop.f32.mrb[4].mxu1 }
 0x282   : > { %v3836_v21 = vsel %vm3821_vm0, %v3490_v60, 0.0  ;;  %v3492_v23 = vpop.f32.mrb[5].mxu1 }
 0x283   : > { %v3837_v32 = vrot.slane %v3836_v21, 4  ;;  %v3843_v28 = vsel %vm3821_vm0, %v3492_v23, 0.0  ;;  %v3494_v18 = vpop.f32.mrb[6].mxu1 }
 0x284   : > { %v3844_v24 = vrot.slane %v3843_v28, 4  ;;  %v3495_v20 = vpop.f32.mrb[7].mxu1  ;;  %v4088_v18 = vrot.slane %v6430_v19, %v5921_v49 }
 0x285   : > { %v3838_v25 = vadd.f32 %v3837_v32, %v3836_v21 }
 0x286   : > { %v3845_v26 = vadd.f32 %v3844_v24, %v3843_v28 }
 0x287   : > { %v3839_v27 = vrot.slane %v3838_v25, 2 }
 0x288   : > { %v3846_v22 = vrot.slane %v3845_v26, 2 }
 0x289   : > { %v3840_v29 = vadd.f32 %v3839_v27, %v3838_v25 }
 0x28a   : > { %v3847_v30 = vadd.f32 %v3846_v22, %v3845_v26 }
 0x28b   : > { %v3841_v31 = vrot.slane %v3840_v29, 1 }
 0x28c   : > { %v3848_v10 = vrot.slane %v3847_v30, 1 }
 0x28d   : > { %v3842_v33 = vadd.f32 %v3841_v31, %v3840_v29 }
 0x28e   : > { %v3849_v34 = vadd.f32 %v3848_v10, %v3847_v30 }
 0x28f   : > { %v3874_v35 = vmul.f32 0.5, %v3842_v33 }
 0x290   : > { %v3875_v36 = vmul.f32 0.5, %v3849_v34 }
 0x291   : > { %v3881_v38 = vsub.f32 %v3490_v60, %v3874_v35 }
 0x292   : > { %v3882_v39 = vsub.f32 %v3492_v23, %v3875_v36 }
 0x293   : > { %v3888_v40 = vmul.f32 %v3881_v38, %v3881_v38 }
 0x294   : > { %v3889_v41 = vmul.f32 %v3882_v39, %v3882_v39 }
 0x295   : > { %v3907_v42 = vsel %vm3821_vm0, %v3888_v40, 0.0 }
 0x296   : > { %v3908_v44 = vrot.slane %v3907_v42, 4  ;;  %v3914_v45 = vsel %vm3821_vm0, %v3889_v41, 0.0 }
 0x297   : > { %v3915_v46 = vrot.slane %v3914_v45, 4 }
 0x298   : > { %v3909_v47 = vadd.f32 %v3908_v44, %v3907_v42 }
 0x299   : > { %v3916_v48 = vadd.f32 %v3915_v46, %v3914_v45 }
 0x29a   : > { %v3910_v50 = vrot.slane %v3909_v47, 2 }
 0x29b   : > { %v3917_v51 = vrot.slane %v3916_v48, 2 }
 0x29c   : > { %v3911_v12 = vadd.f32 %v3910_v50, %v3909_v47 }
 0x29d   : > { %v3918_v14 = vadd.f32 %v3917_v51, %v3916_v48 }
 0x29e   : > { %v3912_v52 = vrot.slane %v3911_v12, 1 }
 0x29f   : > { %v3919_v16 = vrot.slane %v3918_v14, 1 }
 0x2a0   : > { %v3913_v53 = vadd.f32 %v3912_v52, %v3911_v12 }
 0x2a1   : > { %v3920_v54 = vadd.f32 %v3919_v16, %v3918_v14  ;;  %v4713_v55 = vpop.f32.mrb[8].mxu1 }
 0x2a2   : > { %v3944_v0 = vmul.f32 0.5, %v3913_v53  ;;  %v4714_v56 = vpop.f32.mrb[9].mxu1 }
 0x2a3   : > { %v3945_v57 = vmul.f32 0.5, %v3920_v54  ;;  %v4715_v58 = vadd.f32 %v4714_v56, %v4713_v55  ;;  %v4716_v59 = vpop.f32.mrb[10].mxu1 }
 0x2a4   : > { %v3951_v62 = vadd.f32 1e-05, %v3944_v0  ;;  %v4717_v1 = vpop.f32.mrb[11].mxu1 }
 0x2a5   : > { %v3952_v2 = vadd.f32 1e-05, %v3945_v57 }
 0x2a6   : > { %5522 = vrsqrt.f32 %v3951_v62 }
 0x2a7   : > { %5524 = vrsqrt.f32 %v3952_v2 }
 0x2b0   : > { %v5523_v6 = vpop.eup %5522 }
 0x2b1   : > { %v5525_v8 = vpop.eup %5524  ;;  %v3965_v9 = vmul.f32 %v5523_v6, %v3881_v38 }
 0x2b2   : > { %v3966_v11 = vmul.f32 %v5525_v8, %v3882_v39 }
 0x2b3   : > { %v4009_v15 = vmul.f32 %v3983_v5, %v3965_v9 }
 0x2b4   : > { %v4010_v17 = vmul.f32 %v3987_v7, %v3966_v11 }
 0x2b5   : > { %v4053_v60 = vadd.f32 %v4027_v37, %v4009_v15 }
 0x2b6   : > { %v4054_v21 = vadd.f32 %v4031_v13, %v4010_v17 }
 0x2b7   : > { %v4060_v23 = vmax.f32 %v4053_v60, 0.0 }
 0x2b8   : > { %v4061_v32 = vmax.f32 %v4054_v21, 0.0 }
 0x2ba   : > { %v4690_v28 = vpack.c.bf16 %v4061_v32, %v4060_v23 }
 0x2bc   : > { %v4095_v24 = vrot.slane %v4690_v28, %v5921_v49 }
 0x2be   : > { %v6445_v20 = vcombine.low %v4088_v18, %v4095_v24 }
 0x2c1   : > { %v4735_v25 = vpop.f32.mrb[12].mxu1 }
 0x2c2   : > { %v4736_v26 = vpop.f32.mrb[13].mxu1 }
 0x2c3   : > { %v4737_v27 = vadd.f32 %v4736_v26, %v4735_v25  ;;  %v4738_v22 = vpop.f32.mrb[14].mxu1 }
 0x2c4   : > { %v4739_v29 = vpop.f32.mrb[15].mxu1 }
 0x2c5   : > { %v3736_v30 = vadd.f32 %v4737_v27, %v4715_v58 }
 0x2e1   : > { %v4757_v31 = vpop.f32.mrb[16].mxu1 }
 0x2e2   : > { %v4758_v10 = vpop.f32.mrb[17].mxu1 }
 0x2e3   : > { %v4759_v33 = vadd.f32 %v4758_v10, %v4757_v31  ;;  %v4760_v34 = vpop.f32.mrb[18].mxu1 }
 0x2e4   : > { %v4761_v35 = vpop.f32.mrb[19].mxu1 }
 0x2e5   : > { %v3776_v36 = vadd.f32 %v4759_v33, %v3736_v30 }
 0x301   : > { %v4779_v39 = vpop.f32.mrb[20].mxu1 }
 0x302   : > { %v3654_v38 = vpop.f32.mrb[4].mxu0  ;;  %v4780_v41 = vpop.f32.mrb[21].mxu1 }
 0x303   : > { %v3850_v19 = vsel %vm3821_vm0, %v3654_v38, 0.0  ;;  %v3656_v40 = vpop.f32.mrb[5].mxu0  ;;  %v4781_v45 = vadd.f32 %v4780_v41, %v4779_v39  ;;  %v4782_v47 = vpop.f32.mrb[22].mxu1 }
 0x304   : > { %v3851_v42 = vrot.slane %v3850_v19, 4  ;;  %v3857_v44 = vsel %vm3821_vm0, %v3656_v40, 0.0  ;;  %v3658_v46 = vpop.f32.mrb[6].mxu0  ;;  %v4783_v51 = vpop.f32.mrb[23].mxu1  ;;  %v3994_v47 = vsub.s32 5, %v5913_v43 }
 0x305   : > { %v3858_v48 = vrot.slane %v3857_v44, 4  ;;  %v3659_v50 = vpop.f32.mrb[7].mxu0  ;;  %v3816_v14 = vadd.f32 %v4781_v45, %v3776_v36  ;;  %v3990_v46 = vsub.s32 4, %v5913_v43 }
 0x306   : > { %v3852_v12 = vadd.f32 %v3851_v42, %v3850_v19  ;;  %v3995_v51 = vrot.slane %v6415_v61, %v3994_v47 }
 0x307   : > { %v3859_v52 = vadd.f32 %v3858_v48, %v3857_v44  ;;  %v3864_v53 = vsel %vm3821_vm0, %v3816_v14, 0.0  ;;  %v3991_v48 = vrot.slane %v6415_v61, %v3990_v46 }
 0x308   : > { %v3853_v16 = vrot.slane %v3852_v12, 2  ;;  %v3865_v55 = vrot.slane %v3864_v53, 4 }
 0x309   : > { %v3860_v54 = vrot.slane %v3859_v52, 2 }
 0x30a   : > { %v3854_v0 = vadd.f32 %v3853_v16, %v3852_v12  ;;  %v3866_v57 = vadd.f32 %v3865_v55, %v3864_v53  ;;  %v3998_v12 = vsub.s32 6, %v5913_v43  ;;  %v4035_v16 = vrot.slane %v6422_v63, %v3990_v46 }
 0x30b   : > { %v3861_v56 = vadd.f32 %v3860_v54, %v3859_v52  ;;  %v4039_v54 = vrot.slane %v6422_v63, %v3994_v47 }
 0x30c   : > { %v3855_v58 = vrot.slane %v3854_v0, 1  ;;  %v3867_v62 = vrot.slane %v3866_v57, 2 }
 0x30d   : > { %v3862_v59 = vrot.slane %v3861_v56, 1 }
 0x30e   : > { %v3856_v1 = vadd.f32 %v3855_v58, %v3854_v0  ;;  %v3868_v3 = vadd.f32 %v3867_v62, %v3866_v57 }
 0x30f   : > { %v3863_v2 = vadd.f32 %v3862_v59, %v3861_v56  ;;  %v3999_v56 = vrot.slane %v6415_v61, %v3998_v12 }
 0x310   : > { %v3876_v4 = vmul.f32 0.5, %v3856_v1  ;;  %v3869_v6 = vrot.slane %v3868_v3, 1  ;;  %v4043_v1 = vrot.slane %v6422_v63, %v3998_v12 }
 0x311   : > { %v3877_v5 = vmul.f32 0.5, %v3863_v2 }
 0x312   : > { %v3883_v7 = vsub.f32 %v3654_v38, %v3876_v4  ;;  %v3870_v9 = vadd.f32 %v3869_v6, %v3868_v3 }
 0x313   : > { %v3884_v8 = vsub.f32 %v3656_v40, %v3877_v5 }
 0x314   : > { %v3890_v37 = vmul.f32 %v3883_v7, %v3883_v7  ;;  %v3878_v13 = vmul.f32 0.5, %v3870_v9 }
 0x315   : > { %v3891_v11 = vmul.f32 %v3884_v8, %v3884_v8 }
 0x316   : > { %v3921_v15 = vsel %vm3821_vm0, %v3890_v37, 0.0  ;;  %v3885_v21 = vsub.f32 %v3816_v14, %v3878_v13  ;;  %v4118_v37 = vrot.slane %v6445_v20, %v5921_v49 }
 0x317   : > { %v3922_v17 = vrot.slane %v3921_v15, 4  ;;  %v3928_v60 = vsel %vm3821_vm0, %v3891_v11, 0.0 }
 0x318   : > { %v3929_v23 = vrot.slane %v3928_v60, 4  ;;  %v3892_v28 = vmul.f32 %v3885_v21, %v3885_v21 }
 0x319   : > { %v3923_v32 = vadd.f32 %v3922_v17, %v3921_v15 }
 0x31a   : > { %v3930_v18 = vadd.f32 %v3929_v23, %v3928_v60  ;;  %v3935_v25 = vsel %vm3821_vm0, %v3892_v28, 0.0 }
 0x31b   : > { %v3924_v24 = vrot.slane %v3923_v32, 2  ;;  %v3936_v27 = vrot.slane %v3935_v25, 4 }
 0x31c   : > { %v3931_v26 = vrot.slane %v3930_v18, 2 }
 0x31d   : > { %v3925_v22 = vadd.f32 %v3924_v24, %v3923_v32  ;;  %v3937_v30 = vadd.f32 %v3936_v27, %v3935_v25 }
 0x31e   : > { %v3932_v29 = vadd.f32 %v3931_v26, %v3930_v18 }
 0x31f   : > { %v3926_v31 = vrot.slane %v3925_v22, 1  ;;  %v3938_v33 = vrot.slane %v3937_v30, 2 }
 0x320   : > { %v3933_v10 = vrot.slane %v3932_v29, 1 }
 0x321   : > { %v3927_v34 = vadd.f32 %v3926_v31, %v3925_v22  ;;  %v3939_v36 = vadd.f32 %v3938_v33, %v3937_v30 }
 0x322   : > { %v3934_v35 = vadd.f32 %v3933_v10, %v3932_v29 }
 0x323   : > { %v3946_v38 = vmul.f32 0.5, %v3927_v34  ;;  %v3940_v19 = vrot.slane %v3939_v36, 1 }
 0x324   : > { %v3947_v39 = vmul.f32 0.5, %v3934_v35 }
 0x325   : > { %v3953_v40 = vadd.f32 1e-05, %v3946_v38  ;;  %v3941_v42 = vadd.f32 %v3940_v19, %v3939_v36 }
 0x326   : > { %v3954_v41 = vadd.f32 1e-05, %v3947_v39 }
 0x327   : > { %5526 = vrsqrt.f32 %v3953_v40  ;;  %v3948_v44 = vmul.f32 0.5, %v3941_v42 }
 0x328   : > { %5528 = vrsqrt.f32 %v3954_v41 }
 0x329   : > { %v3955_v45 = vadd.f32 1e-05, %v3948_v44 }
 0x32b   : > { %5530 = vrsqrt.f32 %v3955_v45 }
 0x331   : > { %v5527_v50 = vpop.eup %5526 }
 0x332   : > { %v5529_v14 = vpop.eup %5528  ;;  %v3967_v52 = vmul.f32 %v5527_v50, %v3883_v7 }
 0x333   : > { %v3968_v53 = vmul.f32 %v5529_v14, %v3884_v8 }
 0x334   : > { %v4011_v55 = vmul.f32 %v3991_v48, %v3967_v52 }
 0x335   : > { %v4012_v0 = vmul.f32 %v3995_v51, %v3968_v53  ;;  %v5531_v57 = vpop.eup %5530 }
 0x336   : > { %v4055_v58 = vadd.f32 %v4035_v16, %v4011_v55  ;;  %v3969_v62 = vmul.f32 %v5531_v57, %v3885_v21 }
 0x337   : > { %v4056_v59 = vadd.f32 %v4039_v54, %v4012_v0 }
 0x338   : > { %v4062_v2 = vmax.f32 %v4055_v58, 0.0  ;;  %v4013_v3 = vmul.f32 %v3999_v56, %v3969_v62 }
 0x339   : > { %v4063_v43 = vmax.f32 %v4056_v59, 0.0 }
 0x33a   : > { %v4057_v5 = vadd.f32 %v4043_v1, %v4013_v3 }
 0x33b   : > { %v4691_v4 = vpack.c.bf16 %v4063_v43, %v4062_v2 }
 0x33c   : > { %v4064_v6 = vmax.f32 %v4057_v5, 0.0 }
 0x33d   : > { %v4102_v8 = vrot.slane %v4691_v4, %v5921_v49 }
 0x33e   : > { %v4071_v7 = vpack.c.bf16 %v4064_v6, %v4064_v6 }
 0x340   : > { %v4109_v9 = vrot.slane %v4071_v7, %v5921_v49 }
 0x342   : > { %v4111_v61 = vcombine.low %v4102_v8, %v4109_v9 }
 0x344   : > { %v4125_v63 = vrot.slane %v4111_v61, %v5921_v49 }
 0x346   : > { %v4126_v11 = vcombine.low %v4118_v37, %v4125_v63 }
 0x348   : > { %4128 = vst [vmem:[%s291_s19] sm:$0x7f] %v4126_v11 }
 0x349 PF: > { %p17_p0 = scmp.ge.s32.totalorder %s5716_s20, 9   ;;  %s6498_s15 = smov %s5652_s16 }
 0x34a   : > { %s6499_s16 = smov %s5656_s17  ;;  %s6500_s17 = smov %s5726_s23 }
 0x34b   : > { %s6501_s18 = smov %s5716_s20  ;;  %19 = sbr.rel (!%p17_p0) target bundleno = 5 (0x5), region = 100 }
 0x352   :  { %4149 = vsyncpa [#allocation3], 1 }
 0x353   :  { %4151 = vsyncpa [#allocation3 + $0x1], 1 }
 0x354   :  { %4152 = vsyncpa [#allocation5], 1 }
 0x355   :  { %4154 = vsyncpa [#allocation5 + $0x1], 1 }

// kernel: generator_forward.6
= control target key start
LH: loop header
LB: loop body
LE: loop exit
PB: predicated region body
PF: predicated region fallthrough
CT: control target
= control target key end

     0   :  { %vm1946_vm0 = vcmask 801792   ;;  %vm2573_vm1 = vcmask 797696   ;;  %s4641_s0 = inlined_call_operand.vmem [shape: bf16[4,512,98], index: 0, kind: input, shape index: {}]   ;;  %s4642_s1 = inlined_call_operand.vmem [shape: bf16[4,64,512], index: 1, kind: input, shape index: {}]   ;;  %s4643_s2 = inlined_call_operand.vmem [shape: f32[1,64,1], index: 2, kind: input, shape index: {}]   ;;  %s4644_s3 = inlined_call_operand.vmem [shape: f32[1,64,1], index: 3, kind: input, shape index: {}]   ;;  %s4645_s4 = inlined_call_operand.vmem [shape: bf16[4,64,98], index: 4, kind: output, shape index: {}]  }
   0x1   :  { %v3189_v0 = vld [vmem:[%s4641_s0 + $0x40] sm:$0xff]   ;;  %v3193_v4 = vld [vmem:[%s4641_s0 + $0x48] sm:$0xff]   ;;  %v3197_v8 = vld [vmem:[%s4641_s0 + $0x50] sm:$0xff]  }
   0x2   :  { %v3190_v1 = vld [vmem:[%s4641_s0 + $0xc0] sm:$0xff]   ;;  %2866 = vmatprep.subr.bf16.mxu0 %v3189_v0  ;;  %v3194_v5 = vld [vmem:[%s4641_s0 + $0xc8] sm:$0xff]   ;;  %v3198_v9 = vld [vmem:[%s4641_s0 + $0xd0] sm:$0xff]  }
   0x3   :  { %v3191_v2 = vld [vmem:[%s4641_s0] sm:$0xff]   ;;  %2906 = vmatprep.subr.bf16.mxu1 %v3190_v1  ;;  %v3195_v6 = vld [vmem:[%s4641_s0 + $0x8] sm:$0xff]   ;;  %v3199_v10 = vld [vmem:[%s4641_s0 + $0x10] sm:$0xff]  }
   0x4   :  { %v3192_v3 = vld [vmem:[%s4641_s0 + $0x80] sm:$0xff]   ;;  %2867 = vmatpush3.bf16.msra.mxu0 %v3191_v2  ;;  %v3196_v7 = vld [vmem:[%s4641_s0 + $0x88] sm:$0xff]   ;;  %v3200_v11 = vld [vmem:[%s4641_s0 + $0x90] sm:$0xff]  }
   0x5   :  { %2907 = vmatpush3.bf16.msra.mxu1 %v3192_v3  ;;  %2868 = vmatprep.subr.bf16.mxu0 %v3193_v4  ;;  %v3201_v12 = vld [vmem:[%s4641_s0 + $0x58] sm:$0xff]   ;;  %v3205_v16 = vld [vmem:[%s4641_s0 + $0x60] sm:$0xff]   ;;  %v3209_v20 = vld [vmem:[%s4641_s0 + $0x68] sm:$0xff]  }
   0x6   :  { %2908 = vmatprep.subr.bf16.mxu1 %v3194_v5  ;;  %v3202_v13 = vld [vmem:[%s4641_s0 + $0xd8] sm:$0xff]   ;;  %v3206_v17 = vld [vmem:[%s4641_s0 + $0xe0] sm:$0xff]   ;;  %v3210_v21 = vld [vmem:[%s4641_s0 + $0xe8] sm:$0xff]  }
   0x7   :  { %v3203_v14 = vld [vmem:[%s4641_s0 + $0x18] sm:$0xff]   ;;  %v3207_v18 = vld [vmem:[%s4641_s0 + $0x20] sm:$0xff]   ;;  %v3211_v22 = vld [vmem:[%s4641_s0 + $0x28] sm:$0xff]  }
   0x8   :  { %2869 = vmatpush3.bf16.msra.mxu0 %v3195_v6  ;;  %v3204_v15 = vld [vmem:[%s4641_s0 + $0x98] sm:$0xff]   ;;  %v3208_v19 = vld [vmem:[%s4641_s0 + $0xa0] sm:$0xff]   ;;  %v3212_v23 = vld [vmem:[%s4641_s0 + $0xa8] sm:$0xff]  }
   0x9   :  { %2909 = vmatpush3.bf16.msra.mxu1 %v3196_v7  ;;  %2870 = vmatprep.subr.bf16.mxu0 %v3197_v8  ;;  %v3213_v24 = vld [vmem:[%s4641_s0 + $0x70] sm:$0xff]   ;;  %v3217_v28 = vld [vmem:[%s4641_s0 + $0x78] sm:$0xff]   ;;  %v3227_v36 = vld [vmem:[%s4641_s0 + $0x140] sm:$0xff]  }
   0xa   :  { %2910 = vmatprep.subr.bf16.mxu1 %v3198_v9  ;;  %v3214_v25 = vld [vmem:[%s4641_s0 + $0xf0] sm:$0xff]   ;;  %v3218_v29 = vld [vmem:[%s4641_s0 + $0xf8] sm:$0xff]   ;;  %v3228_v37 = vld [vmem:[%s4641_s0 + $0x1c0] sm:$0xff]  }
   0xb   :  { %v3215_v26 = vld [vmem:[%s4641_s0 + $0x30] sm:$0xff]   ;;  %v3219_v30 = vld [vmem:[%s4641_s0 + $0x38] sm:$0xff]   ;;  %v3229_v38 = vld [vmem:[%s4641_s0 + $0x100] sm:$0xff]  }
   0xc   :  { %2871 = vmatpush3.bf16.msra.mxu0 %v3199_v10  ;;  %v3216_v27 = vld [vmem:[%s4641_s0 + $0xb0] sm:$0xff]   ;;  %v3220_v31 = vld [vmem:[%s4641_s0 + $0xb8] sm:$0xff]   ;;  %v3230_v39 = vld [vmem:[%s4641_s0 + $0x180] sm:$0xff]  }
   0xd   :  { %2911 = vmatpush3.bf16.msra.mxu1 %v3200_v11  ;;  %2872 = vmatprep.subr.bf16.mxu0 %v3201_v12  ;;  %v3221_v32 = vld [vmem:[%s4642_s1] ss:$16 sps:$4 sm:$0xff]   ;;  %v3223_v33 = vld [vmem:[%s4642_s1 + $0x4] ss:$16 sps:$4 sm:$0xff]   ;;  %v3224_v34 = vld [vmem:[%s4642_s1 + $0x8] ss:$16 sps:$4 sm:$0xff]  }
   0xe   :  { %2912 = vmatprep.subr.bf16.mxu1 %v3202_v13  ;;  %v3226_v35 = vld [vmem:[%s4642_s1 + $0xc] ss:$16 sps:$4 sm:$0xff]   ;;  %642 = vmatprep.mubr.bf16.mxu0 %v3223_v33  ;;  %v3235_v44 = vld [vmem:[%s4642_s1 + $0x24] ss:$16 sps:$4 sm:$0xff]   ;;  %v3239_v46 = vld [vmem:[%s4642_s1 + $0x20] ss:$16 sps:$4 sm:$0xff]  }
   0xf   :  { %707 = vmatprep.mubr.bf16.mxu1 %v3226_v35  ;;  %v3231_v40 = vld [vmem:[%s4641_s0 + $0x148] sm:$0xff]   ;;  %v3241_v48 = vld [vmem:[%s4641_s0 + $0x150] sm:$0xff]   ;;  %v3245_v52 = vld [vmem:[%s4641_s0 + $0x158] sm:$0xff]  }
  0x10   :  { %2873 = vmatpush3.bf16.msra.mxu0 %v3203_v14  ;;  %v3232_v41 = vld [vmem:[%s4641_s0 + $0x1c8] sm:$0xff]   ;;  %v3242_v49 = vld [vmem:[%s4641_s0 + $0x1d0] sm:$0xff]   ;;  %v3246_v53 = vld [vmem:[%s4641_s0 + $0x1d8] sm:$0xff]  }
  0x11   :  { %2913 = vmatpush3.bf16.msra.mxu1 %v3204_v15  ;;  %2874 = vmatprep.subr.bf16.mxu0 %v3205_v16  ;;  %v3233_v42 = vld [vmem:[%s4641_s0 + $0x108] sm:$0xff]   ;;  %v3243_v50 = vld [vmem:[%s4641_s0 + $0x110] sm:$0xff]   ;;  %v3247_v54 = vld [vmem:[%s4641_s0 + $0x118] sm:$0xff]  }
  0x12   :  { %2914 = vmatprep.subr.bf16.mxu1 %v3206_v17  ;;  %v3234_v43 = vld [vmem:[%s4641_s0 + $0x188] sm:$0xff]   ;;  %v3244_v51 = vld [vmem:[%s4641_s0 + $0x190] sm:$0xff]   ;;  %v3248_v55 = vld [vmem:[%s4641_s0 + $0x198] sm:$0xff]  }
  0x13   :  { %v3237_v45 = vld [vmem:[%s4642_s1 + $0x2c] ss:$16 sps:$4 sm:$0xff]   ;;  %v3240_v47 = vld [vmem:[%s4642_s1 + $0x28] ss:$16 sps:$4 sm:$0xff]   ;;  %v3249_v56 = vld [vmem:[%s4642_s1 + $0x44] ss:$16 sps:$4 sm:$0xff]  }
  0x14   :  { %2875 = vmatpush3.bf16.msra.mxu0 %v3207_v18  ;;  %v3251_v57 = vld [vmem:[%s4642_s1 + $0x4c] ss:$16 sps:$4 sm:$0xff]   ;;  %v3253_v58 = vld [vmem:[%s4642_s1 + $0x40] ss:$16 sps:$4 sm:$0xff]   ;;  %v3254_v59 = vld [vmem:[%s4642_s1 + $0x48] ss:$16 sps:$4 sm:$0xff]  }
  0x15   :  { %2915 = vmatpush3.bf16.msra.mxu1 %v3208_v19  ;;  %2876 = vmatprep.subr.bf16.mxu0 %v3209_v20  ;;  %v3255_v60 = vld [vmem:[%s4641_s0 + $0x160] sm:$0xff]   ;;  %v3259_v0 = vld [vmem:[%s4641_s0 + $0x168] sm:$0xff]   ;;  %v3269_v8 = vld [vmem:[%s4641_s0 + $0x170] sm:$0xff]  }
  0x16   :  { %2916 = vmatprep.subr.bf16.mxu1 %v3210_v21  ;;  %v3256_v61 = vld [vmem:[%s4641_s0 + $0x1e0] sm:$0xff]   ;;  %v3260_v1 = vld [vmem:[%s4641_s0 + $0x1e8] sm:$0xff]   ;;  %v3270_v9 = vld [vmem:[%s4641_s0 + $0x1f0] sm:$0xff]  }
  0x17   :  { %v3257_v62 = vld [vmem:[%s4641_s0 + $0x120] sm:$0xff]   ;;  %v3261_v2 = vld [vmem:[%s4641_s0 + $0x128] sm:$0xff]   ;;  %v3271_v10 = vld [vmem:[%s4641_s0 + $0x130] sm:$0xff]  }
  0x18   :  { %2877 = vmatpush3.bf16.msra.mxu0 %v3211_v22  ;;  %v3258_v63 = vld [vmem:[%s4641_s0 + $0x1a0] sm:$0xff]   ;;  %v3262_v3 = vld [vmem:[%s4641_s0 + $0x1a8] sm:$0xff]   ;;  %v3272_v11 = vld [vmem:[%s4641_s0 + $0x1b0] sm:$0xff]  }
  0x19   :  { %2917 = vmatpush3.bf16.msra.mxu1 %v3212_v23  ;;  %2878 = vmatprep.subr.bf16.mxu0 %v3213_v24  ;;  %v3263_v4 = vld [vmem:[%s4642_s1 + $0x64] ss:$16 sps:$4 sm:$0xff]   ;;  %v3265_v5 = vld [vmem:[%s4642_s1 + $0x6c] ss:$16 sps:$4 sm:$0xff]   ;;  %v3267_v6 = vld [vmem:[%s4642_s1 + $0x60] ss:$16 sps:$4 sm:$0xff]  }
  0x1a   :  { %2918 = vmatprep.subr.bf16.mxu1 %v3214_v25  ;;  %v3268_v7 = vld [vmem:[%s4642_s1 + $0x68] ss:$16 sps:$4 sm:$0xff]   ;;  %v3277_v16 = vld [vmem:[%s4642_s1 + $0x80] ss:$16 sps:$4 sm:$0xff]   ;;  %v3279_v17 = vld [vmem:[%s4642_s1 + $0x84] ss:$16 sps:$4 sm:$0xff]  }
  0x1b   :  { %v3273_v12 = vld [vmem:[%s4641_s0 + $0x178] sm:$0xff]   ;;  %v3283_v20 = vld [vmem:[%s4641_s0 + $0x240] sm:$0xff]   ;;  %v3287_v24 = vld [vmem:[%s4641_s0 + $0x248] sm:$0xff]  }
  0x1c   :  { %2879 = vmatpush3.bf16.msra.mxu0 %v3215_v26  ;;  %v3274_v13 = vld [vmem:[%s4641_s0 + $0x1f8] sm:$0xff]   ;;  %v3284_v21 = vld [vmem:[%s4641_s0 + $0x2c0] sm:$0xff]   ;;  %v3288_v25 = vld [vmem:[%s4641_s0 + $0x2c8] sm:$0xff]  }
  0x1d   :  { %2919 = vmatpush3.bf16.msra.mxu1 %v3216_v27  ;;  %2880 = vmatprep.subr.bf16.mxu0 %v3217_v28  ;;  %v3275_v14 = vld [vmem:[%s4641_s0 + $0x138] sm:$0xff]   ;;  %v3285_v22 = vld [vmem:[%s4641_s0 + $0x200] sm:$0xff]   ;;  %v3289_v26 = vld [vmem:[%s4641_s0 + $0x208] sm:$0xff]  }
  0x1e   :  { %2920 = vmatprep.subr.bf16.mxu1 %v3218_v29  ;;  %v3276_v15 = vld [vmem:[%s4641_s0 + $0x1b8] sm:$0xff]   ;;  %v3286_v23 = vld [vmem:[%s4641_s0 + $0x280] sm:$0xff]   ;;  %v3290_v27 = vld [vmem:[%s4641_s0 + $0x288] sm:$0xff]  }
  0x1f   :  { %v3280_v18 = vld [vmem:[%s4642_s1 + $0x88] ss:$16 sps:$4 sm:$0xff]   ;;  %v3282_v19 = vld [vmem:[%s4642_s1 + $0x8c] ss:$16 sps:$4 sm:$0xff]   ;;  %v3291_v28 = vld [vmem:[%s4642_s1 + $0xa4] ss:$16 sps:$4 sm:$0xff]  }
  0x20   :  { %2881 = vmatpush3.bf16.msra.mxu0 %v3219_v30  ;;  %v3293_v29 = vld [vmem:[%s4642_s1 + $0xac] ss:$16 sps:$4 sm:$0xff]   ;;  %v3295_v30 = vld [vmem:[%s4642_s1 + $0xa0] ss:$16 sps:$4 sm:$0xff]  }
  0x21   :  { %2921 = vmatpush3.bf16.msra.mxu1 %v3220_v31  ;;  %2946 = vmatprep.subr.bf16.mxu0 %v3227_v36  ;;  %v3296_v31 = vld [vmem:[%s4642_s1 + $0xa8] ss:$16 sps:$4 sm:$0xff]   ;;  %v3298_v33 = vld [vmem:[%s4641_s0 + $0x2d0] sm:$0xff]  }
  0x22   :  { %2986 = vmatprep.subr.bf16.mxu1 %v3228_v37  ;;  %v3300_v35 = vld [vmem:[%s4641_s0 + $0x290] sm:$0xff]   ;;  %v3301_v36 = vld [vmem:[%s4641_s0 + $0x258] sm:$0xff]  }
  0x23   :  { %643 = vmatmul.mubr.bf16.vlgmr.msra.gmra.mrb[0].mxu0 %v3221_v32  ;;  %v3297_v32 = vld [vmem:[%s4641_s0 + $0x250] sm:$0xff]   ;;  %v3302_v37 = vld [vmem:[%s4641_s0 + $0x2d8] sm:$0xff]  }
  0x24   :  { %708 = vmatmul.mubr.bf16.vlgmr.msra.gmra.mrb[0].mxu1 %v3224_v34  ;;  %2947 = vmatpush3.bf16.msra.mxu0 %v3229_v38  ;;  %v3299_v34 = vld [vmem:[%s4641_s0 + $0x210] sm:$0xff]   ;;  %v3303_v38 = vld [vmem:[%s4641_s0 + $0x218] sm:$0xff]  }
  0x25   :  { %2987 = vmatpush3.bf16.msra.mxu1 %v3230_v39  ;;  %2948 = vmatprep.subr.bf16.mxu0 %v3231_v40  ;;  %v3304_v39 = vld [vmem:[%s4641_s0 + $0x298] sm:$0xff]   ;;  %v3305_v40 = vld [vmem:[%s4642_s1 + $0xc4] ss:$16 sps:$4 sm:$0xff]  }
  0x26   :  { %2988 = vmatprep.subr.bf16.mxu1 %v3232_v41  ;;  %650 = vmatprep.mubr.bf16.mxu0 %v3235_v44  ;;  %v3307_v41 = vld [vmem:[%s4642_s1 + $0xcc] ss:$16 sps:$4 sm:$0xff]   ;;  %v3311_v44 = vld [vmem:[%s4641_s0 + $0x260] sm:$0xff]  }
  0x27   :  { %715 = vmatprep.mubr.bf16.mxu1 %v3237_v45  ;;  %v3312_v45 = vld [vmem:[%s4641_s0 + $0x2e0] sm:$0xff]  }
  0x28   :  { %2949 = vmatpush3.bf16.msra.mxu0 %v3233_v42  ;;  %v3309_v42 = vld [vmem:[%s4642_s1 + $0xc0] ss:$16 sps:$4 sm:$0xff]  }
  0x29   :  { %2989 = vmatpush3.bf16.msra.mxu1 %v3234_v43  ;;  %2950 = vmatprep.subr.bf16.mxu0 %v3241_v48  ;;  %v3310_v43 = vld [vmem:[%s4642_s1 + $0xc8] ss:$16 sps:$4 sm:$0xff]  }
  0x2a   :  { %2990 = vmatprep.subr.bf16.mxu1 %v3242_v49  ;;  %v3315_v48 = vld [vmem:[%s4641_s0 + $0x268] sm:$0xff]  }
  0x2b   :  { %651 = vmatmul.mubr.bf16.gmra.mrb[4].mxu0 %v3239_v46  ;;  %v3313_v46 = vld [vmem:[%s4641_s0 + $0x220] sm:$0xff]   ;;  %v3316_v49 = vld [vmem:[%s4641_s0 + $0x2e8] sm:$0xff]  }
  0x2c   :  { %716 = vmatmul.mubr.bf16.gmra.mrb[4].mxu1 %v3240_v47  ;;  %2951 = vmatpush3.bf16.msra.mxu0 %v3243_v50  ;;  %v3314_v47 = vld [vmem:[%s4641_s0 + $0x2a0] sm:$0xff]   ;;  %v3317_v50 = vld [vmem:[%s4641_s0 + $0x228] sm:$0xff]  }
  0x2d   :  { %2991 = vmatpush3.bf16.msra.mxu1 %v3244_v51  ;;  %2952 = vmatprep.subr.bf16.mxu0 %v3245_v52  ;;  %v3318_v51 = vld [vmem:[%s4641_s0 + $0x2a8] sm:$0xff]   ;;  %v3319_v52 = vld [vmem:[%s4642_s1 + $0xe4] ss:$16 sps:$4 sm:$0xff]  }
  0x2e   :  { %2992 = vmatprep.subr.bf16.mxu1 %v3246_v53  ;;  %658 = vmatprep.mubr.bf16.mxu0 %v3249_v56  ;;  %v3321_v53 = vld [vmem:[%s4642_s1 + $0xec] ss:$16 sps:$4 sm:$0xff]   ;;  %v3325_v56 = vld [vmem:[%s4641_s0 + $0x270] sm:$0xff]  }
  0x2f   :  { %723 = vmatprep.mubr.bf16.mxu1 %v3251_v57  ;;  %v3326_v57 = vld [vmem:[%s4641_s0 + $0x2f0] sm:$0xff]  }
  0x30   :  { %2953 = vmatpush3.bf16.msra.mxu0 %v3247_v54  ;;  %v3323_v54 = vld [vmem:[%s4642_s1 + $0xe0] ss:$16 sps:$4 sm:$0xff]  }
  0x31   :  { %2993 = vmatpush3.bf16.msra.mxu1 %v3248_v55  ;;  %2954 = vmatprep.subr.bf16.mxu0 %v3255_v60  ;;  %v3324_v55 = vld [vmem:[%s4642_s1 + $0xe8] ss:$16 sps:$4 sm:$0xff]  }
  0x32   :  { %2994 = vmatprep.subr.bf16.mxu1 %v3256_v61  ;;  %v3329_v60 = vld [vmem:[%s4641_s0 + $0x278] sm:$0xff]  }
  0x33   :  { %659 = vmatmul.mubr.bf16.gmra.mrb[8].mxu0 %v3253_v58  ;;  %v3327_v58 = vld [vmem:[%s4641_s0 + $0x230] sm:$0xff]   ;;  %v3330_v61 = vld [vmem:[%s4641_s0 + $0x2f8] sm:$0xff]  }
  0x34   :  { %724 = vmatmul.mubr.bf16.gmra.mrb[8].mxu1 %v3254_v59  ;;  %2955 = vmatpush3.bf16.msra.mxu0 %v3257_v62  ;;  %v3328_v59 = vld [vmem:[%s4641_s0 + $0x2b0] sm:$0xff]   ;;  %v3331_v62 = vld [vmem:[%s4641_s0 + $0x238] sm:$0xff]  }
  0x35   :  { %2995 = vmatpush3.bf16.msra.mxu1 %v3258_v63  ;;  %2956 = vmatprep.subr.bf16.mxu0 %v3259_v0  ;;  %v3332_v63 = vld [vmem:[%s4641_s0 + $0x2b8] sm:$0xff]   ;;  %v3333_v0 = vld [vmem:[%s4642_s1 + $0x100] ss:$16 sps:$4 sm:$0xff]  }
  0x36   :  { %2996 = vmatprep.subr.bf16.mxu1 %v3260_v1  ;;  %666 = vmatprep.mubr.bf16.mxu0 %v3263_v4  ;;  %v3335_v1 = vld [vmem:[%s4642_s1 + $0x104] ss:$16 sps:$4 sm:$0xff]  }
  0x37   :  { %731 = vmatprep.mubr.bf16.mxu1 %v3265_v5  ;;  %v3339_v4 = vld [vmem:[%s4641_s0 + $0x340] sm:$0xff]  }
  0x38   :  { %2957 = vmatpush3.bf16.msra.mxu0 %v3261_v2  ;;  %v3336_v2 = vld [vmem:[%s4642_s1 + $0x108] ss:$16 sps:$4 sm:$0xff]   ;;  %v3340_v5 = vld [vmem:[%s4641_s0 + $0x3c0] sm:$0xff]  }
  0x39   :  { %2997 = vmatpush3.bf16.msra.mxu1 %v3262_v3  ;;  %2958 = vmatprep.subr.bf16.mxu0 %v3269_v8  ;;  %v3338_v3 = vld [vmem:[%s4642_s1 + $0x10c] ss:$16 sps:$4 sm:$0xff]  }
  0x3a   :  { %2998 = vmatprep.subr.bf16.mxu1 %v3270_v9  ;;  %v3343_v8 = vld [vmem:[%s4641_s0 + $0x348] sm:$0xff]  }
  0x3b   :  { %667 = vmatmul.mubr.bf16.gmra.mrb[12].mxu0 %v3267_v6  ;;  %v3341_v6 = vld [vmem:[%s4641_s0 + $0x300] sm:$0xff]   ;;  %v3344_v9 = vld [vmem:[%s4641_s0 + $0x3c8] sm:$0xff]  }
  0x3c   :  { %732 = vmatmul.mubr.bf16.gmra.mrb[12].mxu1 %v3268_v7  ;;  %2959 = vmatpush3.bf16.msra.mxu0 %v3271_v10  ;;  %v3342_v7 = vld [vmem:[%s4641_s0 + $0x380] sm:$0xff]   ;;  %v3345_v10 = vld [vmem:[%s4641_s0 + $0x308] sm:$0xff]  }
  0x3d   :  { %2999 = vmatpush3.bf16.msra.mxu1 %v3272_v11  ;;  %2960 = vmatprep.subr.bf16.mxu0 %v3273_v12  ;;  %v3346_v11 = vld [vmem:[%s4641_s0 + $0x388] sm:$0xff]   ;;  %v3347_v12 = vld [vmem:[%s4642_s1 + $0x124] ss:$16 sps:$4 sm:$0xff]  }
  0x3e   :  { %3000 = vmatprep.subr.bf16.mxu1 %v3274_v13  ;;  %1044 = vmatprep.mubr.bf16.mxu0 %v3279_v17  ;;  %v3349_v13 = vld [vmem:[%s4642_s1 + $0x12c] ss:$16 sps:$4 sm:$0xff]   ;;  %v3354_v17 = vld [vmem:[%s4641_s0 + $0x3d0] sm:$0xff]  }
  0x3f   :  { %1109 = vmatprep.mubr.bf16.mxu1 %v3282_v19  ;;  %v3356_v19 = vld [vmem:[%s4641_s0 + $0x390] sm:$0xff]  }
  0x40   :  { %2961 = vmatpush3.bf16.msra.mxu0 %v3275_v14  ;;  %v3351_v14 = vld [vmem:[%s4642_s1 + $0x120] ss:$16 sps:$4 sm:$0xff]  }
  0x41   :  { %3001 = vmatpush3.bf16.msra.mxu1 %v3276_v15  ;;  %3026 = vmatprep.subr.bf16.mxu0 %v3283_v20  ;;  %v3352_v15 = vld [vmem:[%s4642_s1 + $0x128] ss:$16 sps:$4 sm:$0xff]  }
  0x42   :  { %3066 = vmatprep.subr.bf16.mxu1 %v3284_v21  ;;  %v3357_v20 = vld [vmem:[%s4641_s0 + $0x358] sm:$0xff]  }
  0x43   :  { %1045 = vmatmul.mubr.bf16.vlgmr.msra.gmra.mrb[16].mxu0 %v3277_v16  ;;  %v3353_v16 = vld [vmem:[%s4641_s0 + $0x350] sm:$0xff]   ;;  %v3358_v21 = vld [vmem:[%s4641_s0 + $0x3d8] sm:$0xff]  }
  0x44   :  { %1110 = vmatmul.mubr.bf16.vlgmr.msra.gmra.mrb[16].mxu1 %v3280_v18  ;;  %3027 = vmatpush3.bf16.msra.mxu0 %v3285_v22  ;;  %v3355_v18 = vld [vmem:[%s4641_s0 + $0x310] sm:$0xff]   ;;  %v3359_v22 = vld [vmem:[%s4641_s0 + $0x318] sm:$0xff]  }
  0x45   :  { %3067 = vmatpush3.bf16.msra.mxu1 %v3286_v23  ;;  %3028 = vmatprep.subr.bf16.mxu0 %v3287_v24  ;;  %v3360_v23 = vld [vmem:[%s4641_s0 + $0x398] sm:$0xff]   ;;  %v3361_v24 = vld [vmem:[%s4642_s1 + $0x144] ss:$16 sps:$4 sm:$0xff]  }
  0x46   :  { %3068 = vmatprep.subr.bf16.mxu1 %v3288_v25  ;;  %1052 = vmatprep.mubr.bf16.mxu0 %v3291_v28  ;;  %v3363_v25 = vld [vmem:[%s4642_s1 + $0x14c] ss:$16 sps:$4 sm:$0xff]   ;;  %v3367_v28 = vld [vmem:[%s4641_s0 + $0x360] sm:$0xff]  }
  0x47   :  { %1117 = vmatprep.mubr.bf16.mxu1 %v3293_v29  ;;  %v3368_v29 = vld [vmem:[%s4641_s0 + $0x3e0] sm:$0xff]  }
  0x48   :  { %3029 = vmatpush3.bf16.msra.mxu0 %v3289_v26  ;;  %v3365_v26 = vld [vmem:[%s4642_s1 + $0x140] ss:$16 sps:$4 sm:$0xff]  }
  0x49   :  { %3069 = vmatpush3.bf16.msra.mxu1 %v3290_v27  ;;  %3030 = vmatprep.subr.bf16.mxu0 %v3297_v32  ;;  %v3366_v27 = vld [vmem:[%s4642_s1 + $0x148] ss:$16 sps:$4 sm:$0xff]  }
  0x4a   :  { %3070 = vmatprep.subr.bf16.mxu1 %v3298_v33  ;;  %v3371_v32 = vld [vmem:[%s4641_s0 + $0x368] sm:$0xff]  }
  0x4b   :  { %1053 = vmatmul.mubr.bf16.gmra.mrb[20].mxu0 %v3295_v30  ;;  %v3369_v30 = vld [vmem:[%s4641_s0 + $0x320] sm:$0xff]   ;;  %v3372_v33 = vld [vmem:[%s4641_s0 + $0x3e8] sm:$0xff]  }
  0x4c   :  { %1118 = vmatmul.mubr.bf16.gmra.mrb[20].mxu1 %v3296_v31  ;;  %3031 = vmatpush3.bf16.msra.mxu0 %v3299_v34  ;;  %v3370_v31 = vld [vmem:[%s4641_s0 + $0x3a0] sm:$0xff]   ;;  %v3373_v34 = vld [vmem:[%s4641_s0 + $0x328] sm:$0xff]  }
  0x4d   :  { %3071 = vmatpush3.bf16.msra.mxu1 %v3300_v35  ;;  %3032 = vmatprep.subr.bf16.mxu0 %v3301_v36  ;;  %v3374_v35 = vld [vmem:[%s4641_s0 + $0x3a8] sm:$0xff]   ;;  %v3375_v36 = vld [vmem:[%s4642_s1 + $0x164] ss:$16 sps:$4 sm:$0xff]  }
  0x4e   :  { %3072 = vmatprep.subr.bf16.mxu1 %v3302_v37  ;;  %1060 = vmatprep.mubr.bf16.mxu0 %v3305_v40  ;;  %v3377_v37 = vld [vmem:[%s4642_s1 + $0x16c] ss:$16 sps:$4 sm:$0xff]   ;;  %v3381_v40 = vld [vmem:[%s4641_s0 + $0x370] sm:$0xff]  }
  0x4f   :  { %1125 = vmatprep.mubr.bf16.mxu1 %v3307_v41  ;;  %v3382_v41 = vld [vmem:[%s4641_s0 + $0x3f0] sm:$0xff]  }
  0x50   :  { %3033 = vmatpush3.bf16.msra.mxu0 %v3303_v38  ;;  %v3379_v38 = vld [vmem:[%s4642_s1 + $0x160] ss:$16 sps:$4 sm:$0xff]  }
  0x51   :  { %3073 = vmatpush3.bf16.msra.mxu1 %v3304_v39  ;;  %3034 = vmatprep.subr.bf16.mxu0 %v3311_v44  ;;  %v3380_v39 = vld [vmem:[%s4642_s1 + $0x168] ss:$16 sps:$4 sm:$0xff]  }
  0x52   :  { %3074 = vmatprep.subr.bf16.mxu1 %v3312_v45  ;;  %v3385_v44 = vld [vmem:[%s4641_s0 + $0x378] sm:$0xff]  }
  0x53   :  { %1061 = vmatmul.mubr.bf16.gmra.mrb[24].mxu0 %v3309_v42  ;;  %v3383_v42 = vld [vmem:[%s4641_s0 + $0x330] sm:$0xff]   ;;  %v3386_v45 = vld [vmem:[%s4641_s0 + $0x3f8] sm:$0xff]  }
  0x54   :  { %1126 = vmatmul.mubr.bf16.gmra.mrb[24].mxu1 %v3310_v43  ;;  %3035 = vmatpush3.bf16.msra.mxu0 %v3313_v46  ;;  %v3384_v43 = vld [vmem:[%s4641_s0 + $0x3b0] sm:$0xff]   ;;  %v3387_v46 = vld [vmem:[%s4641_s0 + $0x338] sm:$0xff]  }
  0x55   :  { %3075 = vmatpush3.bf16.msra.mxu1 %v3314_v47  ;;  %3036 = vmatprep.subr.bf16.mxu0 %v3315_v48  ;;  %v3388_v47 = vld [vmem:[%s4641_s0 + $0x3b8] sm:$0xff]   ;;  %v3389_v48 = vld [vmem:[%s4642_s1 + $0x180] ss:$16 sps:$4 sm:$0xff]  }
  0x56   :  { %3076 = vmatprep.subr.bf16.mxu1 %v3316_v49  ;;  %1068 = vmatprep.mubr.bf16.mxu0 %v3319_v52  ;;  %v3391_v49 = vld [vmem:[%s4642_s1 + $0x184] ss:$16 sps:$4 sm:$0xff]  }
  0x57   :  { %1133 = vmatprep.mubr.bf16.mxu1 %v3321_v53  ;;  %v3395_v52 = vld [vmem:[%s4642_s1 + $0x1a4] ss:$16 sps:$4 sm:$0xff]   ;;  %v3397_v53 = vld [vmem:[%s4642_s1 + $0x1ac] ss:$16 sps:$4 sm:$0xff]  }
  0x58   :  { %3037 = vmatpush3.bf16.msra.mxu0 %v3317_v50  ;;  %v3392_v50 = vld [vmem:[%s4642_s1 + $0x188] ss:$16 sps:$4 sm:$0xff]  }
  0x59   :  { %3077 = vmatpush3.bf16.msra.mxu1 %v3318_v51  ;;  %3038 = vmatprep.subr.bf16.mxu0 %v3325_v56  ;;  %v3394_v51 = vld [vmem:[%s4642_s1 + $0x18c] ss:$16 sps:$4 sm:$0xff]   ;;  %v3401_v56 = vld [vmem:[%s4642_s1 + $0x1c4] ss:$16 sps:$4 sm:$0xff]  }
  0x5a   :  { %3078 = vmatprep.subr.bf16.mxu1 %v3326_v57  ;;  %v3403_v57 = vld [vmem:[%s4642_s1 + $0x1cc] ss:$16 sps:$4 sm:$0xff]  }
  0x5b   :  { %1069 = vmatmul.mubr.bf16.gmra.mrb[28].mxu0 %v3323_v54  ;;  %v3399_v54 = vld [vmem:[%s4642_s1 + $0x1a0] ss:$16 sps:$4 sm:$0xff]  }
  0x5c   :  { %1134 = vmatmul.mubr.bf16.gmra.mrb[28].mxu1 %v3324_v55  ;;  %3039 = vmatpush3.bf16.msra.mxu0 %v3327_v58  ;;  %v3400_v55 = vld [vmem:[%s4642_s1 + $0x1a8] ss:$16 sps:$4 sm:$0xff]   ;;  %v3405_v58 = vld [vmem:[%s4642_s1 + $0x1c0] ss:$16 sps:$4 sm:$0xff]  }
  0x5d   :  { %3079 = vmatpush3.bf16.msra.mxu1 %v3328_v59  ;;  %3040 = vmatprep.subr.bf16.mxu0 %v3329_v60  ;;  %v3406_v59 = vld [vmem:[%s4642_s1 + $0x1c8] ss:$16 sps:$4 sm:$0xff]   ;;  %v3407_v60 = vld [vmem:[%s4642_s1 + $0x1e4] ss:$16 sps:$4 sm:$0xff]  }
  0x5e   :  { %3080 = vmatprep.subr.bf16.mxu1 %v3330_v61  ;;  %1446 = vmatprep.mubr.bf16.mxu0 %v3335_v1  ;;  %v3409_v61 = vld [vmem:[%s4642_s1 + $0x1ec] ss:$16 sps:$4 sm:$0xff]  }
  0x5f   :  { %1511 = vmatprep.mubr.bf16.mxu1 %v3338_v3 }
  0x60   :  { %3041 = vmatpush3.bf16.msra.mxu0 %v3331_v62  ;;  %v3411_v62 = vld [vmem:[%s4642_s1 + $0x1e0] ss:$16 sps:$4 sm:$0xff]  }
  0x61   :  { %3081 = vmatpush3.bf16.msra.mxu1 %v3332_v63  ;;  %3106 = vmatprep.subr.bf16.mxu0 %v3339_v4  ;;  %v3412_v63 = vld [vmem:[%s4642_s1 + $0x1e8] ss:$16 sps:$4 sm:$0xff]  }
  0x62   :  { %3146 = vmatprep.subr.bf16.mxu1 %v3340_v5 }
  0x63   :  { %1447 = vmatmul.mubr.bf16.vlgmr.msra.gmra.mrb[32].mxu0 %v3333_v0 }
  0x64   :  { %1512 = vmatmul.mubr.bf16.vlgmr.msra.gmra.mrb[32].mxu1 %v3336_v2  ;;  %3107 = vmatpush3.bf16.msra.mxu0 %v3341_v6 }
  0x65   :  { %3147 = vmatpush3.bf16.msra.mxu1 %v3342_v7  ;;  %3108 = vmatprep.subr.bf16.mxu0 %v3343_v8 }
  0x66   :  { %3148 = vmatprep.subr.bf16.mxu1 %v3344_v9  ;;  %1454 = vmatprep.mubr.bf16.mxu0 %v3347_v12 }
  0x67   :  { %1519 = vmatprep.mubr.bf16.mxu1 %v3349_v13 }
  0x68   :  { %3109 = vmatpush3.bf16.msra.mxu0 %v3345_v10 }
  0x69   :  { %3149 = vmatpush3.bf16.msra.mxu1 %v3346_v11  ;;  %3110 = vmatprep.subr.bf16.mxu0 %v3353_v16 }
  0x6a   :  { %3150 = vmatprep.subr.bf16.mxu1 %v3354_v17 }
  0x6b   :  { %1455 = vmatmul.mubr.bf16.gmra.mrb[36].mxu0 %v3351_v14 }
  0x6c   :  { %1520 = vmatmul.mubr.bf16.gmra.mrb[36].mxu1 %v3352_v15  ;;  %3111 = vmatpush3.bf16.msra.mxu0 %v3355_v18 }
  0x6d   :  { %3151 = vmatpush3.bf16.msra.mxu1 %v3356_v19  ;;  %3112 = vmatprep.subr.bf16.mxu0 %v3357_v20 }
  0x6e   :  { %3152 = vmatprep.subr.bf16.mxu1 %v3358_v21  ;;  %1462 = vmatprep.mubr.bf16.mxu0 %v3361_v24 }
  0x6f   :  { %1527 = vmatprep.mubr.bf16.mxu1 %v3363_v25 }
  0x70   :  { %3113 = vmatpush3.bf16.msra.mxu0 %v3359_v22 }
  0x71   :  { %3153 = vmatpush3.bf16.msra.mxu1 %v3360_v23  ;;  %3114 = vmatprep.subr.bf16.mxu0 %v3367_v28 }
  0x72   :  { %3154 = vmatprep.subr.bf16.mxu1 %v3368_v29 }
  0x73   :  { %1463 = vmatmul.mubr.bf16.gmra.mrb[40].mxu0 %v3365_v26 }
  0x74   :  { %1528 = vmatmul.mubr.bf16.gmra.mrb[40].mxu1 %v3366_v27  ;;  %3115 = vmatpush3.bf16.msra.mxu0 %v3369_v30 }
  0x75   :  { %3155 = vmatpush3.bf16.msra.mxu1 %v3370_v31  ;;  %3116 = vmatprep.subr.bf16.mxu0 %v3371_v32 }
  0x76   :  { %3156 = vmatprep.subr.bf16.mxu1 %v3372_v33  ;;  %1470 = vmatprep.mubr.bf16.mxu0 %v3375_v36 }
  0x77   :  { %1535 = vmatprep.mubr.bf16.mxu1 %v3377_v37 }
  0x78   :  { %3117 = vmatpush3.bf16.msra.mxu0 %v3373_v34 }
  0x79   :  { %3157 = vmatpush3.bf16.msra.mxu1 %v3374_v35  ;;  %3118 = vmatprep.subr.bf16.mxu0 %v3381_v40 }
  0x7a   :  { %3158 = vmatprep.subr.bf16.mxu1 %v3382_v41 }
  0x7b   :  { %1471 = vmatmul.mubr.bf16.gmra.mrb[44].mxu0 %v3379_v38 }
  0x7c   :  { %1536 = vmatmul.mubr.bf16.gmra.mrb[44].mxu1 %v3380_v39  ;;  %3119 = vmatpush3.bf16.msra.mxu0 %v3383_v42 }
  0x7d   :  { %3159 = vmatpush3.bf16.msra.mxu1 %v3384_v43  ;;  %3120 = vmatprep.subr.bf16.mxu0 %v3385_v44 }
  0x7e   :  { %3160 = vmatprep.subr.bf16.mxu1 %v3386_v45  ;;  %1848 = vmatprep.mubr.bf16.mxu0 %v3391_v49 }
  0x7f   :  { %1913 = vmatprep.mubr.bf16.mxu1 %v3394_v51 }
  0x80   :  { %3121 = vmatpush3.bf16.msra.mxu0 %v3387_v46 }
  0x81   :  { %3161 = vmatpush3.bf16.msra.mxu1 %v3388_v47 }
  0x83   :  { %1849 = vmatmul.mubr.bf16.vlgmr.msra.gmra.mrb[48].mxu0 %v3389_v48 }
  0x84   :  { %1914 = vmatmul.mubr.bf16.vlgmr.msra.gmra.mrb[48].mxu1 %v3392_v50  ;;  %1856 = vmatprep.mubr.bf16.mxu0 %v3395_v52 }
  0x85   :  { %1921 = vmatprep.mubr.bf16.mxu1 %v3397_v53 }
  0x8b   :  { %1857 = vmatmul.mubr.bf16.gmra.mrb[52].mxu0 %v3399_v54 }
  0x8c   :  { %1922 = vmatmul.mubr.bf16.gmra.mrb[52].mxu1 %v3400_v55  ;;  %1864 = vmatprep.mubr.bf16.mxu0 %v3401_v56  ;;  %v3429_v56 = vmov 0  }
  0x8d   :  { %1929 = vmatprep.mubr.bf16.mxu1 %v3403_v57  ;;  %3188 = vset.pattern.permute.xlu1 %v3429_v56 }
  0x8e   :  { %3187 = vset.pattern.permute.xlu0 %v3429_v56 }
  0x93   :  { %1865 = vmatmul.mubr.bf16.gmra.mrb[56].mxu0 %v3405_v58 }
  0x94   :  { %1930 = vmatmul.mubr.bf16.gmra.mrb[56].mxu1 %v3406_v59  ;;  %1872 = vmatprep.mubr.bf16.mxu0 %v3407_v60 }
  0x95   :  { %1937 = vmatprep.mubr.bf16.mxu1 %v3409_v61 }
  0x9b   :  { %1873 = vmatmul.mubr.bf16.gmra.mrb[60].mxu0 %v3411_v62 }
  0x9c   :  { %1938 = vmatmul.mubr.bf16.gmra.mrb[60].mxu1 %v3412_v63 }
  0xf6   :  { %v2882_v0 = vpop.f32.mrb[0].mxu0 }
  0xf7   :  { %v2922_v1 = vpop.f32.mrb[0].mxu1  ;;  %v2883_v2 = vpop.f32.mrb[1].mxu0 }
  0xf8   :  { %v2884_v3 = vadd.f32 %v2883_v2, %v2882_v0  ;;  %v2923_v4 = vpop.f32.mrb[1].mxu1  ;;  %v2885_v5 = vpop.f32.mrb[2].mxu0 }
  0xf9   :  { %v2924_v6 = vadd.f32 %v2923_v4, %v2922_v1  ;;  %v2925_v7 = vpop.f32.mrb[2].mxu1  ;;  %v2886_v8 = vpop.f32.mrb[3].mxu0 }
  0xfa   :  { %v2887_v9 = vadd.f32 %v2886_v8, %v2885_v5  ;;  %v2926_v10 = vpop.f32.mrb[3].mxu1 }
  0xfb   :  { %v4031_v11 = vadd.f32 %v2924_v6, %v2884_v3  ;;  %v2927_v12 = vadd.f32 %v2926_v10, %v2925_v7 }
  0xfd   :  { %v4033_v13 = vadd.f32 %v2927_v12, %v2887_v9 }
  0xfe   :  { %v2888_v14 = vpop.f32.mrb[4].mxu0 }
  0xff   :  { %v2928_v15 = vpop.f32.mrb[4].mxu1  ;;  %v2889_v16 = vpop.f32.mrb[5].mxu0 }
 0x100   :  { %v2890_v17 = vadd.f32 %v2889_v16, %v2888_v14  ;;  %v2929_v18 = vpop.f32.mrb[5].mxu1  ;;  %v2891_v19 = vpop.f32.mrb[6].mxu0 }
 0x101   :  { %v2930_v20 = vadd.f32 %v2929_v18, %v2928_v15  ;;  %v2931_v21 = vpop.f32.mrb[6].mxu1  ;;  %v2892_v22 = vpop.f32.mrb[7].mxu0 }
 0x102   :  { %v2893_v23 = vadd.f32 %v2892_v22, %v2891_v19  ;;  %v2932_v24 = vpop.f32.mrb[7].mxu1 }
 0x103   :  { %v4035_v25 = vadd.f32 %v2930_v20, %v2890_v17  ;;  %v2933_v26 = vadd.f32 %v2932_v24, %v2931_v21 }
 0x105   :  { %v4037_v27 = vadd.f32 %v2933_v26, %v2893_v23 }
 0x106   :  { %v2894_v28 = vpop.f32.mrb[8].mxu0 }
 0x107   :  { %v2934_v29 = vpop.f32.mrb[8].mxu1  ;;  %v2895_v30 = vpop.f32.mrb[9].mxu0 }
 0x108   :  { %v2896_v31 = vadd.f32 %v2895_v30, %v2894_v28  ;;  %v2935_v32 = vpop.f32.mrb[9].mxu1  ;;  %v2897_v33 = vpop.f32.mrb[10].mxu0 }
 0x109   :  { %v2936_v34 = vadd.f32 %v2935_v32, %v2934_v29  ;;  %v2937_v35 = vpop.f32.mrb[10].mxu1  ;;  %v2898_v36 = vpop.f32.mrb[11].mxu0 }
 0x10a   :  { %v2899_v37 = vadd.f32 %v2898_v36, %v2897_v33  ;;  %v2938_v38 = vpop.f32.mrb[11].mxu1 }
 0x10b   :  { %v4039_v39 = vadd.f32 %v2936_v34, %v2896_v31  ;;  %v2939_v40 = vadd.f32 %v2938_v38, %v2937_v35 }
 0x10d   :  { %v4041_v41 = vadd.f32 %v2939_v40, %v2899_v37 }
 0x10e   :  { %v2900_v42 = vpop.f32.mrb[12].mxu0 }
 0x10f   :  { %v2940_v43 = vpop.f32.mrb[12].mxu1  ;;  %v2901_v44 = vpop.f32.mrb[13].mxu0 }
 0x110   :  { %v2941_v45 = vpop.f32.mrb[13].mxu1  ;;  %v2902_v46 = vadd.f32 %v2901_v44, %v2900_v42  ;;  %v2903_v48 = vpop.f32.mrb[14].mxu0 }
 0x111   :  { %v2942_v47 = vadd.f32 %v2941_v45, %v2940_v43  ;;  %v2943_v49 = vpop.f32.mrb[14].mxu1  ;;  %v2904_v50 = vpop.f32.mrb[15].mxu0 }
 0x112   :  { %v2944_v51 = vpop.f32.mrb[15].mxu1  ;;  %v2905_v53 = vadd.f32 %v2904_v50, %v2903_v48 }
 0x113   :  { %v4043_v52 = vadd.f32 %v2942_v47, %v2902_v46  ;;  %v2945_v54 = vadd.f32 %v2944_v51, %v2943_v49 }
 0x115   :  { %v4045_v55 = vadd.f32 %v2945_v54, %v2905_v53 }
 0x116   :  { %v2962_v57 = vpop.f32.mrb[16].mxu0 }
 0x117   :  { %v2963_v58 = vpop.f32.mrb[17].mxu0  ;;  %v3002_v59 = vpop.f32.mrb[16].mxu1 }
 0x118   :  { %v2964_v60 = vadd.f32 %v2963_v58, %v2962_v57  ;;  %v2965_v61 = vpop.f32.mrb[18].mxu0  ;;  %v3003_v62 = vpop.f32.mrb[17].mxu1 }
 0x119   :  { %v2966_v63 = vpop.f32.mrb[19].mxu0  ;;  %v3004_v0 = vadd.f32 %v3003_v62, %v3002_v59  ;;  %v3005_v1 = vpop.f32.mrb[18].mxu1 }
 0x11a   :  { %v2967_v2 = vadd.f32 %v2966_v63, %v2965_v61  ;;  %v3006_v3 = vpop.f32.mrb[19].mxu1 }
 0x11b   :  { %v4047_v4 = vadd.f32 %v3004_v0, %v2964_v60  ;;  %v3007_v5 = vadd.f32 %v3006_v3, %v3005_v1 }
 0x11d   :  { %v4049_v6 = vadd.f32 %v3007_v5, %v2967_v2 }
 0x11e   :  { %v2968_v7 = vpop.f32.mrb[20].mxu0 }
 0x11f   :  { %v3008_v8 = vpop.f32.mrb[20].mxu1  ;;  %v2969_v9 = vpop.f32.mrb[21].mxu0 }
 0x120   :  { %v2970_v10 = vadd.f32 %v2969_v9, %v2968_v7  ;;  %v3009_v12 = vpop.f32.mrb[21].mxu1  ;;  %v2971_v14 = vpop.f32.mrb[22].mxu0 }
 0x121   :  { %v3010_v15 = vadd.f32 %v3009_v12, %v3008_v8  ;;  %v3011_v16 = vpop.f32.mrb[22].mxu1  ;;  %v2972_v17 = vpop.f32.mrb[23].mxu0 }
 0x122   :  { %v2973_v18 = vadd.f32 %v2972_v17, %v2971_v14  ;;  %v3012_v19 = vpop.f32.mrb[23].mxu1 }
 0x123   :  { %v4051_v20 = vadd.f32 %v3010_v15, %v2970_v10  ;;  %v3013_v21 = vadd.f32 %v3012_v19, %v3011_v16 }
 0x125   :  { %v4053_v22 = vadd.f32 %v3013_v21, %v2973_v18 }
 0x126   :  { %v2974_v23 = vpop.f32.mrb[24].mxu0 }
 0x127   :  { %v3014_v24 = vpop.f32.mrb[24].mxu1  ;;  %v2975_v26 = vpop.f32.mrb[25].mxu0 }
 0x128   :  { %v3015_v28 = vpop.f32.mrb[25].mxu1  ;;  %v2976_v29 = vadd.f32 %v2975_v26, %v2974_v23  ;;  %v2977_v31 = vpop.f32.mrb[26].mxu0 }
 0x129   :  { %v3016_v30 = vadd.f32 %v3015_v28, %v3014_v24  ;;  %v3017_v32 = vpop.f32.mrb[26].mxu1  ;;  %v2978_v33 = vpop.f32.mrb[27].mxu0 }
 0x12a   :  { %v3018_v34 = vpop.f32.mrb[27].mxu1  ;;  %v2979_v36 = vadd.f32 %v2978_v33, %v2977_v31 }
 0x12b   :  { %v4055_v35 = vadd.f32 %v3016_v30, %v2976_v29  ;;  %v3019_v37 = vadd.f32 %v3018_v34, %v3017_v32 }
 0x12d   :  { %v4057_v38 = vadd.f32 %v3019_v37, %v2979_v36 }
 0x12e   :  { %v2980_v40 = vpop.f32.mrb[28].mxu0 }
 0x12f   :  { %v3020_v42 = vpop.f32.mrb[28].mxu1  ;;  %v2981_v43 = vpop.f32.mrb[29].mxu0 }
 0x130   :  { %v2982_v44 = vadd.f32 %v2981_v43, %v2980_v40  ;;  %v3021_v45 = vpop.f32.mrb[29].mxu1  ;;  %v2983_v46 = vpop.f32.mrb[30].mxu0 }
 0x131   :  { %v3022_v47 = vadd.f32 %v3021_v45, %v3020_v42  ;;  %v3023_v48 = vpop.f32.mrb[30].mxu1  ;;  %v2984_v49 = vpop.f32.mrb[31].mxu0 }
 0x132   :  { %v2985_v50 = vadd.f32 %v2984_v49, %v2983_v46  ;;  %v3024_v51 = vpop.f32.mrb[31].mxu1 }
 0x133   :  { %v4059_v53 = vadd.f32 %v3022_v47, %v2982_v44  ;;  %v3025_v54 = vadd.f32 %v3024_v51, %v3023_v48 }
 0x135   :  { %v4061_v56 = vadd.f32 %v3025_v54, %v2985_v50 }
 0x136   :  { %v3042_v57 = vpop.f32.mrb[32].mxu0 }
 0x137   :  { %v3082_v58 = vpop.f32.mrb[32].mxu1  ;;  %v3043_v59 = vpop.f32.mrb[33].mxu0 }
 0x138   :  { %v3044_v60 = vadd.f32 %v3043_v59, %v3042_v57  ;;  %v3083_v61 = vpop.f32.mrb[33].mxu1  ;;  %v3045_v62 = vpop.f32.mrb[34].mxu0 }
 0x139   :  { %v3084_v63 = vadd.f32 %v3083_v61, %v3082_v58  ;;  %v3085_v0 = vpop.f32.mrb[34].mxu1  ;;  %v3046_v1 = vpop.f32.mrb[35].mxu0 }
 0x13a   :  { %v3047_v2 = vadd.f32 %v3046_v1, %v3045_v62  ;;  %v3086_v3 = vpop.f32.mrb[35].mxu1 }
 0x13b   :  { %v4063_v5 = vadd.f32 %v3084_v63, %v3044_v60  ;;  %v3087_v7 = vadd.f32 %v3086_v3, %v3085_v0 }
 0x13d   :  { %v4065_v8 = vadd.f32 %v3087_v7, %v3047_v2  ;;  %v1948_v2 = vsel %vm1946_vm0, %v4047_v4, 0.0 }
 0x13e   :  { %v3048_v9 = vpop.f32.mrb[36].mxu0 }
 0x13f   :  { %v3088_v10 = vpop.f32.mrb[36].mxu1  ;;  %v3049_v12 = vpop.f32.mrb[37].mxu0 }
 0x140   :  { %v3089_v14 = vpop.f32.mrb[37].mxu1  ;;  %v3050_v15 = vadd.f32 %v3049_v12, %v3048_v9  ;;  %v3051_v17 = vpop.f32.mrb[38].mxu0 }
 0x141   :  { %v3090_v16 = vadd.f32 %v3089_v14, %v3088_v10  ;;  %v3091_v18 = vpop.f32.mrb[38].mxu1  ;;  %v3052_v19 = vpop.f32.mrb[39].mxu0  ;;  %v1947_v14 = vsel %vm1946_vm0, %v4031_v11, 0.0 }
 0x142   :  { %v3092_v21 = vpop.f32.mrb[39].mxu1  ;;  %v3053_v24 = vadd.f32 %v3052_v19, %v3051_v17 }
 0x143   :  { %v4067_v23 = vadd.f32 %v3090_v16, %v3050_v15  ;;  %v3093_v26 = vadd.f32 %v3092_v21, %v3091_v18  ;;  %v1955_v15 = vsel %vm1946_vm0, %v4049_v6, 0.0  ;;  %v1950_v16 = vsel %vm1946_vm0, %v4063_v5, 0.0 }
 0x144   :  { %v1949_v21 = vadd.f32 %v1948_v2, %v1947_v14  ;;  %v1968_v14 = vsel %vm1946_vm0, %v4037_v27, 0.0 }
 0x145   :  { %v4069_v28 = vadd.f32 %v3093_v26, %v3053_v24 }
 0x146   :  { %v3054_v29 = vpop.f32.mrb[40].mxu0 }
 0x147   :  { %v3094_v30 = vpop.f32.mrb[40].mxu1  ;;  %v3055_v31 = vpop.f32.mrb[41].mxu0 }
 0x148   :  { %v3056_v32 = vadd.f32 %v3055_v31, %v3054_v29  ;;  %v3095_v33 = vpop.f32.mrb[41].mxu1  ;;  %v3057_v34 = vpop.f32.mrb[42].mxu0  ;;  %v1954_v29 = vsel %vm1946_vm0, %v4033_v13, 0.0 }
 0x149   :  { %v3096_v36 = vadd.f32 %v3095_v33, %v3094_v30  ;;  %v3097_v37 = vpop.f32.mrb[42].mxu1  ;;  %v3058_v40 = vpop.f32.mrb[43].mxu0  ;;  %v1957_v30 = vsel %vm1946_vm0, %v4065_v8, 0.0  ;;  %v1956_v33 = vadd.f32 %v1955_v15, %v1954_v29  ;;  %v1971_v15 = vsel %vm1946_vm0, %v4069_v28, 0.0 }
 0x14a   :  { %v3059_v42 = vadd.f32 %v3058_v40, %v3057_v34  ;;  %v3098_v43 = vpop.f32.mrb[43].mxu1  ;;  %v1951_v34 = vadd.f32 %v1950_v16, %v1949_v21 }
 0x14b   :  { %v4071_v44 = vadd.f32 %v3096_v36, %v3056_v32  ;;  %v3099_v45 = vadd.f32 %v3098_v43, %v3097_v37  ;;  %v1958_v43 = vadd.f32 %v1957_v30, %v1956_v33  ;;  %v1976_v33 = vsel %vm1946_vm0, %v4055_v35, 0.0 }
 0x14d   :  { %v4073_v46 = vadd.f32 %v3099_v45, %v3059_v42  ;;  %v1962_v45 = vsel %vm1946_vm0, %v4051_v20, 0.0 }
 0x14e   :  { %v3060_v47 = vpop.f32.mrb[44].mxu0 }
 0x14f   :  { %v3100_v48 = vpop.f32.mrb[44].mxu1  ;;  %v3061_v49 = vpop.f32.mrb[45].mxu0 }
 0x150   :  { %v3062_v50 = vadd.f32 %v3061_v49, %v3060_v47  ;;  %v3101_v51 = vpop.f32.mrb[45].mxu1  ;;  %v3063_v54 = vpop.f32.mrb[46].mxu0 }
 0x151   :  { %v3102_v57 = vadd.f32 %v3101_v51, %v3100_v48  ;;  %v3103_v58 = vpop.f32.mrb[46].mxu1  ;;  %v3064_v59 = vpop.f32.mrb[47].mxu0 }
 0x152   :  { %v3065_v60 = vadd.f32 %v3064_v59, %v3063_v54  ;;  %v3104_v61 = vpop.f32.mrb[47].mxu1  ;;  %v1961_v59 = vsel %vm1946_vm0, %v4035_v25, 0.0 }
 0x153   :  { %v4075_v62 = vadd.f32 %v3102_v57, %v3062_v50  ;;  %v3105_v63 = vadd.f32 %v3104_v61, %v3103_v58  ;;  %v1964_v61 = vsel %vm1946_vm0, %v4067_v23, 0.0 }
 0x155   :  { %v4077_v0 = vadd.f32 %v3105_v63, %v3065_v60  ;;  %v1969_v60 = vsel %vm1946_vm0, %v4053_v22, 0.0 }
 0x156   :  { %v3122_v1 = vpop.f32.mrb[48].mxu0 }
 0x157   :  { %v3162_v3 = vpop.f32.mrb[48].mxu1  ;;  %v3123_v7 = vpop.f32.mrb[49].mxu0 }
 0x158   :  { %v3124_v9 = vadd.f32 %v3123_v7, %v3122_v1  ;;  %v3163_v10 = vpop.f32.mrb[49].mxu1  ;;  %v3125_v12 = vpop.f32.mrb[50].mxu0 }
 0x159   :  { %v3164_v17 = vadd.f32 %v3163_v10, %v3162_v3  ;;  %v3165_v18 = vpop.f32.mrb[50].mxu1  ;;  %v3126_v19 = vpop.f32.mrb[51].mxu0  ;;  %v1963_v3 = vadd.f32 %v1962_v45, %v1961_v59 }
 0x15a   :  { %v3127_v24 = vadd.f32 %v3126_v19, %v3125_v12  ;;  %v3166_v26 = vpop.f32.mrb[51].mxu1 }
 0x15b   :  { %v4091_v31 = vadd.f32 %v3164_v17, %v3124_v9  ;;  %v3167_v32 = vadd.f32 %v3166_v26, %v3165_v18  ;;  %v1970_v18 = vadd.f32 %v1969_v60, %v1968_v14  ;;  %v1965_v19 = vadd.f32 %v1964_v61, %v1963_v3 }
 0x15c   :  { %v1985_v3 = vsel %vm1946_vm0, %v4073_v46, 0.0 }
 0x15d   :  { %v4093_v36 = vadd.f32 %v3167_v32, %v3127_v24  ;;  %v1952_v37 = vsel %vm1946_vm0, %v4091_v31, 0.0  ;;  %v1972_v32 = vadd.f32 %v1971_v15, %v1970_v18 }
 0x15e   :  { %v3128_v40 = vpop.f32.mrb[52].mxu0  ;;  %v1953_v42 = vadd.f32 %v1952_v37, %v1951_v34 }
 0x15f   :  { %v3168_v47 = vpop.f32.mrb[52].mxu1  ;;  %v3129_v48 = vpop.f32.mrb[53].mxu0  ;;  %v1959_v49 = vsel %vm1946_vm0, %v4093_v36, 0.0 }
 0x160   :  { %v3130_v50 = vadd.f32 %v3129_v48, %v3128_v40  ;;  %v3169_v51 = vpop.f32.mrb[53].mxu1  ;;  %v3131_v54 = vpop.f32.mrb[54].mxu0  ;;  %v2004_v57 = vmul.f32 0.25, %v1953_v42  ;;  %v1960_v58 = vadd.f32 %v1959_v49, %v1958_v43  ;;  %v1975_v49 = vsel %vm1946_vm0, %v4039_v39, 0.0 }
 0x161   :  { %v3170_v63 = vadd.f32 %v3169_v51, %v3168_v47  ;;  %v3171_v1 = vpop.f32.mrb[54].mxu1  ;;  %v3132_v2 = vpop.f32.mrb[55].mxu0  ;;  %v1978_v51 = vsel %vm1946_vm0, %v4071_v44, 0.0  ;;  %v1977_v59 = vadd.f32 %v1976_v33, %v1975_v49 }
 0x162   :  { %v3133_v7 = vadd.f32 %v3132_v2, %v3131_v54  ;;  %v3172_v9 = vpop.f32.mrb[55].mxu1  ;;  %v2012_v10 = vsel %vm1946_vm0, %v2004_v57, 0.0  ;;  %v2005_v12 = vmul.f32 0.25, %v1960_v58  ;;  %v1982_v2 = vsel %vm1946_vm0, %v4041_v41, 0.0 }
 0x163   :  { %v4112_v16 = vadd.f32 %v3170_v63, %v3130_v50  ;;  %v3173_v17 = vadd.f32 %v3172_v9, %v3171_v1  ;;  %2013 = vadd.xlane.f32.xlu0 %v2012_v10  ;;  %v1983_v50 = vsel %vm1946_vm0, %v4057_v38, 0.0 }
 0x164   :  { %v2015_v29 = vsel %vm1946_vm0, %v2005_v12, 0.0  ;;  %v1984_v10 = vadd.f32 %v1983_v50, %v1982_v2  ;;  %v1979_v12 = vadd.f32 %v1978_v51, %v1977_v59 }
 0x165   :  { %v4114_v21 = vadd.f32 %v3173_v17, %v3133_v7  ;;  %v1966_v24 = vsel %vm1946_vm0, %v4112_v16, 0.0 }
 0x166   :  { %v3134_v26 = vpop.f32.mrb[56].mxu0  ;;  %v1967_v30 = vadd.f32 %v1966_v24, %v1965_v19  ;;  %v1986_v24 = vadd.f32 %v1985_v3, %v1984_v10 }
 0x167   :  { %v3174_v34 = vpop.f32.mrb[56].mxu1  ;;  %2016 = vadd.xlane.f32.xlu0 %v2015_v29  ;;  %v3135_v37 = vpop.f32.mrb[57].mxu0  ;;  %v1973_v40 = vsel %vm1946_vm0, %v4114_v21, 0.0 }
 0x168   :  { %v3136_v42 = vadd.f32 %v3135_v37, %v3134_v26  ;;  %v3175_v43 = vpop.f32.mrb[57].mxu1  ;;  %v3137_v45 = vpop.f32.mrb[58].mxu0  ;;  %v2006_v47 = vmul.f32 0.25, %v1967_v30  ;;  %v1974_v48 = vadd.f32 %v1973_v40, %v1972_v32  ;;  %v1990_v26 = vsel %vm1946_vm0, %v4059_v53, 0.0 }
 0x169   :  { %v3176_v54 = vadd.f32 %v3175_v43, %v3174_v34  ;;  %v3177_v57 = vpop.f32.mrb[58].mxu1  ;;  %v3138_v58 = vpop.f32.mrb[59].mxu0  ;;  %v1989_v43 = vsel %vm1946_vm0, %v4043_v52, 0.0 }
 0x16a   :  { %v3139_v60 = vadd.f32 %v3138_v58, %v3137_v45  ;;  %v3178_v61 = vpop.f32.mrb[59].mxu1  ;;  %v2018_v63 = vsel %vm1946_vm0, %v2006_v47, 0.0  ;;  %v2007_v1 = vmul.f32 0.25, %v1974_v48  ;;  %v1992_v45 = vsel %vm1946_vm0, %v4075_v62, 0.0 }
 0x16b   :  { %v4134_v7 = vadd.f32 %v3176_v54, %v3136_v42  ;;  %v3179_v9 = vadd.f32 %v3178_v61, %v3177_v57  ;;  %2019 = vadd.xlane.f32.xlu1 %v2018_v63  ;;  %v1991_v50 = vadd.f32 %v1990_v26, %v1989_v43  ;;  %v2258_v26 = vld [vmem:[%s4643_s2 + $0x28] sm:$0xff] }
 0x16c   :  { %v2021_v18 = vsel %vm1946_vm0, %v2007_v1, 0.0 }
 0x16d   :  { %v4136_v14 = vadd.f32 %v3179_v9, %v3139_v60  ;;  %v1980_v15 = vsel %vm1946_vm0, %v4134_v7, 0.0  ;;  %v1993_v63 = vadd.f32 %v1992_v45, %v1991_v50  ;;  %v2333_v50 = vld [vmem:[%s4644_s3] sm:$0xff] }
 0x16e   :  { %v3140_v17 = vpop.f32.mrb[60].mxu0  ;;  %v1981_v19 = vadd.f32 %v1980_v15, %v1979_v12  ;;  %v2254_v12 = vld [vmem:[%s4643_s2 + $0x8] sm:$0xff]  ;;  %v2255_v15 = vld [vmem:[%s4643_s2 + $0x10] sm:$0xff] }
 0x16f   :  { %v3180_v29 = vpop.f32.mrb[60].mxu1  ;;  %2022 = vadd.xlane.f32.xlu1 %v2021_v18  ;;  %v3141_v30 = vpop.f32.mrb[61].mxu0  ;;  %v1987_v32 = vsel %vm1946_vm0, %v4136_v14, 0.0  ;;  %v2253_v18 = vld [vmem:[%s4643_s2] sm:$0xff] }
 0x170   :  { %v3142_v33 = vadd.f32 %v3141_v30, %v3140_v17  ;;  %v3181_v34 = vpop.f32.mrb[61].mxu1  ;;  %v3143_v37 = vpop.f32.mrb[62].mxu0  ;;  %v2008_v40 = vmul.f32 0.25, %v1981_v19  ;;  %v1988_v42 = vadd.f32 %v1987_v32, %v1986_v24  ;;  %v2256_v17 = vld [vmem:[%s4643_s2 + $0x18] sm:$0xff]  ;;  %v2257_v19 = vld [vmem:[%s4643_s2 + $0x20] sm:$0xff]  ;;  %v2334_v24 = vld [vmem:[%s4644_s3 + $0x8] sm:$0xff] }
 0x171   :  { %v3182_v47 = vadd.f32 %v3181_v34, %v3180_v29  ;;  %v3183_v48 = vpop.f32.mrb[62].mxu1  ;;  %v3144_v49 = vpop.f32.mrb[63].mxu0  ;;  %v2336_v29 = vld [vmem:[%s4644_s3 + $0x18] sm:$0xff]  ;;  %v2338_v30 = vld [vmem:[%s4644_s3 + $0x28] sm:$0xff]  ;;  %v1997_v32 = vsel %vm1946_vm0, %v4061_v56, 0.0  ;;  %v1999_v34 = vsel %vm1946_vm0, %v4077_v0, 0.0 }
 0x172   :  { %v3145_v51 = vadd.f32 %v3144_v49, %v3143_v37  ;;  %v3184_v54 = vpop.f32.mrb[63].mxu1  ;;  %v2024_v57 = vsel %vm1946_vm0, %v2008_v40, 0.0  ;;  %v2009_v58 = vmul.f32 0.25, %v1988_v42  ;;  %v2260_v49 = vld [vmem:[%s4643_s2 + $0x38] sm:$0xff] }
 0x173   :  { %v4150_v59 = vadd.f32 %v3182_v47, %v3142_v33  ;;  %v3185_v60 = vadd.f32 %v3184_v54, %v3183_v48  ;;  %2025 = vadd.xlane.f32.xlu0 %v2024_v57  ;;  %v1996_v33 = vsel %vm1946_vm0, %v4045_v55, 0.0  ;;  %v2259_v48 = vld [vmem:[%s4643_s2 + $0x30] sm:$0xff]  ;;  %v2337_v54 = vld [vmem:[%s4644_s3 + $0x20] sm:$0xff] }
 0x174   :  { %v2027_v61 = vsel %vm1946_vm0, %v2009_v58, 0.0  ;;  %v1998_v37 = vadd.f32 %v1997_v32, %v1996_v33 }
 0x175   :  { %v4153_v1 = vadd.f32 %v3185_v60, %v3145_v51  ;;  %2028 = vadd.xlane.f32.xlu1 %v2027_v61  ;;  %v1994_v2 = vsel %vm1946_vm0, %v4150_v59, 0.0  ;;  %v2335_v51 = vld [vmem:[%s4644_s3 + $0x10] sm:$0xff] }
 0x176   :  { %v1995_v3 = vadd.f32 %v1994_v2, %v1993_v63  ;;  %v2000_v42 = vadd.f32 %v1999_v34, %v1998_v37 }
 0x177   :  { %v2001_v40 = vsel %vm1946_vm0, %v4153_v1, 0.0 }
 0x178   :  { %v2010_v9 = vmul.f32 0.25, %v1995_v3  ;;  %v2002_v43 = vadd.f32 %v2001_v40, %v2000_v42 }
 0x17a   :  { %v2030_v10 = vsel %vm1946_vm0, %v2010_v9, 0.0  ;;  %v2011_v45 = vmul.f32 0.25, %v2002_v43 }
 0x17b   :  { %2031 = vadd.xlane.f32.xlu0 %v2030_v10 }
 0x17c   :  { %v2033_v47 = vsel %vm1946_vm0, %v2011_v45, 0.0 }
 0x186   :  { %2268 = vperm.xlu1 %3188, %v2254_v12  }
 0x18a   :  { %2273 = vperm.xlu1 %3188, %v2255_v15  }
 0x18e   :  { %2278 = vperm.xlu1 %3188, %v2256_v17  }
 0x191   :  { %2263 = vperm.xlu0 %3187, %v2253_v18  }
 0x192   :  { %2283 = vperm.xlu1 %3188, %v2257_v19  }
 0x195   :  { %2348 = vperm.xlu0 %3187, %v2334_v24  }
 0x196   :  { %2288 = vperm.xlu1 %3188, %v2258_v26  }
 0x199   :  { %2358 = vperm.xlu0 %3187, %v2336_v29  }
 0x19d   :  { %2368 = vperm.xlu0 %3187, %v2338_v30  }
 0x1ba   :  { %2034 = vadd.xlane.f32.xlu1 %v2033_v47 }
 0x1cb   :  { %2293 = vperm.xlu1 %3188, %v2259_v48  }
 0x1cf   :  { %2298 = vperm.xlu1 %3188, %v2260_v49  }
 0x1d3   :  { %2343 = vperm.xlu1 %3188, %v2333_v50  }
 0x1d7   :  { %2353 = vperm.xlu1 %3188, %v2335_v51  }
 0x1db   :  { %2363 = vperm.xlu1 %3188, %v2337_v54  }
 0x1f0   :  { %v2014_v57 = vpop.xlane.xlu0 %2013 }
 0x1f1   :  { %v2037_v58 = vmul.f32 0.010204081, %v2014_v57 }
 0x1f3   :  { %v4210_v60 = vsub.f32 %v4031_v11, %v2037_v58  ;;  %v4213_v61 = vsub.f32 %v4047_v4, %v2037_v58  ;;  %v4216_v63 = vsub.f32 %v4063_v5, %v2037_v58  ;;  %v4219_v3 = vsub.f32 %v4091_v31, %v2037_v58 }
 0x1f4   :  { %v2017_v2 = vpop.xlane.xlu0 %2016 }
 0x1f5   :  { %v2038_v9 = vmul.f32 0.010204081, %v2017_v2  ;;  %v2077_v10 = vmul.f32 %v4210_v60, %v4210_v60  ;;  %v2085_v12 = vmul.f32 %v4213_v61, %v4213_v61  ;;  %v2093_v11 = vmul.f32 %v4216_v63, %v4216_v63 }
 0x1f6   :  { %v2101_v18 = vmul.f32 %v4219_v3, %v4219_v3 }
 0x1f7   :  { %v4228_v4 = vsub.f32 %v4033_v13, %v2038_v9  ;;  %v4231_v5 = vsub.f32 %v4049_v6, %v2038_v9  ;;  %v4234_v15 = vsub.f32 %v4065_v8, %v2038_v9  ;;  %v2109_v31 = vsel %vm1946_vm0, %v2077_v10, 0.0 }
 0x1f8   :  { %v2020_v17 = vpop.xlane.xlu1 %2019  ;;  %v2110_v19 = vsel %vm1946_vm0, %v2085_v12, 0.0  ;;  %v4241_v24 = vsub.f32 %v4093_v36, %v2038_v9  ;;  %v2112_v29 = vsel %vm1946_vm0, %v2093_v11, 0.0  ;;  %v2114_v42 = vsel %vm1946_vm0, %v2101_v18, 0.0 }
 0x1f9   :  { %v2039_v26 = vmul.f32 0.010204081, %v2020_v17  ;;  %v2111_v13 = vadd.f32 %v2110_v19, %v2109_v31  ;;  %v2078_v6 = vmul.f32 %v4228_v4, %v4228_v4  ;;  %v2086_v8 = vmul.f32 %v4231_v5, %v4231_v5 }
 0x1fa   :  { %v2094_v30 = vmul.f32 %v4234_v15, %v4234_v15  ;;  %v2102_v32 = vmul.f32 %v4241_v24, %v4241_v24 }
 0x1fb   :  { %v4253_v33 = vsub.f32 %v4035_v25, %v2039_v26  ;;  %v4256_v36 = vsub.f32 %v4051_v20, %v2039_v26  ;;  %v4259_v34 = vsub.f32 %v4067_v23, %v2039_v26  ;;  %v2113_v37 = vadd.f32 %v2112_v29, %v2111_v13 }
 0x1fc   :  { %v2023_v40 = vpop.xlane.xlu1 %2022  ;;  %v2116_v43 = vsel %vm1946_vm0, %v2078_v6, 0.0  ;;  %v2117_v45 = vsel %vm1946_vm0, %v2086_v8, 0.0  ;;  %v4265_v25 = vsub.f32 %v4112_v16, %v2039_v26  ;;  %v2119_v20 = vsel %vm1946_vm0, %v2094_v30, 0.0 }
 0x1fd   :  { %v2040_v47 = vmul.f32 0.010204081, %v2023_v40  ;;  %v2115_v48 = vadd.f32 %v2114_v42, %v2113_v37  ;;  %v2118_v49 = vadd.f32 %v2117_v45, %v2116_v43  ;;  %v2079_v23 = vmul.f32 %v4253_v33, %v4253_v33 }
 0x1fe   :  { %v2087_v50 = vmul.f32 %v4256_v36, %v4256_v36  ;;  %v2095_v51 = vmul.f32 %v4259_v34, %v4259_v34  ;;  %v2121_v16 = vsel %vm1946_vm0, %v2102_v32, 0.0 }
 0x1ff   :  { %v4275_v54 = vsub.f32 %v4037_v27, %v2040_v47  ;;  %v4278_v57 = vsub.f32 %v4053_v22, %v2040_v47  ;;  %v2165_v58 = vmul.f32 0.25, %v2115_v48  ;;  %v4282_v2 = vsub.f32 %v4069_v28, %v2040_v47 }
 0x200   :  { %v2026_v9 = vpop.xlane.xlu0 %2025  ;;  %v2120_v10 = vadd.f32 %v2119_v20, %v2118_v49  ;;  %v2123_v12 = vsel %vm1946_vm0, %v2079_v23, 0.0  ;;  %v2124_v11 = vsel %vm1946_vm0, %v2087_v50, 0.0  ;;  %v2103_v27 = vmul.f32 %v4265_v25, %v4265_v25 }
 0x201   :  { %v2041_v31 = vmul.f32 0.010204081, %v2026_v9  ;;  %v2173_v17 = vsel %vm1946_vm0, %v2165_v58, 0.0  ;;  %v2125_v22 = vadd.f32 %v2124_v11, %v2123_v12  ;;  %v2126_v26 = vsel %vm1946_vm0, %v2095_v51, 0.0 }
 0x202   :  { %2174 = vadd.xlane.f32.xlu0 %v2173_v17  ;;  %v2029_v18 = vpop.xlane.xlu1 %2028  ;;  %v2122_v19 = vadd.f32 %v2121_v16, %v2120_v10  ;;  %v4291_v28 = vsub.f32 %v4114_v21, %v2040_v47  ;;  %v2080_v13 = vmul.f32 %v4275_v54, %v4275_v54  ;;  %v2088_v40 = vmul.f32 %v4278_v57, %v4278_v57 }
 0x203   :  { %v4296_v6 = vsub.f32 %v4039_v39, %v2041_v31  ;;  %v4299_v8 = vsub.f32 %v4055_v35, %v2041_v31  ;;  %v4302_v29 = vsub.f32 %v4071_v44, %v2041_v31  ;;  %v2042_v30 = vmul.f32 0.010204081, %v2029_v18 }
 0x204   :  { %v2166_v32 = vmul.f32 0.25, %v2122_v19  ;;  %v2127_v37 = vadd.f32 %v2126_v26, %v2125_v22  ;;  %v2096_v21 = vmul.f32 %v4282_v2, %v4282_v2  ;;  %v2128_v35 = vsel %vm1946_vm0, %v2103_v27, 0.0 }
 0x205   :  { %v4309_v42 = vsub.f32 %v4041_v41, %v2042_v30  ;;  %v4312_v39 = vsub.f32 %v4057_v38, %v2042_v30  ;;  %v2104_v44 = vmul.f32 %v4291_v28, %v4291_v28  ;;  %v2130_v47 = vsel %vm1946_vm0, %v2080_v13, 0.0 }
 0x206   :  { %v2176_v43 = vsel %vm1946_vm0, %v2166_v32, 0.0  ;;  %v2129_v45 = vadd.f32 %v2128_v35, %v2127_v37  ;;  %v2131_v48 = vsel %vm1946_vm0, %v2088_v40, 0.0  ;;  %v4321_v49 = vsub.f32 %v4073_v46, %v2042_v30 }
 0x207   :  { %2177 = vadd.xlane.f32.xlu1 %v2176_v43  ;;  %v2132_v41 = vadd.f32 %v2131_v48, %v2130_v47  ;;  %v2133_v38 = vsel %vm1946_vm0, %v2096_v21, 0.0  ;;  %v4325_v20 = vsub.f32 %v4134_v7, %v2041_v31  ;;  %v2081_v51 = vmul.f32 %v4296_v6, %v4296_v6 }
 0x208   :  { %v2032_v23 = vpop.xlane.xlu0 %2031  ;;  %v2167_v50 = vmul.f32 0.25, %v2129_v45  ;;  %v2089_v58 = vmul.f32 %v4299_v8, %v4299_v8  ;;  %v2097_v16 = vmul.f32 %v4302_v29, %v4302_v29  ;;  %v2135_v10 = vsel %vm1946_vm0, %v2104_v44, 0.0 }
 0x209   :  { %v2043_v46 = vmul.f32 0.010204081, %v2032_v23  ;;  %v2134_v9 = vadd.f32 %v2133_v38, %v2132_v41  ;;  %v4335_v12 = vsub.f32 %v4136_v14, %v2042_v30  ;;  %v2105_v11 = vmul.f32 %v4325_v20, %v4325_v20 }
 0x20a   :  { %v2179_v7 = vsel %vm1946_vm0, %v2167_v50, 0.0  ;;  %v2137_v31 = vsel %vm1946_vm0, %v2081_v51, 0.0  ;;  %v2138_v17 = vsel %vm1946_vm0, %v2089_v58, 0.0  ;;  %v2140_v14 = vsel %vm1946_vm0, %v2097_v16, 0.0 }
 0x20b   :  { %v4343_v27 = vsub.f32 %v4043_v52, %v2043_v46  ;;  %v4346_v22 = vsub.f32 %v4059_v53, %v2043_v46  ;;  %2180 = vadd.xlane.f32.xlu0 %v2179_v7  ;;  %v2136_v18 = vadd.f32 %v2135_v10, %v2134_v9  ;;  %v4350_v19 = vsub.f32 %v4075_v62, %v2043_v46 }
 0x20c   :  { %v2139_v26 = vadd.f32 %v2138_v17, %v2137_v31  ;;  %v2082_v13 = vmul.f32 %v4309_v42, %v4309_v42  ;;  %v2090_v30 = vmul.f32 %v4312_v39, %v4312_v39  ;;  %v2098_v52 = vmul.f32 %v4321_v49, %v4321_v49 }
 0x20d   :  { %v2168_v32 = vmul.f32 0.25, %v2136_v18  ;;  %v2106_v53 = vmul.f32 %v4335_v12, %v4335_v12  ;;  %v4361_v37 = vsub.f32 %v4150_v59, %v2043_v46  ;;  %v2083_v35 = vmul.f32 %v4343_v27, %v4343_v27 }
 0x20e   :  { %v2141_v40 = vadd.f32 %v2140_v14, %v2139_v26  ;;  %v2144_v62 = vsel %vm1946_vm0, %v2082_v13, 0.0  ;;  %v2145_v21 = vsel %vm1946_vm0, %v2090_v30, 0.0  ;;  %v2142_v43 = vsel %vm1946_vm0, %v2105_v11, 0.0  ;;  %v4384_v30 = vpop.permute.xlu1 %2268 }
 0x20f   :  { %v2182_v44 = vsel %vm1946_vm0, %v2168_v32, 0.0  ;;  %v2146_v45 = vadd.f32 %v2145_v21, %v2144_v62  ;;  %v2147_v48 = vsel %vm1946_vm0, %v2098_v52, 0.0  ;;  %v2091_v59 = vmul.f32 %v4346_v22, %v4346_v22  ;;  %v2340_v32 = vld [vmem:[%s4644_s3 + $0x38] sm:$0xff] }
 0x210   :  { %2183 = vadd.xlane.f32.xlu1 %v2182_v44  ;;  %v2143_v47 = vadd.f32 %v2142_v43, %v2141_v40  ;;  %v2099_v41 = vmul.f32 %v4350_v19, %v4350_v19  ;;  %v2151_v23 = vsel %vm1946_vm0, %v2083_v35, 0.0  ;;  %v2149_v51 = vsel %vm1946_vm0, %v2106_v53, 0.0 }
 0x211   :  { %v2148_v38 = vadd.f32 %v2147_v48, %v2146_v45  ;;  %v2107_v58 = vmul.f32 %v4361_v37, %v4361_v37  ;;  %v2152_v16 = vsel %vm1946_vm0, %v2091_v59, 0.0 }
 0x212   :  { %v2169_v50 = vmul.f32 0.25, %v2143_v47  ;;  %v2153_v9 = vadd.f32 %v2152_v16, %v2151_v23  ;;  %v2154_v7 = vsel %vm1946_vm0, %v2099_v41, 0.0  ;;  %v4389_v52 = vpop.permute.xlu1 %2273 }
 0x213   :  { %v2150_v46 = vadd.f32 %v2149_v51, %v2148_v38  ;;  %v2156_v17 = vsel %vm1946_vm0, %v2107_v58, 0.0 }
 0x214   :  { %v2185_v10 = vsel %vm1946_vm0, %v2169_v50, 0.0  ;;  %v2155_v31 = vadd.f32 %v2154_v7, %v2153_v9  ;;  %v2264_v9 = vpop.permute.xlu0 %2263 }
 0x215   :  { %2186 = vadd.xlane.f32.xlu0 %v2185_v10  ;;  %v2170_v11 = vmul.f32 0.25, %v2150_v46  ;;  %v2339_v46 = vld [vmem:[%s4644_s3 + $0x30] sm:$0xff] }
 0x216   :  { %v2157_v14 = vadd.f32 %v2156_v17, %v2155_v31  ;;  %v4391_v53 = vpop.permute.xlu1 %2278 }
 0x217   :  { %v2188_v18 = vsel %vm1946_vm0, %v2170_v11, 0.0 }
 0x218   :  { %2189 = vadd.xlane.f32.xlu1 %v2188_v18  ;;  %v2171_v26 = vmul.f32 0.25, %v2157_v14  ;;  %v2349_v7 = vpop.permute.xlu0 %2348 }
 0x21a   :  { %v2191_v13 = vsel %vm1946_vm0, %v2171_v26, 0.0  ;;  %v4393_v40 = vpop.permute.xlu1 %2283 }
 0x21b   :  { %2192 = vadd.xlane.f32.xlu0 %v2191_v13 }
 0x21c   :  { %v4429_v31 = vpop.permute.xlu0 %2358 }
 0x21e   :  { %v4395_v62 = vpop.permute.xlu1 %2288 }
 0x220   :  { %v4431_v18 = vpop.permute.xlu0 %2368 }
 0x231   :  { %2378 = vperm.xlu0 %3187, %v2340_v32  }
 0x247   :  { %v2035_v21 = vpop.xlane.xlu1 %2034 }
 0x248   :  { %v2044_v35 = vmul.f32 0.010204081, %v2035_v21 }
 0x24a   :  { %v4398_v44 = vsub.f32 %v4045_v55, %v2044_v35  ;;  %v4401_v43 = vsub.f32 %v4061_v56, %v2044_v35  ;;  %v4404_v45 = vsub.f32 %v4077_v0, %v2044_v35  ;;  %v4407_v47 = vsub.f32 %v4153_v1, %v2044_v35 }
 0x24b   :  { %v4425_v10 = vpop.permute.xlu1 %2293 }
 0x24c   :  { %v2084_v48 = vmul.f32 %v4398_v44, %v4398_v44  ;;  %v2092_v59 = vmul.f32 %v4401_v43, %v4401_v43  ;;  %v2100_v41 = vmul.f32 %v4404_v45, %v4404_v45  ;;  %v2108_v55 = vmul.f32 %v4407_v47, %v4407_v47 }
 0x24e   :  { %v2158_v56 = vsel %vm1946_vm0, %v2084_v48, 0.0  ;;  %v2159_v0 = vsel %vm1946_vm0, %v2092_v59, 0.0  ;;  %v2161_v1 = vsel %vm1946_vm0, %v2100_v41, 0.0  ;;  %v2163_v50 = vsel %vm1946_vm0, %v2108_v55, 0.0 }
 0x24f   :  { %v2160_v38 = vadd.f32 %v2159_v0, %v2158_v56  ;;  %v4427_v11 = vpop.permute.xlu1 %2298 }
 0x251   :  { %v2162_v23 = vadd.f32 %v2161_v1, %v2160_v38 }
 0x253   :  { %v2164_v51 = vadd.f32 %v2163_v50, %v2162_v23  ;;  %v2344_v17 = vpop.permute.xlu1 %2343 }
 0x255   :  { %v2172_v58 = vmul.f32 0.25, %v2164_v51 }
 0x257   :  { %v2194_v16 = vsel %vm1946_vm0, %v2172_v58, 0.0  ;;  %v4433_v14 = vpop.permute.xlu1 %2353 }
 0x258   :  { %2195 = vadd.xlane.f32.xlu1 %v2194_v16 }
 0x25b   :  { %v4435_v13 = vpop.permute.xlu1 %2363 }
 0x269   :  { %2373 = vperm.xlu1 %3188, %v2339_v46  }
 0x28f   :  { %v2175_v26 = vpop.xlane.xlu0 %2174 }
 0x290   :  { %v2197_v32 = vmul.f32 0.010204081, %v2175_v26 }
 0x292   :  { %v2205_v21 = vadd.f32 1e-05, %v2197_v32 }
 0x294   :  { %3413 = vrsqrt.f32 %v2205_v21  ;;  %v2178_v35 = vpop.xlane.xlu1 %2177 }
 0x295   :  { %v2198_v48 = vmul.f32 0.010204081, %v2178_v35 }
 0x297   :  { %v2206_v59 = vadd.f32 1e-05, %v2198_v48 }
 0x298   :  { %v2181_v41 = vpop.xlane.xlu0 %2180 }
 0x299   :  { %3415 = vrsqrt.f32 %v2206_v59  ;;  %v2199_v55 = vmul.f32 0.010204081, %v2181_v41 }
 0x29b   :  { %v2207_v56 = vadd.f32 1e-05, %v2199_v55 }
 0x29d   :  { %3417 = vrsqrt.f32 %v2207_v56  ;;  %v2184_v0 = vpop.xlane.xlu1 %2183 }
 0x29e   :  { %v3414_v38 = vpop.eup %3413  ;;  %v2200_v1 = vmul.f32 0.010204081, %v2184_v0 }
 0x29f   :  { %v2221_v23 = vmul.f32 %v3414_v38, %v4210_v60  ;;  %v2229_v50 = vmul.f32 %v3414_v38, %v4213_v61  ;;  %v2237_v51 = vmul.f32 %v3414_v38, %v4216_v63  ;;  %v2245_v58 = vmul.f32 %v3414_v38, %v4219_v3 }
 0x2a0   :  { %v2208_v16 = vadd.f32 1e-05, %v2200_v1 }
 0x2a1   :  { %v2301_v46 = vmul.f32 %v2264_v9, %v2221_v23  ;;  %v2309_v26 = vmul.f32 %v2264_v9, %v2229_v50  ;;  %v2317_v32 = vmul.f32 %v2264_v9, %v2237_v51  ;;  %v2325_v21 = vmul.f32 %v2264_v9, %v2245_v58 }
 0x2a2   :  { %3419 = vrsqrt.f32 %v2208_v16 }
 0x2a3   :  { %v3416_v35 = vpop.eup %3415  ;;  %v2381_v48 = vadd.f32 %v2344_v17, %v2301_v46  ;;  %v2389_v59 = vadd.f32 %v2344_v17, %v2309_v26  ;;  %v2397_v41 = vadd.f32 %v2344_v17, %v2317_v32  ;;  %v2405_v55 = vadd.f32 %v2344_v17, %v2325_v21 }
 0x2a4   :  { %v2222_v60 = vmul.f32 %v3416_v35, %v4228_v4  ;;  %v2230_v61 = vmul.f32 %v3416_v35, %v4231_v5  ;;  %v2238_v63 = vmul.f32 %v3416_v35, %v4234_v15  ;;  %v2246_v3 = vmul.f32 %v3416_v35, %v4241_v24 }
 0x2a5   :  { %v2413_v56 = vmax.f32 %v2381_v48, 0.0  ;;  %v2421_v0 = vmax.f32 %v2389_v59, 0.0  ;;  %v2429_v38 = vmax.f32 %v2397_v41, 0.0  ;;  %v2437_v1 = vmax.f32 %v2405_v55, 0.0 }
 0x2a6   :  { %v2302_v9 = vmul.f32 %v4384_v30, %v2222_v60  ;;  %v2310_v23 = vmul.f32 %v4384_v30, %v2230_v61  ;;  %v2318_v50 = vmul.f32 %v4384_v30, %v2238_v63  ;;  %v2326_v17 = vmul.f32 %v4384_v30, %v2246_v3 }
 0x2a7   :  { %v3418_v51 = vpop.eup %3417  ;;  %v2834_v4 = vpack.c.bf16 %v2413_v56, %v2413_v56  ;;  %v2842_v58 = vpack.c.bf16 %v2421_v0, %v2421_v0  ;;  %v2850_v5 = vpack.c.bf16 %v2429_v38, %v2429_v38  ;;  %v2858_v16 = vpack.c.bf16 %v2437_v1, %v2437_v1 }
 0x2a8   :  { %v2382_v15 = vadd.f32 %v2349_v7, %v2302_v9  ;;  %v2390_v46 = vadd.f32 %v2349_v7, %v2310_v23  ;;  %v2398_v24 = vadd.f32 %v2349_v7, %v2318_v50  ;;  %v2406_v26 = vadd.f32 %v2349_v7, %v2326_v17 }
 0x2a9   :  { %2574 = vst.msk [vmem:[%s4645_s4] sm:$0xf] %vm2573_vm1, %v2834_v4  ;;  %2582 = vst.msk [vmem:[%s4645_s4 + $0x20] sm:$0xf] %vm2573_vm1, %v2842_v58  ;;  %v2223_v30 = vmul.f32 %v3418_v51, %v4253_v33  ;;  %v2231_v7 = vmul.f32 %v3418_v51, %v4256_v36  ;;  %v2239_v32 = vmul.f32 %v3418_v51, %v4259_v34 }
 0x2aa   :  { %2590 = vst.msk [vmem:[%s4645_s4 + $0x40] sm:$0xf] %vm2573_vm1, %v2850_v5  ;;  %2598 = vst.msk [vmem:[%s4645_s4 + $0x60] sm:$0xf] %vm2573_vm1, %v2858_v16  ;;  %v2247_v21 = vmul.f32 %v3418_v51, %v4265_v25  ;;  %v2414_v35 = vmax.f32 %v2382_v15, 0.0  ;;  %v2422_v48 = vmax.f32 %v2390_v46, 0.0  ;;  %v2187_v46 = vpop.xlane.xlu0 %2186 }
 0x2ab   :  { %v2430_v59 = vmax.f32 %v2398_v24, 0.0  ;;  %v2438_v41 = vmax.f32 %v2406_v26, 0.0  ;;  %v2303_v55 = vmul.f32 %v4389_v52, %v2223_v30  ;;  %v2311_v60 = vmul.f32 %v4389_v52, %v2231_v7 }
 0x2ac   :  { %v2319_v61 = vmul.f32 %v4389_v52, %v2239_v32  ;;  %v2327_v63 = vmul.f32 %v4389_v52, %v2247_v21  ;;  %v3420_v3 = vpop.eup %3419  ;;  %v2835_v33 = vpack.c.bf16 %v2414_v35, %v2414_v35  ;;  %v2843_v56 = vpack.c.bf16 %v2422_v48, %v2422_v48 }
 0x2ad   :  { %v2851_v36 = vpack.c.bf16 %v2430_v59, %v2430_v59  ;;  %v2859_v0 = vpack.c.bf16 %v2438_v41, %v2438_v41  ;;  %v2383_v34 = vadd.f32 %v4433_v14, %v2303_v55  ;;  %v2391_v25 = vadd.f32 %v4433_v14, %v2311_v60 }
 0x2ae   :  { %v2399_v38 = vadd.f32 %v4433_v14, %v2319_v61  ;;  %v2407_v1 = vadd.f32 %v4433_v14, %v2327_v63  ;;  %2575 = vst.msk [vmem:[%s4645_s4 + $0x4] sm:$0xf] %vm2573_vm1, %v2835_v33  ;;  %2583 = vst.msk [vmem:[%s4645_s4 + $0x24] sm:$0xf] %vm2573_vm1, %v2843_v56  ;;  %v2224_v52 = vmul.f32 %v3420_v3, %v4275_v54  ;;  %v2190_v54 = vpop.xlane.xlu1 %2189 }
 0x2af   :  { %2591 = vst.msk [vmem:[%s4645_s4 + $0x44] sm:$0xf] %vm2573_vm1, %v2851_v36  ;;  %2599 = vst.msk [vmem:[%s4645_s4 + $0x64] sm:$0xf] %vm2573_vm1, %v2859_v0  ;;  %v2232_v14 = vmul.f32 %v3420_v3, %v4278_v57  ;;  %v2240_v9 = vmul.f32 %v3420_v3, %v4282_v2  ;;  %v2248_v23 = vmul.f32 %v3420_v3, %v4291_v28  ;;  %v2415_v50 = vmax.f32 %v2383_v34, 0.0 }
 0x2b0   :  { %v2423_v17 = vmax.f32 %v2391_v25, 0.0  ;;  %v2431_v51 = vmax.f32 %v2399_v38, 0.0  ;;  %v2439_v4 = vmax.f32 %v2407_v1, 0.0  ;;  %v2304_v58 = vmul.f32 %v4391_v53, %v2224_v52 }
 0x2b1   :  { %v2312_v5 = vmul.f32 %v4391_v53, %v2232_v14  ;;  %v2320_v16 = vmul.f32 %v4391_v53, %v2240_v9  ;;  %v2328_v15 = vmul.f32 %v4391_v53, %v2248_v23  ;;  %v2836_v24 = vpack.c.bf16 %v2415_v50, %v2415_v50 }
 0x2b2   :  { %v2844_v57 = vpack.c.bf16 %v2423_v17, %v2423_v17  ;;  %v2852_v26 = vpack.c.bf16 %v2431_v51, %v2431_v51  ;;  %v2860_v2 = vpack.c.bf16 %v2439_v4, %v2439_v4  ;;  %v2384_v28 = vadd.f32 %v4429_v31, %v2304_v58 }
 0x2b3   :  { %v2392_v30 = vadd.f32 %v4429_v31, %v2312_v5  ;;  %v2400_v7 = vadd.f32 %v4429_v31, %v2320_v16  ;;  %v2408_v32 = vadd.f32 %v4429_v31, %v2328_v15  ;;  %2576 = vst.msk [vmem:[%s4645_s4 + $0x8] sm:$0xf] %vm2573_vm1, %v2836_v24  ;;  %v2201_v53 = vmul.f32 0.010204081, %v2187_v46 }
 0x2b4   :  { %2584 = vst.msk [vmem:[%s4645_s4 + $0x28] sm:$0xf] %vm2573_vm1, %v2844_v57  ;;  %2592 = vst.msk [vmem:[%s4645_s4 + $0x48] sm:$0xf] %vm2573_vm1, %v2852_v26  ;;  %v2202_v31 = vmul.f32 0.010204081, %v2190_v54 }
 0x2b5   :  { %2600 = vst.msk [vmem:[%s4645_s4 + $0x68] sm:$0xf] %vm2573_vm1, %v2860_v2  ;;  %v2416_v21 = vmax.f32 %v2384_v28, 0.0  ;;  %v2424_v35 = vmax.f32 %v2392_v30, 0.0  ;;  %v2432_v48 = vmax.f32 %v2400_v7, 0.0  ;;  %v2440_v59 = vmax.f32 %v2408_v32, 0.0 }
 0x2b6   :  { %v2209_v41 = vadd.f32 1e-05, %v2201_v53  ;;  %v2210_v55 = vadd.f32 1e-05, %v2202_v31 }
 0x2b7   :  { %v2837_v60 = vpack.c.bf16 %v2416_v21, %v2416_v21  ;;  %v2845_v61 = vpack.c.bf16 %v2424_v35, %v2424_v35  ;;  %v2853_v63 = vpack.c.bf16 %v2432_v48, %v2432_v48  ;;  %v2861_v3 = vpack.c.bf16 %v2440_v59, %v2440_v59 }
 0x2b8   :  { %3421 = vrsqrt.f32 %v2209_v41 }
 0x2b9   :  { %2577 = vst.msk [vmem:[%s4645_s4 + $0xc] sm:$0xf] %vm2573_vm1, %v2837_v60  ;;  %2585 = vst.msk [vmem:[%s4645_s4 + $0x2c] sm:$0xf] %vm2573_vm1, %v2845_v61  ;;  %3423 = vrsqrt.f32 %v2210_v55 }
 0x2ba   :  { %2593 = vst.msk [vmem:[%s4645_s4 + $0x4c] sm:$0xf] %vm2573_vm1, %v2853_v63  ;;  %2601 = vst.msk [vmem:[%s4645_s4 + $0x6c] sm:$0xf] %vm2573_vm1, %v2861_v3 }
 0x2c2   :  { %v3422_v33 = vpop.eup %3421 }
 0x2c3   :  { %v3424_v56 = vpop.eup %3423  ;;  %v2225_v36 = vmul.f32 %v3422_v33, %v4296_v6  ;;  %v2233_v0 = vmul.f32 %v3422_v33, %v4299_v8  ;;  %v2241_v34 = vmul.f32 %v3422_v33, %v4302_v29  ;;  %v2249_v25 = vmul.f32 %v3422_v33, %v4325_v20 }
 0x2c4   :  { %v2226_v38 = vmul.f32 %v3424_v56, %v4309_v42  ;;  %v2234_v1 = vmul.f32 %v3424_v56, %v4312_v39  ;;  %v2242_v52 = vmul.f32 %v3424_v56, %v4321_v49  ;;  %v2250_v14 = vmul.f32 %v3424_v56, %v4335_v12 }
 0x2c5   :  { %v2305_v9 = vmul.f32 %v4393_v40, %v2225_v36  ;;  %v2313_v23 = vmul.f32 %v4393_v40, %v2233_v0  ;;  %v2321_v6 = vmul.f32 %v4393_v40, %v2241_v34  ;;  %v2329_v8 = vmul.f32 %v4393_v40, %v2249_v25 }
 0x2c6   :  { %v2306_v29 = vmul.f32 %v4395_v62, %v2226_v38  ;;  %v2314_v20 = vmul.f32 %v4395_v62, %v2234_v1  ;;  %v2322_v42 = vmul.f32 %v4395_v62, %v2242_v52  ;;  %v2330_v39 = vmul.f32 %v4395_v62, %v2250_v14 }
 0x2c7   :  { %v2385_v49 = vadd.f32 %v4435_v13, %v2305_v9  ;;  %v2393_v12 = vadd.f32 %v4435_v13, %v2313_v23  ;;  %v2401_v50 = vadd.f32 %v4435_v13, %v2321_v6  ;;  %v2409_v17 = vadd.f32 %v4435_v13, %v2329_v8 }
 0x2c8   :  { %v2386_v51 = vadd.f32 %v4431_v18, %v2306_v29  ;;  %v2394_v40 = vadd.f32 %v4431_v18, %v2314_v20  ;;  %v2402_v4 = vadd.f32 %v4431_v18, %v2322_v42  ;;  %v2410_v58 = vadd.f32 %v4431_v18, %v2330_v39  ;;  %v2193_v18 = vpop.xlane.xlu0 %2192 }
 0x2c9   :  { %v2417_v5 = vmax.f32 %v2385_v49, 0.0  ;;  %v2425_v16 = vmax.f32 %v2393_v12, 0.0  ;;  %v2433_v15 = vmax.f32 %v2401_v50, 0.0  ;;  %v2441_v62 = vmax.f32 %v2409_v17, 0.0 }
 0x2ca   :  { %v2418_v46 = vmax.f32 %v2386_v51, 0.0  ;;  %v2426_v54 = vmax.f32 %v2394_v40, 0.0  ;;  %v2434_v24 = vmax.f32 %v2402_v4, 0.0  ;;  %v2442_v57 = vmax.f32 %v2410_v58, 0.0 }
 0x2cb   :  { %v2838_v26 = vpack.c.bf16 %v2417_v5, %v2417_v5  ;;  %v2846_v2 = vpack.c.bf16 %v2425_v16, %v2425_v16  ;;  %v2854_v28 = vpack.c.bf16 %v2433_v15, %v2433_v15  ;;  %v2862_v13 = vpack.c.bf16 %v2441_v62, %v2441_v62 }
 0x2cc   :  { %v2839_v30 = vpack.c.bf16 %v2418_v46, %v2418_v46  ;;  %v2847_v7 = vpack.c.bf16 %v2426_v54, %v2426_v54  ;;  %v2855_v32 = vpack.c.bf16 %v2434_v24, %v2434_v24  ;;  %v2863_v53 = vpack.c.bf16 %v2442_v57, %v2442_v57  ;;  %v2379_v50 = vpop.permute.xlu0 %2378 }
 0x2cd   :  { %2578 = vst.msk [vmem:[%s4645_s4 + $0x10] sm:$0xf] %vm2573_vm1, %v2838_v26  ;;  %2586 = vst.msk [vmem:[%s4645_s4 + $0x30] sm:$0xf] %vm2573_vm1, %v2846_v2  ;;  %v2203_v31 = vmul.f32 0.010204081, %v2193_v18 }
 0x2ce   :  { %2594 = vst.msk [vmem:[%s4645_s4 + $0x50] sm:$0xf] %vm2573_vm1, %v2854_v28  ;;  %2602 = vst.msk [vmem:[%s4645_s4 + $0x70] sm:$0xf] %vm2573_vm1, %v2862_v13 }
 0x2cf   :  { %2579 = vst.msk [vmem:[%s4645_s4 + $0x14] sm:$0xf] %vm2573_vm1, %v2839_v30  ;;  %2587 = vst.msk [vmem:[%s4645_s4 + $0x34] sm:$0xf] %vm2573_vm1, %v2847_v7  ;;  %v2211_v21 = vadd.f32 1e-05, %v2203_v31 }
 0x2d0   :  { %2595 = vst.msk [vmem:[%s4645_s4 + $0x54] sm:$0xf] %vm2573_vm1, %v2855_v32  ;;  %2603 = vst.msk [vmem:[%s4645_s4 + $0x74] sm:$0xf] %vm2573_vm1, %v2863_v53 }
 0x2d1   :  { %3425 = vrsqrt.f32 %v2211_v21 }
 0x2db   :  { %v3426_v35 = vpop.eup %3425 }
 0x2dc   :  { %v2227_v48 = vmul.f32 %v3426_v35, %v4343_v27  ;;  %v2235_v59 = vmul.f32 %v3426_v35, %v4346_v22  ;;  %v2243_v41 = vmul.f32 %v3426_v35, %v4350_v19  ;;  %v2251_v60 = vmul.f32 %v3426_v35, %v4361_v37 }
 0x2de   :  { %v2307_v3 = vmul.f32 %v4425_v10, %v2227_v48  ;;  %v2315_v33 = vmul.f32 %v4425_v10, %v2235_v59  ;;  %v2323_v56 = vmul.f32 %v4425_v10, %v2243_v41  ;;  %v2331_v0 = vmul.f32 %v4425_v10, %v2251_v60 }
 0x2e5   :  { %v2196_v55 = vpop.xlane.xlu1 %2195 }
 0x2e6   :  { %v2204_v61 = vmul.f32 0.010204081, %v2196_v55 }
 0x2e8   :  { %v2212_v63 = vadd.f32 1e-05, %v2204_v61 }
 0x2e9   :  { %v2374_v36 = vpop.permute.xlu1 %2373 }
 0x2ea   :  { %3427 = vrsqrt.f32 %v2212_v63  ;;  %v2387_v27 = vadd.f32 %v2374_v36, %v2307_v3  ;;  %v2395_v34 = vadd.f32 %v2374_v36, %v2315_v33  ;;  %v2403_v22 = vadd.f32 %v2374_v36, %v2323_v56 }
 0x2eb   :  { %v2411_v25 = vadd.f32 %v2374_v36, %v2331_v0 }
 0x2ec   :  { %v2419_v19 = vmax.f32 %v2387_v27, 0.0  ;;  %v2427_v38 = vmax.f32 %v2395_v34, 0.0  ;;  %v2435_v1 = vmax.f32 %v2403_v22, 0.0 }
 0x2ed   :  { %v2443_v37 = vmax.f32 %v2411_v25, 0.0 }
 0x2ee   :  { %v2840_v52 = vpack.c.bf16 %v2419_v19, %v2419_v19  ;;  %v2848_v14 = vpack.c.bf16 %v2427_v38, %v2427_v38  ;;  %v2856_v9 = vpack.c.bf16 %v2435_v1, %v2435_v1 }
 0x2ef   :  { %v2864_v23 = vpack.c.bf16 %v2443_v37, %v2443_v37 }
 0x2f0   :  { %2580 = vst.msk [vmem:[%s4645_s4 + $0x18] sm:$0xf] %vm2573_vm1, %v2840_v52  ;;  %2588 = vst.msk [vmem:[%s4645_s4 + $0x38] sm:$0xf] %vm2573_vm1, %v2848_v14 }
 0x2f1   :  { %2596 = vst.msk [vmem:[%s4645_s4 + $0x58] sm:$0xf] %vm2573_vm1, %v2856_v9  ;;  %2604 = vst.msk [vmem:[%s4645_s4 + $0x78] sm:$0xf] %vm2573_vm1, %v2864_v23 }
 0x2f4   :  { %v3428_v10 = vpop.eup %3427 }
 0x2f5   :  { %v2228_v6 = vmul.f32 %v3428_v10, %v4398_v44  ;;  %v2236_v8 = vmul.f32 %v3428_v10, %v4401_v43  ;;  %v2244_v29 = vmul.f32 %v3428_v10, %v4404_v45  ;;  %v2252_v20 = vmul.f32 %v3428_v10, %v4407_v47 }
 0x2f7   :  { %v2308_v42 = vmul.f32 %v4427_v11, %v2228_v6  ;;  %v2316_v39 = vmul.f32 %v4427_v11, %v2236_v8  ;;  %v2324_v49 = vmul.f32 %v4427_v11, %v2244_v29  ;;  %v2332_v12 = vmul.f32 %v4427_v11, %v2252_v20 }
 0x2f9   :  { %v2388_v17 = vadd.f32 %v2379_v50, %v2308_v42  ;;  %v2396_v51 = vadd.f32 %v2379_v50, %v2316_v39  ;;  %v2404_v40 = vadd.f32 %v2379_v50, %v2324_v49  ;;  %v2412_v4 = vadd.f32 %v2379_v50, %v2332_v12 }
 0x2fb   :  { %v2420_v44 = vmax.f32 %v2388_v17, 0.0  ;;  %v2428_v58 = vmax.f32 %v2396_v51, 0.0  ;;  %v2436_v43 = vmax.f32 %v2404_v40, 0.0  ;;  %v2444_v5 = vmax.f32 %v2412_v4, 0.0 }
 0x2fd   :  { %v2841_v45 = vpack.c.bf16 %v2420_v44, %v2420_v44  ;;  %v2849_v16 = vpack.c.bf16 %v2428_v58, %v2428_v58  ;;  %v2857_v47 = vpack.c.bf16 %v2436_v43, %v2436_v43  ;;  %v2865_v15 = vpack.c.bf16 %v2444_v5, %v2444_v5 }
 0x2ff   :  { %2581 = vst.msk [vmem:[%s4645_s4 + $0x1c] sm:$0xf] %vm2573_vm1, %v2841_v45  ;;  %2589 = vst.msk [vmem:[%s4645_s4 + $0x3c] sm:$0xf] %vm2573_vm1, %v2849_v16 }
 0x300   :  { %2597 = vst.msk [vmem:[%s4645_s4 + $0x5c] sm:$0xf] %vm2573_vm1, %v2857_v47  ;;  %2605 = vst.msk [vmem:[%s4645_s4 + $0x7c] sm:$0xf] %vm2573_vm1, %v2865_v15 }

// kernel: generator_forward.7
= control target key start
LH: loop header
LB: loop body
LE: loop exit
PB: predicated region body
PF: predicated region fallthrough
CT: control target
= control target key end

     0   :  { %s1018_s14 = smov 0   ;;  %s1122_s0 = inlined_call_operand.vmem [shape: bf16[4,256,392], index: 0, kind: input, shape index: {}]   ;;  %s1123_s1 = inlined_call_operand.vmem [shape: bf16[4,1,256], index: 1, kind: input, shape index: {}]   ;;  %s1124_s2 = inlined_call_operand.<no memory space> [shape: f32[1,1,1], index: 2, kind: input, shape index: {}]   ;;  %s1125_s3 = inlined_call_operand.vmem [shape: f32[4,1,392], index: 3, kind: output, shape index: {}]  }
   0x1   :  { %v8_v0 = vstv %s1124_s2 }
   0x2   :  { %9 = vst [vmem:[#allocation2] sm:$0x1] %v8_v0 }
   0x3 LB: > { %s793_s15 = sadd.s32 4294967295, %s991_s14   ;;  %p797_p0 = scmp.ge.s32.totalorder %s991_s14, 1  ;;  %s991_s14 = sphi %s1018_s14, %s15_s14  }
   0x4   : > { %p148_p1 = scmp.lt.s32.totalorder %s991_s14, 5 }
   0x6   : > { %p149_p2 = pnand %p797_p0, %p148_p1 }
   0x7   : > { %p175_p3 = scmp.lt.s32.totalorder (!%p149_p2), %s793_s15, 3  ;;  %v993_v2 = vmov (!%p149_p2), 0   ;;  %v259_v41 = vlaneseq (!%p149_p2)  ;;  %v994_v42 = vmov (!%p149_p2), 1966171168  }
   0x8   : > { %152 = sbr.rel (%p149_p2) target bundleno = 320 (0x140), region = 32  ;;  %880 = vset.pattern.permute.xlu0 (!%p149_p2), %v993_v2  ;;  %v273_v43 = vunpack.c.l.s4 (!%p149_p2), %v994_v42 }
   0x9   : > { %v253_v1 = vld [vmem:[#allocation2] sm:$0x1] (!%p149_p2)  ;;  %v1078_v48 = vshrl.u32 (!%p149_p2), %v259_v41, 7  ;;  %vm725_vm0 = vcmp.lt.s32.totalorder (!%p149_p2), %v259_v41, 392 }
   0xa   : > { %256 = vperm.xlu0 (!%p149_p2), %880, %v253_v1   ;;  %v274_v49 = vunpack.c.0.s8 (!%p149_p2), %v273_v43 }
   0xc   : > { %v1088_v54 = vsub.s32 (!%p149_p2), %v274_v49, %v1078_v48 }
   0xf   : > { %s1127_s15 = smov (!%p175_p3, %s793_s15), 3 }
  0x10   : > { %s869_s2 = sshll.u32 %s1127_s15, 9  ;;  %s800_s19 = sshll.u32 %s1127_s15, 1 }
  0x11   : > { %s1032_s18 = scalar_lea.vmem %s1122_s0, %s869_s2  ;;  %s183_s22 = scalar_lea.vmem %s1123_s1, %s800_s19 }
  0x12   : > { %v881_v3 = vld [vmem:[%s1032_s18 + $0x4] ss:$16 sps:$4 sm:$0xff]   ;;  %v883_v4 = vld [vmem:[%s1032_s18 + $0xc] ss:$16 sps:$4 sm:$0xff]   ;;  %v885_v5 = vld [vmem:[%s1032_s18] ss:$16 sps:$4 sm:$0xff]  }
  0x13   : > { %608 = vmatprep.subr.bf16.mxu0 %v881_v3  ;;  %v886_v6 = vld [vmem:[%s1032_s18 + $0x8] ss:$16 sps:$4 sm:$0xff]   ;;  %649 = vmatprep.subr.bf16.mxu1 %v883_v4  ;;  %v887_v7 = vld [vmem:[%s1032_s18 + $0x24] ss:$16 sps:$4 sm:$0xff]   ;;  %v889_v8 = vld [vmem:[%s1032_s18 + $0x2c] ss:$16 sps:$4 sm:$0xff]  }
  0x14   : > { %609 = vmatpush1.bf16.msra.mxu0 %v885_v5  ;;  %650 = vmatpush1.bf16.msra.mxu1 %v886_v6  ;;  %v891_v9 = vld [vmem:[%s1032_s18 + $0x20] ss:$16 sps:$4 sm:$0xff]   ;;  %v892_v10 = vld [vmem:[%s1032_s18 + $0x28] ss:$16 sps:$4 sm:$0xff]   ;;  %v893_v11 = vld [vmem:[%s1032_s18 + $0x44] ss:$16 sps:$4 sm:$0xff]  }
  0x15   : > { %610 = vmatprep.subr.bf16.mxu0 %v887_v7  ;;  %651 = vmatprep.subr.bf16.mxu1 %v889_v8  ;;  %v895_v12 = vld [vmem:[%s1032_s18 + $0x4c] ss:$16 sps:$4 sm:$0xff]   ;;  %v897_v13 = vld [vmem:[%s1032_s18 + $0x40] ss:$16 sps:$4 sm:$0xff]   ;;  %v898_v14 = vld [vmem:[%s1032_s18 + $0x48] ss:$16 sps:$4 sm:$0xff]  }
  0x16   : > { %v899_v15 = vld [vmem:[%s1032_s18 + $0x64] ss:$16 sps:$4 sm:$0xff]   ;;  %v901_v16 = vld [vmem:[%s1032_s18 + $0x6c] ss:$16 sps:$4 sm:$0xff]   ;;  %v903_v17 = vld [vmem:[%s1032_s18 + $0x60] ss:$16 sps:$4 sm:$0xff]  }
  0x17   : > { %v904_v18 = vld [vmem:[%s1032_s18 + $0x68] ss:$16 sps:$4 sm:$0xff]   ;;  %v905_v19 = vld [vmem:[%s1032_s18 + $0x84] ss:$16 sps:$4 sm:$0xff]   ;;  %v907_v20 = vld [vmem:[%s1032_s18 + $0x8c] ss:$16 sps:$4 sm:$0xff]  }
  0x18   : > { %611 = vmatpush1.bf16.msra.mxu0 %v891_v9  ;;  %652 = vmatpush1.bf16.msra.mxu1 %v892_v10  ;;  %v909_v21 = vld [vmem:[%s1032_s18 + $0x80] ss:$16 sps:$4 sm:$0xff]   ;;  %v910_v22 = vld [vmem:[%s1032_s18 + $0x88] ss:$16 sps:$4 sm:$0xff]   ;;  %v911_v23 = vld [vmem:[%s1032_s18 + $0xa4] ss:$16 sps:$4 sm:$0xff]  }
  0x19   : > { %612 = vmatprep.subr.bf16.mxu0 %v893_v11  ;;  %653 = vmatprep.subr.bf16.mxu1 %v895_v12  ;;  %v913_v24 = vld [vmem:[%s1032_s18 + $0xac] ss:$16 sps:$4 sm:$0xff]   ;;  %v915_v25 = vld [vmem:[%s1032_s18 + $0xa0] ss:$16 sps:$4 sm:$0xff]   ;;  %v916_v26 = vld [vmem:[%s1032_s18 + $0xa8] ss:$16 sps:$4 sm:$0xff]  }
  0x1a   : > { %v917_v27 = vld [vmem:[%s1032_s18 + $0xc4] ss:$16 sps:$4 sm:$0xff]   ;;  %v919_v28 = vld [vmem:[%s1032_s18 + $0xcc] ss:$16 sps:$4 sm:$0xff]   ;;  %v921_v29 = vld [vmem:[%s1032_s18 + $0xc0] ss:$16 sps:$4 sm:$0xff]  }
  0x1b   : > { %v922_v30 = vld [vmem:[%s1032_s18 + $0xc8] ss:$16 sps:$4 sm:$0xff]   ;;  %v923_v31 = vld [vmem:[%s1032_s18 + $0xe4] ss:$16 sps:$4 sm:$0xff]   ;;  %v925_v32 = vld [vmem:[%s1032_s18 + $0xec] ss:$16 sps:$4 sm:$0xff]  }
  0x1c   : > { %613 = vmatpush1.bf16.msra.mxu0 %v897_v13  ;;  %654 = vmatpush1.bf16.msra.mxu1 %v898_v14  ;;  %v927_v33 = vld [vmem:[%s1032_s18 + $0xe0] ss:$16 sps:$4 sm:$0xff]   ;;  %v928_v34 = vld [vmem:[%s1032_s18 + $0xe8] ss:$16 sps:$4 sm:$0xff]   ;;  %v929_v35 = vld [vmem:[%s1032_s18 + $0x104] ss:$16 sps:$4 sm:$0xff]  }
  0x1d   : > { %614 = vmatprep.subr.bf16.mxu0 %v899_v15  ;;  %655 = vmatprep.subr.bf16.mxu1 %v901_v16  ;;  %v931_v36 = vld [vmem:[%s1032_s18 + $0x10c] ss:$16 sps:$4 sm:$0xff]   ;;  %v933_v37 = vld [vmem:[%s1032_s18 + $0x100] ss:$16 sps:$4 sm:$0xff]   ;;  %v934_v38 = vld [vmem:[%s1032_s18 + $0x108] ss:$16 sps:$4 sm:$0xff]  }
  0x1e   : > { %v935_v39 = vld [vmem:[%s1032_s18 + $0x124] ss:$16 sps:$4 sm:$0xff]   ;;  %v937_v40 = vld [vmem:[%s1032_s18 + $0x12c] ss:$16 sps:$4 sm:$0xff]   ;;  %v939_v44 = vld [vmem:[%s1032_s18 + $0x120] ss:$16 sps:$4 sm:$0xff]  }
  0x1f   : > { %v940_v45 = vld [vmem:[%s1032_s18 + $0x128] ss:$16 sps:$4 sm:$0xff]   ;;  %v941_v46 = vld [vmem:[%s1032_s18 + $0x144] ss:$16 sps:$4 sm:$0xff]   ;;  %v943_v47 = vld [vmem:[%s1032_s18 + $0x14c] ss:$16 sps:$4 sm:$0xff]  }
  0x20   : > { %615 = vmatpush1.bf16.msra.mxu0 %v903_v17  ;;  %656 = vmatpush1.bf16.msra.mxu1 %v904_v18  ;;  %v945_v50 = vld [vmem:[%s1032_s18 + $0x140] ss:$16 sps:$4 sm:$0xff]   ;;  %v946_v51 = vld [vmem:[%s1032_s18 + $0x148] ss:$16 sps:$4 sm:$0xff]   ;;  %v947_v52 = vld [vmem:[%s1032_s18 + $0x164] ss:$16 sps:$4 sm:$0xff]  }
  0x21   : > { %616 = vmatprep.subr.bf16.mxu0 %v905_v19  ;;  %657 = vmatprep.subr.bf16.mxu1 %v907_v20  ;;  %v949_v53 = vld [vmem:[%s1032_s18 + $0x16c] ss:$16 sps:$4 sm:$0xff]   ;;  %v802_v55 = vld.sshfl [vmem:[%s183_s22] sm:$0x11 pattern:$0x75316420] }
  0x22   : > { %v951_v56 = vld [vmem:[%s1032_s18 + $0x160] ss:$16 sps:$4 sm:$0xff]   ;;  %v952_v57 = vld [vmem:[%s1032_s18 + $0x168] ss:$16 sps:$4 sm:$0xff]   ;;  %v271_v58 = vcombine.high %v802_v55, %v802_v55  ;;  %v953_v59 = vld [vmem:[%s1032_s18 + $0x184] ss:$16 sps:$4 sm:$0xff]   ;;  %v278_v12 = vrot.slane %v802_v55, %v1088_v54 }
  0x23   : > { %v955_v60 = vld [vmem:[%s1032_s18 + $0x18c] ss:$16 sps:$4 sm:$0xff]   ;;  %v957_v62 = vld [vmem:[%s1032_s18 + $0x180] ss:$16 sps:$4 sm:$0xff]   ;;  %v958_v63 = vld [vmem:[%s1032_s18 + $0x188] ss:$16 sps:$4 sm:$0xff]  }
  0x24   : > { %617 = vmatpush1.bf16.msra.mxu0 %v909_v21  ;;  %658 = vmatpush1.bf16.msra.mxu1 %v910_v22  ;;  %v285_v61 = vrot.slane %v271_v58, %v1088_v54  ;;  %v959_v0 = vld [vmem:[%s1032_s18 + $0x1a4] ss:$16 sps:$4 sm:$0xff]   ;;  %v961_v1 = vld [vmem:[%s1032_s18 + $0x1ac] ss:$16 sps:$4 sm:$0xff]   ;;  %v963_v2 = vld [vmem:[%s1032_s18 + $0x1a0] ss:$16 sps:$4 sm:$0xff]  }
  0x25   : > { %618 = vmatprep.subr.bf16.mxu0 %v911_v23  ;;  %659 = vmatprep.subr.bf16.mxu1 %v913_v24  ;;  %v964_v3 = vld [vmem:[%s1032_s18 + $0x1a8] ss:$16 sps:$4 sm:$0xff]   ;;  %v965_v4 = vld [vmem:[%s1032_s18 + $0x1c4] ss:$16 sps:$4 sm:$0xff]   ;;  %v967_v5 = vld [vmem:[%s1032_s18 + $0x1cc] ss:$16 sps:$4 sm:$0xff]  }
  0x26   : > { %640 = vmatprep.mubr.bf16.mxu0 %v285_v61  ;;  %681 = vmatprep.mubr.bf16.mxu1 %v285_v61  ;;  %v969_v6 = vld [vmem:[%s1032_s18 + $0x1c0] ss:$16 sps:$4 sm:$0xff]   ;;  %v970_v7 = vld [vmem:[%s1032_s18 + $0x1c8] ss:$16 sps:$4 sm:$0xff]   ;;  %v971_v8 = vld [vmem:[%s1032_s18 + $0x1e4] ss:$16 sps:$4 sm:$0xff]  }
  0x27   : > { %v973_v9 = vld [vmem:[%s1032_s18 + $0x1ec] ss:$16 sps:$4 sm:$0xff]   ;;  %v975_v10 = vld [vmem:[%s1032_s18 + $0x1e0] ss:$16 sps:$4 sm:$0xff]   ;;  %v976_v11 = vld [vmem:[%s1032_s18 + $0x1e8] ss:$16 sps:$4 sm:$0xff]  }
  0x28   : > { %619 = vmatpush1.bf16.msra.mxu0 %v915_v25  ;;  %660 = vmatpush1.bf16.msra.mxu1 %v916_v26  ;;  %v261_v13 = vsub.s32 0, %v1078_v48  ;;  %s801_s23 = sshll.u32 %s1127_s15, 2 }
  0x29   : > { %620 = vmatprep.subr.bf16.mxu0 %v917_v27  ;;  %661 = vmatprep.subr.bf16.mxu1 %v919_v28  ;;  %s187_s26 = scalar_lea.vmem %s1125_s3, %s801_s23 }
  0x2c   : > { %621 = vmatpush1.bf16.msra.mxu0 %v921_v29  ;;  %662 = vmatpush1.bf16.msra.mxu1 %v922_v30 }
  0x2d   : > { %622 = vmatprep.subr.bf16.mxu0 %v923_v31  ;;  %663 = vmatprep.subr.bf16.mxu1 %v925_v32 }
  0x30   : > { %623 = vmatpush1.bf16.msra.mxu0 %v927_v33  ;;  %664 = vmatpush1.bf16.msra.mxu1 %v928_v34 }
  0x31   : > { %624 = vmatprep.subr.bf16.mxu0 %v929_v35  ;;  %665 = vmatprep.subr.bf16.mxu1 %v931_v36 }
  0x34   : > { %625 = vmatpush1.bf16.msra.mxu0 %v933_v37  ;;  %666 = vmatpush1.bf16.msra.mxu1 %v934_v38 }
  0x35   : > { %626 = vmatprep.subr.bf16.mxu0 %v935_v39  ;;  %667 = vmatprep.subr.bf16.mxu1 %v937_v40 }
  0x38   : > { %627 = vmatpush1.bf16.msra.mxu0 %v939_v44  ;;  %668 = vmatpush1.bf16.msra.mxu1 %v940_v45 }
  0x39   : > { %628 = vmatprep.subr.bf16.mxu0 %v941_v46  ;;  %669 = vmatprep.subr.bf16.mxu1 %v943_v47 }
  0x3c   : > { %629 = vmatpush1.bf16.msra.mxu0 %v945_v50  ;;  %670 = vmatpush1.bf16.msra.mxu1 %v946_v51 }
  0x3d   : > { %630 = vmatprep.subr.bf16.mxu0 %v947_v52  ;;  %671 = vmatprep.subr.bf16.mxu1 %v949_v53 }
  0x40   : > { %631 = vmatpush1.bf16.msra.mxu0 %v951_v56  ;;  %672 = vmatpush1.bf16.msra.mxu1 %v952_v57 }
  0x41   : > { %632 = vmatprep.subr.bf16.mxu0 %v953_v59  ;;  %673 = vmatprep.subr.bf16.mxu1 %v955_v60 }
  0x44   : > { %633 = vmatpush1.bf16.msra.mxu0 %v957_v62  ;;  %674 = vmatpush1.bf16.msra.mxu1 %v958_v63 }
  0x45   : > { %634 = vmatprep.subr.bf16.mxu0 %v959_v0  ;;  %675 = vmatprep.subr.bf16.mxu1 %v961_v1 }
  0x48   : > { %635 = vmatpush1.bf16.msra.mxu0 %v963_v2  ;;  %676 = vmatpush1.bf16.msra.mxu1 %v964_v3 }
  0x49   : > { %636 = vmatprep.subr.bf16.mxu0 %v965_v4  ;;  %677 = vmatprep.subr.bf16.mxu1 %v967_v5 }
  0x4c   : > { %637 = vmatpush1.bf16.msra.mxu0 %v969_v6  ;;  %678 = vmatpush1.bf16.msra.mxu1 %v970_v7 }
  0x4d   : > { %638 = vmatprep.subr.bf16.mxu0 %v971_v8  ;;  %679 = vmatprep.subr.bf16.mxu1 %v973_v9 }
  0x50   : > { %639 = vmatpush1.bf16.msra.mxu0 %v975_v10  ;;  %680 = vmatpush1.bf16.msra.mxu1 %v976_v11 }
  0x53   : > { %641 = vmatmul.mubr.bf16.vlgmr.msra.gmra.mrb[0].mxu0 %v278_v12  ;;  %682 = vmatmul.mubr.bf16.vlgmr.msra.gmra.mrb[0].mxu1 %v278_v12 }
  0x89   : > { %v257_v14 = vpop.permute.xlu0 %256 }
  0x8a   : > { %v262_v15 = vrot.slane %v257_v14, %v261_v13 }
 0x126   : > { %v642_v16 = vpop.f32.mrb[0].mxu0  ;;  %v683_v17 = vpop.f32.mrb[0].mxu1 }
 0x127   : > { %v643_v18 = vadd.f32 %v642_v16, %v262_v15  ;;  %v684_v19 = vadd.f32 %v683_v17, %v262_v15  ;;  %v644_v20 = vpop.f32.mrb[1].mxu0  ;;  %v685_v21 = vpop.f32.mrb[1].mxu1 }
 0x128   : > { %v645_v22 = vadd.f32 %v644_v20, %v262_v15  ;;  %v686_v23 = vadd.f32 %v685_v21, %v262_v15  ;;  %v646_v24 = vpop.f32.mrb[2].mxu0  ;;  %v687_v25 = vpop.f32.mrb[2].mxu1 }
 0x129   : > { %977 = vtanh.f32 %v643_v18  ;;  %v647_v26 = vpop.f32.mrb[3].mxu0  ;;  %v688_v27 = vpop.f32.mrb[3].mxu1 }
 0x12a   : > { %979 = vtanh.f32 %v684_v19 }
 0x12b   : > { %981 = vtanh.f32 %v645_v22 }
 0x12c   : > { %983 = vtanh.f32 %v686_v23 }
 0x133   : > { %v978_v28 = vpop.eup %977 }
 0x134   : > { %v980_v29 = vpop.eup %979 }
 0x135   : > { %v982_v30 = vpop.eup %981 }
 0x136   : > { %v984_v31 = vpop.eup %983  ;;  %v698_v32 = vcombine.low %v978_v28, %v982_v30 }
 0x137   : > { %v699_v33 = vcombine.low %v980_v29, %v984_v31 }
 0x138   : > { %v706_v34 = vrot.slane %v698_v32, %v1088_v54 }
 0x139   : > { %v713_v35 = vrot.slane %v699_v33, %v1088_v54 }
 0x13b   : > { %v714_v36 = vcombine.low %v706_v34, %v713_v35 }
 0x13d   : > { %v721_v37 = vrot.slane %v714_v36, %v1088_v54 }
 0x13f   : > { %727 = vst.msk [vmem:[%s187_s26] sm:$0xf] %vm725_vm0, %v721_v37 }
 0x140 PF: > { %s15_s14 = sadd.s32 1, %s991_s14  }
 0x141   : > { %p12_p4 = scmp.ge.s32.totalorder %s15_s14, 6  }
 0x143   :  { %14 = sbr.rel (!%p12_p4) target bundleno = 3 (0x3), region = 65 }

</bundles_post_ra>
